<compile_context>
chip_gen: v5e
topology: v5e:2x2
jax: 0.10.0
libtpu: 0.0.40
codegen_flags: <defaults>
</compile_context>

<pallas_src>
import functools

import jax
import jax.numpy as jnp
import numpy as np
from jax import lax
from jax.experimental import pallas as pl
from jax.experimental.pallas import tpu as pltpu


def _round_up(x, m):
    return ((x + m - 1) // m) * m


def _ncc_kernel(nT_ref, tE_ref, mu_ref, img_ref, out_ref, p_sc, psq_sc, *,
                h, w, RT, n_tiles, OW_pad, TB):
    """One grid step == TB batch elements.

    nT_ref : SMEM (B*h*w,)           zero-mean templates, flattened row-major
    tE_ref : SMEM (B,)               template energies sum(nT**2)
    mu_ref : SMEM (B,)               per-batch image means (subtracted in-kernel)
    img_ref: VMEM (TB, Hk, W_pad)    raw (NOT mean-subtracted), zero-padded images
    out_ref: VMEM (TB, OH_pad, OW_pad)
    p_sc/psq_sc: VMEM (RT+h-1, OW_pad) staging scratch
    """
    g = pl.program_id(0)
    inv_hw = 1.0 / float(h * w)
    halo = RT + h - 1

    def one_image(i):
        b = g * TB + i
        mu = mu_ref[b]
        tE = tE_ref[b]
        base = b * (h * w)
        for t in range(n_tiles):                     # static row tiles
            r0 = t * RT                              # sublane-aligned (RT in {8,16})
            acc = None    # sum_window nO * nT   (correlation)
            rsum = None   # width-w sliding row sum of nO     (separable box sum)
            rsq = None    # width-w sliding row sum of nO**2
            for q in range(w):
                # Lane-shifted, mean-subtracted patch for this column offset:
                # built once per q directly from the ref (never the whole
                # image), staged through VMEM scratch so the p loop uses cheap
                # sublane-offset vector loads instead of value slices/rotates.
                patch = img_ref[i, r0:r0 + halo, q:q + OW_pad] - mu
                p_sc[...] = patch
                psq = patch * patch
                rsum = patch if rsum is None else rsum + patch
                rsq = psq if rsq is None else rsq + psq
                for p in range(h):
                    # coefficient is a flat-SMEM scalar (co-issues on scalar slots)
                    term = nT_ref[base + p * w + q] * p_sc[p:p + RT, :]
                    acc = term if acc is None else acc + term

            # height-h sublane pass completes the separable box sums
            p_sc[...] = rsum
            psq_sc[...] = rsq
            win = p_sc[0:RT, :]
            sq = psq_sc[0:RT, :]
            for p in range(1, h):
                win = win + p_sc[p:p + RT, :]
                sq = sq + psq_sc[p:p + RT, :]

            image = jnp.maximum(sq - (win * win) * inv_hw, 0.0)
            d = image * tE
            # rsqrt goes to the EUP (its own bundle slot); the d > 0 guard
            # replaces isfinite and never produces inf/NaN in the output.
            res = jnp.where(d > 0.0, acc * lax.rsqrt(d), 0.0)
            out_ref[i, r0:r0 + RT, :] = res

    if TB * n_tiles * h * w <= 2048:
        for i in range(TB):                          # small static unroll
            one_image(i)
    else:
        # Rolled batch loop keeps the instruction stream bounded when
        # TB * h * w gets large; dynamic img_ref[i]/out_ref[i] is supported.
        def body(i, carry):
            one_image(i)
            return carry
        lax.fori_loop(0, TB, body, 0)


def _vmem_budget():
    """~75% of this chip's per-core VMEM (leaves compiler/spill headroom)."""
    cap = 64 * 2**20  # conservative fallback (v7x per-TensorCore VMEM)
    try:
        info = pltpu.get_tpu_info()
        cap = int(getattr(info, "vmem_capacity_bytes", cap)) or cap
    except Exception:
        pass
    return int(0.75 * cap)


def _pick_tb(B, per_img_bytes, fixed_bytes, budget):
    """Largest TB whose double-buffered in+out blocks fit the VMEM budget,
    preferring >= 2 grid steps (pipelining + megacore sharding)."""
    def fits(tb):
        return 2 * tb * per_img_bytes + fixed_bytes + (2 << 20) <= budget

    divs = [d for d in range(B, 0, -1) if B % d == 0]
    for tb in divs:
        if B // tb >= 2 and fits(tb):
            return tb
    for tb in divs:
        if fits(tb):
            return tb
    return 1


def correlation(original, template):
    """Pallas implementation of Correlation.forward(original, template)."""
    original = original.astype(jnp.float32)
    template = template.astype(jnp.float32)
    B, H, W = original.shape
    Bt, h, w = template.shape
    assert B == Bt and h <= H and w <= W
    OH, OW = H - h + 1, W - w + 1

    # Lane-dense output; input width padded to a full 128-multiple so the
    # HBM->VMEM block DMA is row-dense and every q-shift stays in-tile.
    OW_pad = _round_up(OW, 128)
    W_pad = _round_up(OW_pad + w - 1, 128)
    # Row tiles: RT output sublanes per tile, (h-1)-row halo; output rows are
    # padded to a multiple of RT so every tile is full (garbage rows sliced off).
    RT = 8 if OH <= 8 else 16
    OH_pad = _round_up(OH, RT)
    n_tiles = OH_pad // RT
    H_kern = OH_pad + h - 1          # image rows the kernel needs (>= H)
    halo = RT + h - 1

    # Wrapper-side prep is tiny per-batch data only: zero-mean template table,
    # template energies and image means.  No full-size normalised image copy.
    nT = template - jnp.mean(template, axis=(1, 2), keepdims=True)
    tE = jnp.sum(nT * nT, axis=(1, 2))                       # (B,)
    nT_flat = nT.reshape(B * h * w)                          # flat 1-D SMEM table
    mu = jnp.mean(original, axis=(1, 2))                     # (B,) subtracted in-kernel

    img = jnp.pad(original, ((0, 0), (0, H_kern - H), (0, W_pad - W)))

    # Footprint-aware TB and VMEM limit.
    budget = _vmem_budget()
    per_img_bytes = 4 * (_round_up(H_kern, 8) * W_pad + OH_pad * OW_pad)
    scratch_bytes = 2 * 4 * _round_up(halo, 8) * OW_pad
    TB = _pick_tb(B, per_img_bytes, scratch_bytes, budget)
    G = B // TB

    needed = 2 * TB * per_img_bytes + scratch_bytes + (2 << 20)
    vmem_limit = max(needed, 32 * 2**20)
    if needed <= budget:
        vmem_limit = min(vmem_limit, budget)

    img_spec_kwargs = {}
    if h * w <= 8:
        # Tiny templates: compute per block is small, deepen the pipeline so
        # the block DMA stays hidden (matters mostly on v5e's slower HBM).
        img_spec_kwargs["pipeline_mode"] = pl.Buffered(3)
    img_spec = pl.BlockSpec((TB, H_kern, W_pad), lambda g: (g, 0, 0),
                            **img_spec_kwargs)

    kernel = functools.partial(_ncc_kernel, h=h, w=w, RT=RT, n_tiles=n_tiles,
                               OW_pad=OW_pad, TB=TB)
    out = pl.pallas_call(
        kernel,
        out_shape=jax.ShapeDtypeStruct((B, OH_pad, OW_pad), jnp.float32),
        grid=(G,),
        in_specs=[
            pl.BlockSpec(memory_space=pltpu.MemorySpace.SMEM),   # nT_flat (whole)
            pl.BlockSpec(memory_space=pltpu.MemorySpace.SMEM),   # tE      (whole)
            pl.BlockSpec(memory_space=pltpu.MemorySpace.SMEM),   # mu      (whole)
            img_spec,                                            # images, TB/step
        ],
        out_specs=pl.BlockSpec((TB, OH_pad, OW_pad), lambda g: (g, 0, 0)),
        scratch_shapes=[
            pltpu.VMEM((halo, OW_pad), jnp.float32),
            pltpu.VMEM((halo, OW_pad), jnp.float32),
        ],
        compiler_params=pltpu.CompilerParams(
            dimension_semantics=("parallel",),
            vmem_limit_bytes=int(vmem_limit),
        ),
    )(nT_flat, tE, mu, img)
    return out[:, :OH, :OW]


def _reference(original, template):
    """Pure numpy reference with the exact same forward semantics."""
    original = np.asarray(original, np.float32)
    template = np.asarray(template, np.float32)
    B, H, W = original.shape
    _, h, w = template.shape
    OH, OW = H - h + 1, W - w + 1
    nO = original - original.mean(axis=(1, 2), keepdims=True)
    nT = template - template.mean(axis=(1, 2), keepdims=True)
    tE = (nT * nT).sum(axis=(1, 2))
    out = np.zeros((B, OH, OW), np.float32)
    win = np.zeros_like(out)
    sq = np.zeros_like(out)
    for p in range(h):
        for q in range(w):
            patch = nO[:, p:p + OH, q:q + OW]
            out += patch * nT[:, p:p + 1, q:q + 1]
            win += patch
            sq += patch * patch
    image = np.maximum(sq - win * win / (h * w), 0.0)
    with np.errstate(divide="ignore", invalid="ignore"):
        res = out / np.sqrt(image * tE[:, None, None])
    res[~np.isfinite(res)] = 0.0
    return res


if __name__ == "__main__":
    key = jax.random.PRNGKey(0)
    k1, k2, k3, k4 = jax.random.split(key, 4)

    # Case 1: module-sized example (B=4, 16x16 images, 8x8 template).
    B, H, W, h, w = 4, 16, 16, 8, 8
    original = jax.random.normal(k1, (B, H, W), dtype=jnp.float32)
    template = jax.random.normal(k2, (B, h, w), dtype=jnp.float32)

    # Module parameter: self.a1 = torch.ones(template_size).  It is an all-ones
    # box kernel; its effect is realised directly as the win/sq window sums, so
    # the array itself never needs to be shipped to the TPU.
    _a1 = jnp.ones((B, h, w), dtype=jnp.float32)  # deterministic param (fidelity)

    out = correlation(original, template)
    jax.block_until_ready(out)
    np.testing.assert_allclose(np.asarray(out), _reference(original, template),
                               rtol=1e-3, atol=1e-3)

    # Case 2: exercises multiple row tiles (OH=28 -> 2 tiles) and odd template.
    B2, H2, W2, h2, w2 = 2, 32, 32, 5, 5
    original2 = jax.random.normal(k3, (B2, H2, W2), dtype=jnp.float32)
    template2 = jax.random.normal(k4, (B2, h2, w2), dtype=jnp.float32)
    out2 = correlation(original2, template2)
    jax.block_until_ready(out2)
    np.testing.assert_allclose(np.asarray(out2), _reference(original2, template2),
                               rtol=1e-3, atol=1e-3)

    print("KERNEL_OK")
</pallas_src>

<mosaic_0001>
module attributes {stable_mosaic.version = 11 : i64} {
  func.func @_ncc_kernel(%arg0: i32, %arg1: memref<256xf32, #tpu.memory_space<smem>>, %arg2: memref<4xf32, #tpu.memory_space<smem>>, %arg3: memref<4xf32, #tpu.memory_space<smem>>, %arg4: memref<2x23x256xf32, #tpu.memory_space<vmem>>, %arg5: memref<2x16x128xf32, #tpu.memory_space<vmem>>, %arg6: memref<23x128xf32, #tpu.memory_space<vmem>>, %arg7: memref<23x128xf32, #tpu.memory_space<vmem>>) attributes {dimension_semantics = [#tpu.dimension_semantics<parallel>], iteration_bounds = array<i64: 2>, scalar_prefetch = 0 : i64, scratch_operands = 2 : i64, tpu.core_type = #tpu.core_type<tc>, window_params = [{transform_indices = @transform_0, window_bounds = array<i64: 256>}, {transform_indices = @transform_1, window_bounds = array<i64: 4>}, {transform_indices = @transform_2, window_bounds = array<i64: 4>}, {transform_indices = @transform_3, window_bounds = array<i64: 2, 23, 256>}, {transform_indices = @transform_4, window_bounds = array<i64: 2, 16, 128>}]} {
    %c2_i32 = arith.constant 2 : i32
    %0 = arith.muli %arg0, %c2_i32 : i32
    %c0_i32 = arith.constant 0 : i32
    %1 = arith.addi %0, %c0_i32 : i32
    %2 = arith.index_cast %1 : i32 to index
    %3 = memref.load %arg3[%2] : memref<4xf32, #tpu.memory_space<smem>>
    %4 = arith.index_cast %1 : i32 to index
    %5 = memref.load %arg2[%4] : memref<4xf32, #tpu.memory_space<smem>>
    %c64_i32 = arith.constant 64 : i32
    %6 = arith.muli %1, %c64_i32 : i32
    %c0 = arith.constant 0 : index
    %c0_0 = arith.constant 0 : index
    %c0_1 = arith.constant 0 : index
    %7 = vector.load %arg4[%c0, %c0_0, %c0_1] : memref<2x23x256xf32, #tpu.memory_space<vmem>>, vector<1x23x128xf32>
    %8 = vector.shape_cast %7 : vector<1x23x128xf32> to vector<23x128xf32>
    %9 = vector.broadcast %3 : f32 to vector<23x128xf32>
    %10 = arith.subf %8, %9 : vector<23x128xf32>
    %c0_2 = arith.constant 0 : index
    %c0_3 = arith.constant 0 : index
    %11 = vector.load %arg6[%c0_2, %c0_3] : memref<23x128xf32, #tpu.memory_space<vmem>>, vector<23x128xf32>
    tpu.vector_store %arg6[%c0_2, %c0_3], %10 {strides = array<i32>} : memref<23x128xf32, #tpu.memory_space<vmem>>, vector<23x128xf32>,
    %12 = arith.mulf %10, %10 : vector<23x128xf32>
    %c0_i32_4 = arith.constant 0 : i32
    %13 = arith.addi %6, %c0_i32_4 : i32
    %c0_i32_5 = arith.constant 0 : i32
    %14 = arith.addi %13, %c0_i32_5 : i32
    %15 = arith.index_cast %14 : i32 to index
    %16 = memref.load %arg1[%15] : memref<256xf32, #tpu.memory_space<smem>>
    %c0_6 = arith.constant 0 : index
    %c0_7 = arith.constant 0 : index
    %17 = vector.load %arg6[%c0_6, %c0_7] : memref<23x128xf32, #tpu.memory_space<vmem>>, vector<16x128xf32>
    %18 = vector.broadcast %16 : f32 to vector<16x128xf32>
    %19 = arith.mulf %18, %17 : vector<16x128xf32>
    %c8_i32 = arith.constant 8 : i32
    %20 = arith.addi %6, %c8_i32 : i32
    %c0_i32_8 = arith.constant 0 : i32
    %21 = arith.addi %20, %c0_i32_8 : i32
    %22 = arith.index_cast %21 : i32 to index
    %23 = memref.load %arg1[%22] : memref<256xf32, #tpu.memory_space<smem>>
    %c1 = arith.constant 1 : index
    %c0_9 = arith.constant 0 : index
    %24 = vector.load %arg6[%c1, %c0_9] : memref<23x128xf32, #tpu.memory_space<vmem>>, vector<16x128xf32>
    %25 = vector.broadcast %23 : f32 to vector<16x128xf32>
    %26 = arith.mulf %25, %24 : vector<16x128xf32>
    %27 = arith.addf %19, %26 : vector<16x128xf32>
    %c16_i32 = arith.constant 16 : i32
    %28 = arith.addi %6, %c16_i32 : i32
    %c0_i32_10 = arith.constant 0 : i32
    %29 = arith.addi %28, %c0_i32_10 : i32
    %30 = arith.index_cast %29 : i32 to index
    %31 = memref.load %arg1[%30] : memref<256xf32, #tpu.memory_space<smem>>
    %c2 = arith.constant 2 : index
    %c0_11 = arith.constant 0 : index
    %32 = vector.load %arg6[%c2, %c0_11] : memref<23x128xf32, #tpu.memory_space<vmem>>, vector<16x128xf32>
    %33 = vector.broadcast %31 : f32 to vector<16x128xf32>
    %34 = arith.mulf %33, %32 : vector<16x128xf32>
    %35 = arith.addf %27, %34 : vector<16x128xf32>
    %c24_i32 = arith.constant 24 : i32
    %36 = arith.addi %6, %c24_i32 : i32
    %c0_i32_12 = arith.constant 0 : i32
    %37 = arith.addi %36, %c0_i32_12 : i32
    %38 = arith.index_cast %37 : i32 to index
    %39 = memref.load %arg1[%38] : memref<256xf32, #tpu.memory_space<smem>>
    %c3 = arith.constant 3 : index
    %c0_13 = arith.constant 0 : index
    %40 = vector.load %arg6[%c3, %c0_13] : memref<23x128xf32, #tpu.memory_space<vmem>>, vector<16x128xf32>
    %41 = vector.broadcast %39 : f32 to vector<16x128xf32>
    %42 = arith.mulf %41, %40 : vector<16x128xf32>
    %43 = arith.addf %35, %42 : vector<16x128xf32>
    %c32_i32 = arith.constant 32 : i32
    %44 = arith.addi %6, %c32_i32 : i32
    %c0_i32_14 = arith.constant 0 : i32
    %45 = arith.addi %44, %c0_i32_14 : i32
    %46 = arith.index_cast %45 : i32 to index
    %47 = memref.load %arg1[%46] : memref<256xf32, #tpu.memory_space<smem>>
    %c4 = arith.constant 4 : index
    %c0_15 = arith.constant 0 : index
    %48 = vector.load %arg6[%c4, %c0_15] : memref<23x128xf32, #tpu.memory_space<vmem>>, vector<16x128xf32>
    %49 = vector.broadcast %47 : f32 to vector<16x128xf32>
    %50 = arith.mulf %49, %48 : vector<16x128xf32>
    %51 = arith.addf %43, %50 : vector<16x128xf32>
    %c40_i32 = arith.constant 40 : i32
    %52 = arith.addi %6, %c40_i32 : i32
    %c0_i32_16 = arith.constant 0 : i32
    %53 = arith.addi %52, %c0_i32_16 : i32
    %54 = arith.index_cast %53 : i32 to index
    %55 = memref.load %arg1[%54] : memref<256xf32, #tpu.memory_space<smem>>
    %c5 = arith.constant 5 : index
    %c0_17 = arith.constant 0 : index
    %56 = vector.load %arg6[%c5, %c0_17] : memref<23x128xf32, #tpu.memory_space<vmem>>, vector<16x128xf32>
    %57 = vector.broadcast %55 : f32 to vector<16x128xf32>
    %58 = arith.mulf %57, %56 : vector<16x128xf32>
    %59 = arith.addf %51, %58 : vector<16x128xf32>
    %c48_i32 = arith.constant 48 : i32
    %60 = arith.addi %6, %c48_i32 : i32
    %c0_i32_18 = arith.constant 0 : i32
    %61 = arith.addi %60, %c0_i32_18 : i32
    %62 = arith.index_cast %61 : i32 to index
    %63 = memref.load %arg1[%62] : memref<256xf32, #tpu.memory_space<smem>>
    %c6 = arith.constant 6 : index
    %c0_19 = arith.constant 0 : index
    %64 = vector.load %arg6[%c6, %c0_19] : memref<23x128xf32, #tpu.memory_space<vmem>>, vector<16x128xf32>
    %65 = vector.broadcast %63 : f32 to vector<16x128xf32>
    %66 = arith.mulf %65, %64 : vector<16x128xf32>
    %67 = arith.addf %59, %66 : vector<16x128xf32>
    %c56_i32 = arith.constant 56 : i32
    %68 = arith.addi %6, %c56_i32 : i32
    %c0_i32_20 = arith.constant 0 : i32
    %69 = arith.addi %68, %c0_i32_20 : i32
    %70 = arith.index_cast %69 : i32 to index
    %71 = memref.load %arg1[%70] : memref<256xf32, #tpu.memory_space<smem>>
    %c7 = arith.constant 7 : index
    %c0_21 = arith.constant 0 : index
    %72 = vector.load %arg6[%c7, %c0_21] : memref<23x128xf32, #tpu.memory_space<vmem>>, vector<16x128xf32>
    %73 = vector.broadcast %71 : f32 to vector<16x128xf32>
    %74 = arith.mulf %73, %72 : vector<16x128xf32>
    %75 = arith.addf %67, %74 : vector<16x128xf32>
    %c0_22 = arith.constant 0 : index
    %c0_23 = arith.constant 0 : index
    %c1_24 = arith.constant 1 : index
    %76 = vector.load %arg4[%c0_22, %c0_23, %c1_24] : memref<2x23x256xf32, #tpu.memory_space<vmem>>, vector<1x23x128xf32>
    %77 = vector.shape_cast %76 : vector<1x23x128xf32> to vector<23x128xf32>
    %78 = vector.broadcast %3 : f32 to vector<23x128xf32>
    %79 = arith.subf %77, %78 : vector<23x128xf32>
    %c0_25 = arith.constant 0 : index
    %c0_26 = arith.constant 0 : index
    %80 = vector.load %arg6[%c0_25, %c0_26] : memref<23x128xf32, #tpu.memory_space<vmem>>, vector<23x128xf32>
    tpu.vector_store %arg6[%c0_25, %c0_26], %79 {strides = array<i32>} : memref<23x128xf32, #tpu.memory_space<vmem>>, vector<23x128xf32>,
    %81 = arith.mulf %79, %79 : vector<23x128xf32>
    %82 = arith.addf %10, %79 : vector<23x128xf32>
    %83 = arith.addf %12, %81 : vector<23x128xf32>
    %c0_i32_27 = arith.constant 0 : i32
    %84 = arith.addi %6, %c0_i32_27 : i32
    %c1_i32 = arith.constant 1 : i32
    %85 = arith.addi %84, %c1_i32 : i32
    %86 = arith.index_cast %85 : i32 to index
    %87 = memref.load %arg1[%86] : memref<256xf32, #tpu.memory_space<smem>>
    %c0_28 = arith.constant 0 : index
    %c0_29 = arith.constant 0 : index
    %88 = vector.load %arg6[%c0_28, %c0_29] : memref<23x128xf32, #tpu.memory_space<vmem>>, vector<16x128xf32>
    %89 = vector.broadcast %87 : f32 to vector<16x128xf32>
    %90 = arith.mulf %89, %88 : vector<16x128xf32>
    %91 = arith.addf %75, %90 : vector<16x128xf32>
    %c8_i32_30 = arith.constant 8 : i32
    %92 = arith.addi %6, %c8_i32_30 : i32
    %c1_i32_31 = arith.constant 1 : i32
    %93 = arith.addi %92, %c1_i32_31 : i32
    %94 = arith.index_cast %93 : i32 to index
    %95 = memref.load %arg1[%94] : memref<256xf32, #tpu.memory_space<smem>>
    %c1_32 = arith.constant 1 : index
    %c0_33 = arith.constant 0 : index
    %96 = vector.load %arg6[%c1_32, %c0_33] : memref<23x128xf32, #tpu.memory_space<vmem>>, vector<16x128xf32>
    %97 = vector.broadcast %95 : f32 to vector<16x128xf32>
    %98 = arith.mulf %97, %96 : vector<16x128xf32>
    %99 = arith.addf %91, %98 : vector<16x128xf32>
    %c16_i32_34 = arith.constant 16 : i32
    %100 = arith.addi %6, %c16_i32_34 : i32
    %c1_i32_35 = arith.constant 1 : i32
    %101 = arith.addi %100, %c1_i32_35 : i32
    %102 = arith.index_cast %101 : i32 to index
    %103 = memref.load %arg1[%102] : memref<256xf32, #tpu.memory_space<smem>>
    %c2_36 = arith.constant 2 : index
    %c0_37 = arith.constant 0 : index
    %104 = vector.load %arg6[%c2_36, %c0_37] : memref<23x128xf32, #tpu.memory_space<vmem>>, vector<16x128xf32>
    %105 = vector.broadcast %103 : f32 to vector<16x128xf32>
    %106 = arith.mulf %105, %104 : vector<16x128xf32>
    %107 = arith.addf %99, %106 : vector<16x128xf32>
    %c24_i32_38 = arith.constant 24 : i32
    %108 = arith.addi %6, %c24_i32_38 : i32
    %c1_i32_39 = arith.constant 1 : i32
    %109 = arith.addi %108, %c1_i32_39 : i32
    %110 = arith.index_cast %109 : i32 to index
    %111 = memref.load %arg1[%110] : memref<256xf32, #tpu.memory_space<smem>>
    %c3_40 = arith.constant 3 : index
    %c0_41 = arith.constant 0 : index
    %112 = vector.load %arg6[%c3_40, %c0_41] : memref<23x128xf32, #tpu.memory_space<vmem>>, vector<16x128xf32>
    %113 = vector.broadcast %111 : f32 to vector<16x128xf32>
    %114 = arith.mulf %113, %112 : vector<16x128xf32>
    %115 = arith.addf %107, %114 : vector<16x128xf32>
    %c32_i32_42 = arith.constant 32 : i32
    %116 = arith.addi %6, %c32_i32_42 : i32
    %c1_i32_43 = arith.constant 1 : i32
    %117 = arith.addi %116, %c1_i32_43 : i32
    %118 = arith.index_cast %117 : i32 to index
    %119 = memref.load %arg1[%118] : memref<256xf32, #tpu.memory_space<smem>>
    %c4_44 = arith.constant 4 : index
    %c0_45 = arith.constant 0 : index
    %120 = vector.load %arg6[%c4_44, %c0_45] : memref<23x128xf32, #tpu.memory_space<vmem>>, vector<16x128xf32>
    %121 = vector.broadcast %119 : f32 to vector<16x128xf32>
    %122 = arith.mulf %121, %120 : vector<16x128xf32>
    %123 = arith.addf %115, %122 : vector<16x128xf32>
    %c40_i32_46 = arith.constant 40 : i32
    %124 = arith.addi %6, %c40_i32_46 : i32
    %c1_i32_47 = arith.constant 1 : i32
    %125 = arith.addi %124, %c1_i32_47 : i32
    %126 = arith.index_cast %125 : i32 to index
    %127 = memref.load %arg1[%126] : memref<256xf32, #tpu.memory_space<smem>>
    %c5_48 = arith.constant 5 : index
    %c0_49 = arith.constant 0 : index
    %128 = vector.load %arg6[%c5_48, %c0_49] : memref<23x128xf32, #tpu.memory_space<vmem>>, vector<16x128xf32>
    %129 = vector.broadcast %127 : f32 to vector<16x128xf32>
    %130 = arith.mulf %129, %128 : vector<16x128xf32>
    %131 = arith.addf %123, %130 : vector<16x128xf32>
    %c48_i32_50 = arith.constant 48 : i32
    %132 = arith.addi %6, %c48_i32_50 : i32
    %c1_i32_51 = arith.constant 1 : i32
    %133 = arith.addi %132, %c1_i32_51 : i32
    %134 = arith.index_cast %133 : i32 to index
    %135 = memref.load %arg1[%134] : memref<256xf32, #tpu.memory_space<smem>>
    %c6_52 = arith.constant 6 : index
    %c0_53 = arith.constant 0 : index
    %136 = vector.load %arg6[%c6_52, %c0_53] : memref<23x128xf32, #tpu.memory_space<vmem>>, vector<16x128xf32>
    %137 = vector.broadcast %135 : f32 to vector<16x128xf32>
    %138 = arith.mulf %137, %136 : vector<16x128xf32>
    %139 = arith.addf %131, %138 : vector<16x128xf32>
    %c56_i32_54 = arith.constant 56 : i32
    %140 = arith.addi %6, %c56_i32_54 : i32
    %c1_i32_55 = arith.constant 1 : i32
    %141 = arith.addi %140, %c1_i32_55 : i32
    %142 = arith.index_cast %141 : i32 to index
    %143 = memref.load %arg1[%142] : memref<256xf32, #tpu.memory_space<smem>>
    %c7_56 = arith.constant 7 : index
    %c0_57 = arith.constant 0 : index
    %144 = vector.load %arg6[%c7_56, %c0_57] : memref<23x128xf32, #tpu.memory_space<vmem>>, vector<16x128xf32>
    %145 = vector.broadcast %143 : f32 to vector<16x128xf32>
    %146 = arith.mulf %145, %144 : vector<16x128xf32>
    %147 = arith.addf %139, %146 : vector<16x128xf32>
    %c0_58 = arith.constant 0 : index
    %c0_59 = arith.constant 0 : index
    %c2_60 = arith.constant 2 : index
    %148 = vector.load %arg4[%c0_58, %c0_59, %c2_60] : memref<2x23x256xf32, #tpu.memory_space<vmem>>, vector<1x23x128xf32>
    %149 = vector.shape_cast %148 : vector<1x23x128xf32> to vector<23x128xf32>
    %150 = vector.broadcast %3 : f32 to vector<23x128xf32>
    %151 = arith.subf %149, %150 : vector<23x128xf32>
    %c0_61 = arith.constant 0 : index
    %c0_62 = arith.constant 0 : index
    %152 = vector.load %arg6[%c0_61, %c0_62] : memref<23x128xf32, #tpu.memory_space<vmem>>, vector<23x128xf32>
    tpu.vector_store %arg6[%c0_61, %c0_62], %151 {strides = array<i32>} : memref<23x128xf32, #tpu.memory_space<vmem>>, vector<23x128xf32>,
    %153 = arith.mulf %151, %151 : vector<23x128xf32>
    %154 = arith.addf %82, %151 : vector<23x128xf32>
    %155 = arith.addf %83, %153 : vector<23x128xf32>
    %c0_i32_63 = arith.constant 0 : i32
    %156 = arith.addi %6, %c0_i32_63 : i32
    %c2_i32_64 = arith.constant 2 : i32
    %157 = arith.addi %156, %c2_i32_64 : i32
    %158 = arith.index_cast %157 : i32 to index
    %159 = memref.load %arg1[%158] : memref<256xf32, #tpu.memory_space<smem>>
    %c0_65 = arith.constant 0 : index
    %c0_66 = arith.constant 0 : index
    %160 = vector.load %arg6[%c0_65, %c0_66] : memref<23x128xf32, #tpu.memory_space<vmem>>, vector<16x128xf32>
    %161 = vector.broadcast %159 : f32 to vector<16x128xf32>
    %162 = arith.mulf %161, %160 : vector<16x128xf32>
    %163 = arith.addf %147, %162 : vector<16x128xf32>
    %c8_i32_67 = arith.constant 8 : i32
    %164 = arith.addi %6, %c8_i32_67 : i32
    %c2_i32_68 = arith.constant 2 : i32
    %165 = arith.addi %164, %c2_i32_68 : i32
    %166 = arith.index_cast %165 : i32 to index
    %167 = memref.load %arg1[%166] : memref<256xf32, #tpu.memory_space<smem>>
    %c1_69 = arith.constant 1 : index
    %c0_70 = arith.constant 0 : index
    %168 = vector.load %arg6[%c1_69, %c0_70] : memref<23x128xf32, #tpu.memory_space<vmem>>, vector<16x128xf32>
    %169 = vector.broadcast %167 : f32 to vector<16x128xf32>
    %170 = arith.mulf %169, %168 : vector<16x128xf32>
    %171 = arith.addf %163, %170 : vector<16x128xf32>
    %c16_i32_71 = arith.constant 16 : i32
    %172 = arith.addi %6, %c16_i32_71 : i32
    %c2_i32_72 = arith.constant 2 : i32
    %173 = arith.addi %172, %c2_i32_72 : i32
    %174 = arith.index_cast %173 : i32 to index
    %175 = memref.load %arg1[%174] : memref<256xf32, #tpu.memory_space<smem>>
    %c2_73 = arith.constant 2 : index
    %c0_74 = arith.constant 0 : index
    %176 = vector.load %arg6[%c2_73, %c0_74] : memref<23x128xf32, #tpu.memory_space<vmem>>, vector<16x128xf32>
    %177 = vector.broadcast %175 : f32 to vector<16x128xf32>
    %178 = arith.mulf %177, %176 : vector<16x128xf32>
    %179 = arith.addf %171, %178 : vector<16x128xf32>
    %c24_i32_75 = arith.constant 24 : i32
    %180 = arith.addi %6, %c24_i32_75 : i32
    %c2_i32_76 = arith.constant 2 : i32
    %181 = arith.addi %180, %c2_i32_76 : i32
    %182 = arith.index_cast %181 : i32 to index
    %183 = memref.load %arg1[%182] : memref<256xf32, #tpu.memory_space<smem>>
    %c3_77 = arith.constant 3 : index
    %c0_78 = arith.constant 0 : index
    %184 = vector.load %arg6[%c3_77, %c0_78] : memref<23x128xf32, #tpu.memory_space<vmem>>, vector<16x128xf32>
    %185 = vector.broadcast %183 : f32 to vector<16x128xf32>
    %186 = arith.mulf %185, %184 : vector<16x128xf32>
    %187 = arith.addf %179, %186 : vector<16x128xf32>
    %c32_i32_79 = arith.constant 32 : i32
    %188 = arith.addi %6, %c32_i32_79 : i32
    %c2_i32_80 = arith.constant 2 : i32
    %189 = arith.addi %188, %c2_i32_80 : i32
    %190 = arith.index_cast %189 : i32 to index
    %191 = memref.load %arg1[%190] : memref<256xf32, #tpu.memory_space<smem>>
    %c4_81 = arith.constant 4 : index
    %c0_82 = arith.constant 0 : index
    %192 = vector.load %arg6[%c4_81, %c0_82] : memref<23x128xf32, #tpu.memory_space<vmem>>, vector<16x128xf32>
    %193 = vector.broadcast %191 : f32 to vector<16x128xf32>
    %194 = arith.mulf %193, %192 : vector<16x128xf32>
    %195 = arith.addf %187, %194 : vector<16x128xf32>
    %c40_i32_83 = arith.constant 40 : i32
    %196 = arith.addi %6, %c40_i32_83 : i32
    %c2_i32_84 = arith.constant 2 : i32
    %197 = arith.addi %196, %c2_i32_84 : i32
    %198 = arith.index_cast %197 : i32 to index
    %199 = memref.load %arg1[%198] : memref<256xf32, #tpu.memory_space<smem>>
    %c5_85 = arith.constant 5 : index
    %c0_86 = arith.constant 0 : index
    %200 = vector.load %arg6[%c5_85, %c0_86] : memref<23x128xf32, #tpu.memory_space<vmem>>, vector<16x128xf32>
    %201 = vector.broadcast %199 : f32 to vector<16x128xf32>
    %202 = arith.mulf %201, %200 : vector<16x128xf32>
    %203 = arith.addf %195, %202 : vector<16x128xf32>
    %c48_i32_87 = arith.constant 48 : i32
    %204 = arith.addi %6, %c48_i32_87 : i32
    %c2_i32_88 = arith.constant 2 : i32
    %205 = arith.addi %204, %c2_i32_88 : i32
    %206 = arith.index_cast %205 : i32 to index
    %207 = memref.load %arg1[%206] : memref<256xf32, #tpu.memory_space<smem>>
    %c6_89 = arith.constant 6 : index
    %c0_90 = arith.constant 0 : index
    %208 = vector.load %arg6[%c6_89, %c0_90] : memref<23x128xf32, #tpu.memory_space<vmem>>, vector<16x128xf32>
    %209 = vector.broadcast %207 : f32 to vector<16x128xf32>
    %210 = arith.mulf %209, %208 : vector<16x128xf32>
    %211 = arith.addf %203, %210 : vector<16x128xf32>
    %c56_i32_91 = arith.constant 56 : i32
    %212 = arith.addi %6, %c56_i32_91 : i32
    %c2_i32_92 = arith.constant 2 : i32
    %213 = arith.addi %212, %c2_i32_92 : i32
    %214 = arith.index_cast %213 : i32 to index
    %215 = memref.load %arg1[%214] : memref<256xf32, #tpu.memory_space<smem>>
    %c7_93 = arith.constant 7 : index
    %c0_94 = arith.constant 0 : index
    %216 = vector.load %arg6[%c7_93, %c0_94] : memref<23x128xf32, #tpu.memory_space<vmem>>, vector<16x128xf32>
    %217 = vector.broadcast %215 : f32 to vector<16x128xf32>
    %218 = arith.mulf %217, %216 : vector<16x128xf32>
    %219 = arith.addf %211, %218 : vector<16x128xf32>
    %c0_95 = arith.constant 0 : index
    %c0_96 = arith.constant 0 : index
    %c3_97 = arith.constant 3 : index
    %220 = vector.load %arg4[%c0_95, %c0_96, %c3_97] : memref<2x23x256xf32, #tpu.memory_space<vmem>>, vector<1x23x128xf32>
    %221 = vector.shape_cast %220 : vector<1x23x128xf32> to vector<23x128xf32>
    %222 = vector.broadcast %3 : f32 to vector<23x128xf32>
    %223 = arith.subf %221, %222 : vector<23x128xf32>
    %c0_98 = arith.constant 0 : index
    %c0_99 = arith.constant 0 : index
    %224 = vector.load %arg6[%c0_98, %c0_99] : memref<23x128xf32, #tpu.memory_space<vmem>>, vector<23x128xf32>
    tpu.vector_store %arg6[%c0_98, %c0_99], %223 {strides = array<i32>} : memref<23x128xf32, #tpu.memory_space<vmem>>, vector<23x128xf32>,
    %225 = arith.mulf %223, %223 : vector<23x128xf32>
    %226 = arith.addf %154, %223 : vector<23x128xf32>
    %227 = arith.addf %155, %225 : vector<23x128xf32>
    %c0_i32_100 = arith.constant 0 : i32
    %228 = arith.addi %6, %c0_i32_100 : i32
    %c3_i32 = arith.constant 3 : i32
    %229 = arith.addi %228, %c3_i32 : i32
    %230 = arith.index_cast %229 : i32 to index
    %231 = memref.load %arg1[%230] : memref<256xf32, #tpu.memory_space<smem>>
    %c0_101 = arith.constant 0 : index
    %c0_102 = arith.constant 0 : index
    %232 = vector.load %arg6[%c0_101, %c0_102] : memref<23x128xf32, #tpu.memory_space<vmem>>, vector<16x128xf32>
    %233 = vector.broadcast %231 : f32 to vector<16x128xf32>
    %234 = arith.mulf %233, %232 : vector<16x128xf32>
    %235 = arith.addf %219, %234 : vector<16x128xf32>
    %c8_i32_103 = arith.constant 8 : i32
    %236 = arith.addi %6, %c8_i32_103 : i32
    %c3_i32_104 = arith.constant 3 : i32
    %237 = arith.addi %236, %c3_i32_104 : i32
    %238 = arith.index_cast %237 : i32 to index
    %239 = memref.load %arg1[%238] : memref<256xf32, #tpu.memory_space<smem>>
    %c1_105 = arith.constant 1 : index
    %c0_106 = arith.constant 0 : index
    %240 = vector.load %arg6[%c1_105, %c0_106] : memref<23x128xf32, #tpu.memory_space<vmem>>, vector<16x128xf32>
    %241 = vector.broadcast %239 : f32 to vector<16x128xf32>
    %242 = arith.mulf %241, %240 : vector<16x128xf32>
    %243 = arith.addf %235, %242 : vector<16x128xf32>
    %c16_i32_107 = arith.constant 16 : i32
    %244 = arith.addi %6, %c16_i32_107 : i32
    %c3_i32_108 = arith.constant 3 : i32
    %245 = arith.addi %244, %c3_i32_108 : i32
    %246 = arith.index_cast %245 : i32 to index
    %247 = memref.load %arg1[%246] : memref<256xf32, #tpu.memory_space<smem>>
    %c2_109 = arith.constant 2 : index
    %c0_110 = arith.constant 0 : index
    %248 = vector.load %arg6[%c2_109, %c0_110] : memref<23x128xf32, #tpu.memory_space<vmem>>, vector<16x128xf32>
    %249 = vector.broadcast %247 : f32 to vector<16x128xf32>
    %250 = arith.mulf %249, %248 : vector<16x128xf32>
    %251 = arith.addf %243, %250 : vector<16x128xf32>
    %c24_i32_111 = arith.constant 24 : i32
    %252 = arith.addi %6, %c24_i32_111 : i32
    %c3_i32_112 = arith.constant 3 : i32
    %253 = arith.addi %252, %c3_i32_112 : i32
    %254 = arith.index_cast %253 : i32 to index
    %255 = memref.load %arg1[%254] : memref<256xf32, #tpu.memory_space<smem>>
    %c3_113 = arith.constant 3 : index
    %c0_114 = arith.constant 0 : index
    %256 = vector.load %arg6[%c3_113, %c0_114] : memref<23x128xf32, #tpu.memory_space<vmem>>, vector<16x128xf32>
    %257 = vector.broadcast %255 : f32 to vector<16x128xf32>
    %258 = arith.mulf %257, %256 : vector<16x128xf32>
    %259 = arith.addf %251, %258 : vector<16x128xf32>
    %c32_i32_115 = arith.constant 32 : i32
    %260 = arith.addi %6, %c32_i32_115 : i32
    %c3_i32_116 = arith.constant 3 : i32
    %261 = arith.addi %260, %c3_i32_116 : i32
    %262 = arith.index_cast %261 : i32 to index
    %263 = memref.load %arg1[%262] : memref<256xf32, #tpu.memory_space<smem>>
    %c4_117 = arith.constant 4 : index
    %c0_118 = arith.constant 0 : index
    %264 = vector.load %arg6[%c4_117, %c0_118] : memref<23x128xf32, #tpu.memory_space<vmem>>, vector<16x128xf32>
    %265 = vector.broadcast %263 : f32 to vector<16x128xf32>
    %266 = arith.mulf %265, %264 : vector<16x128xf32>
    %267 = arith.addf %259, %266 : vector<16x128xf32>
    %c40_i32_119 = arith.constant 40 : i32
    %268 = arith.addi %6, %c40_i32_119 : i32
    %c3_i32_120 = arith.constant 3 : i32
    %269 = arith.addi %268, %c3_i32_120 : i32
    %270 = arith.index_cast %269 : i32 to index
    %271 = memref.load %arg1[%270] : memref<256xf32, #tpu.memory_space<smem>>
    %c5_121 = arith.constant 5 : index
    %c0_122 = arith.constant 0 : index
    %272 = vector.load %arg6[%c5_121, %c0_122] : memref<23x128xf32, #tpu.memory_space<vmem>>, vector<16x128xf32>
    %273 = vector.broadcast %271 : f32 to vector<16x128xf32>
    %274 = arith.mulf %273, %272 : vector<16x128xf32>
    %275 = arith.addf %267, %274 : vector<16x128xf32>
    %c48_i32_123 = arith.constant 48 : i32
    %276 = arith.addi %6, %c48_i32_123 : i32
    %c3_i32_124 = arith.constant 3 : i32
    %277 = arith.addi %276, %c3_i32_124 : i32
    %278 = arith.index_cast %277 : i32 to index
    %279 = memref.load %arg1[%278] : memref<256xf32, #tpu.memory_space<smem>>
    %c6_125 = arith.constant 6 : index
    %c0_126 = arith.constant 0 : index
    %280 = vector.load %arg6[%c6_125, %c0_126] : memref<23x128xf32, #tpu.memory_space<vmem>>, vector<16x128xf32>
    %281 = vector.broadcast %279 : f32 to vector<16x128xf32>
    %282 = arith.mulf %281, %280 : vector<16x128xf32>
    %283 = arith.addf %275, %282 : vector<16x128xf32>
    %c56_i32_127 = arith.constant 56 : i32
    %284 = arith.addi %6, %c56_i32_127 : i32
    %c3_i32_128 = arith.constant 3 : i32
    %285 = arith.addi %284, %c3_i32_128 : i32
    %286 = arith.index_cast %285 : i32 to index
    %287 = memref.load %arg1[%286] : memref<256xf32, #tpu.memory_space<smem>>
    %c7_129 = arith.constant 7 : index
    %c0_130 = arith.constant 0 : index
    %288 = vector.load %arg6[%c7_129, %c0_130] : memref<23x128xf32, #tpu.memory_space<vmem>>, vector<16x128xf32>
    %289 = vector.broadcast %287 : f32 to vector<16x128xf32>
    %290 = arith.mulf %289, %288 : vector<16x128xf32>
    %291 = arith.addf %283, %290 : vector<16x128xf32>
    %c0_131 = arith.constant 0 : index
    %c0_132 = arith.constant 0 : index
    %c4_133 = arith.constant 4 : index
    %292 = vector.load %arg4[%c0_131, %c0_132, %c4_133] : memref<2x23x256xf32, #tpu.memory_space<vmem>>, vector<1x23x128xf32>
    %293 = vector.shape_cast %292 : vector<1x23x128xf32> to vector<23x128xf32>
    %294 = vector.broadcast %3 : f32 to vector<23x128xf32>
    %295 = arith.subf %293, %294 : vector<23x128xf32>
    %c0_134 = arith.constant 0 : index
    %c0_135 = arith.constant 0 : index
    %296 = vector.load %arg6[%c0_134, %c0_135] : memref<23x128xf32, #tpu.memory_space<vmem>>, vector<23x128xf32>
    tpu.vector_store %arg6[%c0_134, %c0_135], %295 {strides = array<i32>} : memref<23x128xf32, #tpu.memory_space<vmem>>, vector<23x128xf32>,
    %297 = arith.mulf %295, %295 : vector<23x128xf32>
    %298 = arith.addf %226, %295 : vector<23x128xf32>
    %299 = arith.addf %227, %297 : vector<23x128xf32>
    %c0_i32_136 = arith.constant 0 : i32
    %300 = arith.addi %6, %c0_i32_136 : i32
    %c4_i32 = arith.constant 4 : i32
    %301 = arith.addi %300, %c4_i32 : i32
    %302 = arith.index_cast %301 : i32 to index
    %303 = memref.load %arg1[%302] : memref<256xf32, #tpu.memory_space<smem>>
    %c0_137 = arith.constant 0 : index
    %c0_138 = arith.constant 0 : index
    %304 = vector.load %arg6[%c0_137, %c0_138] : memref<23x128xf32, #tpu.memory_space<vmem>>, vector<16x128xf32>
    %305 = vector.broadcast %303 : f32 to vector<16x128xf32>
    %306 = arith.mulf %305, %304 : vector<16x128xf32>
    %307 = arith.addf %291, %306 : vector<16x128xf32>
    %c8_i32_139 = arith.constant 8 : i32
    %308 = arith.addi %6, %c8_i32_139 : i32
    %c4_i32_140 = arith.constant 4 : i32
    %309 = arith.addi %308, %c4_i32_140 : i32
    %310 = arith.index_cast %309 : i32 to index
    %311 = memref.load %arg1[%310] : memref<256xf32, #tpu.memory_space<smem>>
    %c1_141 = arith.constant 1 : index
    %c0_142 = arith.constant 0 : index
    %312 = vector.load %arg6[%c1_141, %c0_142] : memref<23x128xf32, #tpu.memory_space<vmem>>, vector<16x128xf32>
    %313 = vector.broadcast %311 : f32 to vector<16x128xf32>
    %314 = arith.mulf %313, %312 : vector<16x128xf32>
    %315 = arith.addf %307, %314 : vector<16x128xf32>
    %c16_i32_143 = arith.constant 16 : i32
    %316 = arith.addi %6, %c16_i32_143 : i32
    %c4_i32_144 = arith.constant 4 : i32
    %317 = arith.addi %316, %c4_i32_144 : i32
    %318 = arith.index_cast %317 : i32 to index
    %319 = memref.load %arg1[%318] : memref<256xf32, #tpu.memory_space<smem>>
    %c2_145 = arith.constant 2 : index
    %c0_146 = arith.constant 0 : index
    %320 = vector.load %arg6[%c2_145, %c0_146] : memref<23x128xf32, #tpu.memory_space<vmem>>, vector<16x128xf32>
    %321 = vector.broadcast %319 : f32 to vector<16x128xf32>
    %322 = arith.mulf %321, %320 : vector<16x128xf32>
    %323 = arith.addf %315, %322 : vector<16x128xf32>
    %c24_i32_147 = arith.constant 24 : i32
    %324 = arith.addi %6, %c24_i32_147 : i32
    %c4_i32_148 = arith.constant 4 : i32
    %325 = arith.addi %324, %c4_i32_148 : i32
    %326 = arith.index_cast %325 : i32 to index
    %327 = memref.load %arg1[%326] : memref<256xf32, #tpu.memory_space<smem>>
    %c3_149 = arith.constant 3 : index
    %c0_150 = arith.constant 0 : index
    %328 = vector.load %arg6[%c3_149, %c0_150] : memref<23x128xf32, #tpu.memory_space<vmem>>, vector<16x128xf32>
    %329 = vector.broadcast %327 : f32 to vector<16x128xf32>
    %330 = arith.mulf %329, %328 : vector<16x128xf32>
    %331 = arith.addf %323, %330 : vector<16x128xf32>
    %c32_i32_151 = arith.constant 32 : i32
    %332 = arith.addi %6, %c32_i32_151 : i32
    %c4_i32_152 = arith.constant 4 : i32
    %333 = arith.addi %332, %c4_i32_152 : i32
    %334 = arith.index_cast %333 : i32 to index
    %335 = memref.load %arg1[%334] : memref<256xf32, #tpu.memory_space<smem>>
    %c4_153 = arith.constant 4 : index
    %c0_154 = arith.constant 0 : index
    %336 = vector.load %arg6[%c4_153, %c0_154] : memref<23x128xf32, #tpu.memory_space<vmem>>, vector<16x128xf32>
    %337 = vector.broadcast %335 : f32 to vector<16x128xf32>
    %338 = arith.mulf %337, %336 : vector<16x128xf32>
    %339 = arith.addf %331, %338 : vector<16x128xf32>
    %c40_i32_155 = arith.constant 40 : i32
    %340 = arith.addi %6, %c40_i32_155 : i32
    %c4_i32_156 = arith.constant 4 : i32
    %341 = arith.addi %340, %c4_i32_156 : i32
    %342 = arith.index_cast %341 : i32 to index
    %343 = memref.load %arg1[%342] : memref<256xf32, #tpu.memory_space<smem>>
    %c5_157 = arith.constant 5 : index
    %c0_158 = arith.constant 0 : index
    %344 = vector.load %arg6[%c5_157, %c0_158] : memref<23x128xf32, #tpu.memory_space<vmem>>, vector<16x128xf32>
    %345 = vector.broadcast %343 : f32 to vector<16x128xf32>
    %346 = arith.mulf %345, %344 : vector<16x128xf32>
    %347 = arith.addf %339, %346 : vector<16x128xf32>
    %c48_i32_159 = arith.constant 48 : i32
    %348 = arith.addi %6, %c48_i32_159 : i32
    %c4_i32_160 = arith.constant 4 : i32
    %349 = arith.addi %348, %c4_i32_160 : i32
    %350 = arith.index_cast %349 : i32 to index
    %351 = memref.load %arg1[%350] : memref<256xf32, #tpu.memory_space<smem>>
    %c6_161 = arith.constant 6 : index
    %c0_162 = arith.constant 0 : index
    %352 = vector.load %arg6[%c6_161, %c0_162] : memref<23x128xf32, #tpu.memory_space<vmem>>, vector<16x128xf32>
    %353 = vector.broadcast %351 : f32 to vector<16x128xf32>
    %354 = arith.mulf %353, %352 : vector<16x128xf32>
    %355 = arith.addf %347, %354 : vector<16x128xf32>
    %c56_i32_163 = arith.constant 56 : i32
    %356 = arith.addi %6, %c56_i32_163 : i32
    %c4_i32_164 = arith.constant 4 : i32
    %357 = arith.addi %356, %c4_i32_164 : i32
    %358 = arith.index_cast %357 : i32 to index
    %359 = memref.load %arg1[%358] : memref<256xf32, #tpu.memory_space<smem>>
    %c7_165 = arith.constant 7 : index
    %c0_166 = arith.constant 0 : index
    %360 = vector.load %arg6[%c7_165, %c0_166] : memref<23x128xf32, #tpu.memory_space<vmem>>, vector<16x128xf32>
    %361 = vector.broadcast %359 : f32 to vector<16x128xf32>
    %362 = arith.mulf %361, %360 : vector<16x128xf32>
    %363 = arith.addf %355, %362 : vector<16x128xf32>
    %c0_167 = arith.constant 0 : index
    %c0_168 = arith.constant 0 : index
    %c5_169 = arith.constant 5 : index
    %364 = vector.load %arg4[%c0_167, %c0_168, %c5_169] : memref<2x23x256xf32, #tpu.memory_space<vmem>>, vector<1x23x128xf32>
    %365 = vector.shape_cast %364 : vector<1x23x128xf32> to vector<23x128xf32>
    %366 = vector.broadcast %3 : f32 to vector<23x128xf32>
    %367 = arith.subf %365, %366 : vector<23x128xf32>
    %c0_170 = arith.constant 0 : index
    %c0_171 = arith.constant 0 : index
    %368 = vector.load %arg6[%c0_170, %c0_171] : memref<23x128xf32, #tpu.memory_space<vmem>>, vector<23x128xf32>
    tpu.vector_store %arg6[%c0_170, %c0_171], %367 {strides = array<i32>} : memref<23x128xf32, #tpu.memory_space<vmem>>, vector<23x128xf32>,
    %369 = arith.mulf %367, %367 : vector<23x128xf32>
    %370 = arith.addf %298, %367 : vector<23x128xf32>
    %371 = arith.addf %299, %369 : vector<23x128xf32>
    %c0_i32_172 = arith.constant 0 : i32
    %372 = arith.addi %6, %c0_i32_172 : i32
    %c5_i32 = arith.constant 5 : i32
    %373 = arith.addi %372, %c5_i32 : i32
    %374 = arith.index_cast %373 : i32 to index
    %375 = memref.load %arg1[%374] : memref<256xf32, #tpu.memory_space<smem>>
    %c0_173 = arith.constant 0 : index
    %c0_174 = arith.constant 0 : index
    %376 = vector.load %arg6[%c0_173, %c0_174] : memref<23x128xf32, #tpu.memory_space<vmem>>, vector<16x128xf32>
    %377 = vector.broadcast %375 : f32 to vector<16x128xf32>
    %378 = arith.mulf %377, %376 : vector<16x128xf32>
    %379 = arith.addf %363, %378 : vector<16x128xf32>
    %c8_i32_175 = arith.constant 8 : i32
    %380 = arith.addi %6, %c8_i32_175 : i32
    %c5_i32_176 = arith.constant 5 : i32
    %381 = arith.addi %380, %c5_i32_176 : i32
    %382 = arith.index_cast %381 : i32 to index
    %383 = memref.load %arg1[%382] : memref<256xf32, #tpu.memory_space<smem>>
    %c1_177 = arith.constant 1 : index
    %c0_178 = arith.constant 0 : index
    %384 = vector.load %arg6[%c1_177, %c0_178] : memref<23x128xf32, #tpu.memory_space<vmem>>, vector<16x128xf32>
    %385 = vector.broadcast %383 : f32 to vector<16x128xf32>
    %386 = arith.mulf %385, %384 : vector<16x128xf32>
    %387 = arith.addf %379, %386 : vector<16x128xf32>
    %c16_i32_179 = arith.constant 16 : i32
    %388 = arith.addi %6, %c16_i32_179 : i32
    %c5_i32_180 = arith.constant 5 : i32
    %389 = arith.addi %388, %c5_i32_180 : i32
    %390 = arith.index_cast %389 : i32 to index
    %391 = memref.load %arg1[%390] : memref<256xf32, #tpu.memory_space<smem>>
    %c2_181 = arith.constant 2 : index
    %c0_182 = arith.constant 0 : index
    %392 = vector.load %arg6[%c2_181, %c0_182] : memref<23x128xf32, #tpu.memory_space<vmem>>, vector<16x128xf32>
    %393 = vector.broadcast %391 : f32 to vector<16x128xf32>
    %394 = arith.mulf %393, %392 : vector<16x128xf32>
    %395 = arith.addf %387, %394 : vector<16x128xf32>
    %c24_i32_183 = arith.constant 24 : i32
    %396 = arith.addi %6, %c24_i32_183 : i32
    %c5_i32_184 = arith.constant 5 : i32
    %397 = arith.addi %396, %c5_i32_184 : i32
    %398 = arith.index_cast %397 : i32 to index
    %399 = memref.load %arg1[%398] : memref<256xf32, #tpu.memory_space<smem>>
    %c3_185 = arith.constant 3 : index
    %c0_186 = arith.constant 0 : index
    %400 = vector.load %arg6[%c3_185, %c0_186] : memref<23x128xf32, #tpu.memory_space<vmem>>, vector<16x128xf32>
    %401 = vector.broadcast %399 : f32 to vector<16x128xf32>
    %402 = arith.mulf %401, %400 : vector<16x128xf32>
    %403 = arith.addf %395, %402 : vector<16x128xf32>
    %c32_i32_187 = arith.constant 32 : i32
    %404 = arith.addi %6, %c32_i32_187 : i32
    %c5_i32_188 = arith.constant 5 : i32
    %405 = arith.addi %404, %c5_i32_188 : i32
    %406 = arith.index_cast %405 : i32 to index
    %407 = memref.load %arg1[%406] : memref<256xf32, #tpu.memory_space<smem>>
    %c4_189 = arith.constant 4 : index
    %c0_190 = arith.constant 0 : index
    %408 = vector.load %arg6[%c4_189, %c0_190] : memref<23x128xf32, #tpu.memory_space<vmem>>, vector<16x128xf32>
    %409 = vector.broadcast %407 : f32 to vector<16x128xf32>
    %410 = arith.mulf %409, %408 : vector<16x128xf32>
    %411 = arith.addf %403, %410 : vector<16x128xf32>
    %c40_i32_191 = arith.constant 40 : i32
    %412 = arith.addi %6, %c40_i32_191 : i32
    %c5_i32_192 = arith.constant 5 : i32
    %413 = arith.addi %412, %c5_i32_192 : i32
    %414 = arith.index_cast %413 : i32 to index
    %415 = memref.load %arg1[%414] : memref<256xf32, #tpu.memory_space<smem>>
    %c5_193 = arith.constant 5 : index
    %c0_194 = arith.constant 0 : index
    %416 = vector.load %arg6[%c5_193, %c0_194] : memref<23x128xf32, #tpu.memory_space<vmem>>, vector<16x128xf32>
    %417 = vector.broadcast %415 : f32 to vector<16x128xf32>
    %418 = arith.mulf %417, %416 : vector<16x128xf32>
    %419 = arith.addf %411, %418 : vector<16x128xf32>
    %c48_i32_195 = arith.constant 48 : i32
    %420 = arith.addi %6, %c48_i32_195 : i32
    %c5_i32_196 = arith.constant 5 : i32
    %421 = arith.addi %420, %c5_i32_196 : i32
    %422 = arith.index_cast %421 : i32 to index
    %423 = memref.load %arg1[%422] : memref<256xf32, #tpu.memory_space<smem>>
    %c6_197 = arith.constant 6 : index
    %c0_198 = arith.constant 0 : index
    %424 = vector.load %arg6[%c6_197, %c0_198] : memref<23x128xf32, #tpu.memory_space<vmem>>, vector<16x128xf32>
    %425 = vector.broadcast %423 : f32 to vector<16x128xf32>
    %426 = arith.mulf %425, %424 : vector<16x128xf32>
    %427 = arith.addf %419, %426 : vector<16x128xf32>
    %c56_i32_199 = arith.constant 56 : i32
    %428 = arith.addi %6, %c56_i32_199 : i32
    %c5_i32_200 = arith.constant 5 : i32
    %429 = arith.addi %428, %c5_i32_200 : i32
    %430 = arith.index_cast %429 : i32 to index
    %431 = memref.load %arg1[%430] : memref<256xf32, #tpu.memory_space<smem>>
    %c7_201 = arith.constant 7 : index
    %c0_202 = arith.constant 0 : index
    %432 = vector.load %arg6[%c7_201, %c0_202] : memref<23x128xf32, #tpu.memory_space<vmem>>, vector<16x128xf32>
    %433 = vector.broadcast %431 : f32 to vector<16x128xf32>
    %434 = arith.mulf %433, %432 : vector<16x128xf32>
    %435 = arith.addf %427, %434 : vector<16x128xf32>
    %c0_203 = arith.constant 0 : index
    %c0_204 = arith.constant 0 : index
    %c6_205 = arith.constant 6 : index
    %436 = vector.load %arg4[%c0_203, %c0_204, %c6_205] : memref<2x23x256xf32, #tpu.memory_space<vmem>>, vector<1x23x128xf32>
    %437 = vector.shape_cast %436 : vector<1x23x128xf32> to vector<23x128xf32>
    %438 = vector.broadcast %3 : f32 to vector<23x128xf32>
    %439 = arith.subf %437, %438 : vector<23x128xf32>
    %c0_206 = arith.constant 0 : index
    %c0_207 = arith.constant 0 : index
    %440 = vector.load %arg6[%c0_206, %c0_207] : memref<23x128xf32, #tpu.memory_space<vmem>>, vector<23x128xf32>
    tpu.vector_store %arg6[%c0_206, %c0_207], %439 {strides = array<i32>} : memref<23x128xf32, #tpu.memory_space<vmem>>, vector<23x128xf32>,
    %441 = arith.mulf %439, %439 : vector<23x128xf32>
    %442 = arith.addf %370, %439 : vector<23x128xf32>
    %443 = arith.addf %371, %441 : vector<23x128xf32>
    %c0_i32_208 = arith.constant 0 : i32
    %444 = arith.addi %6, %c0_i32_208 : i32
    %c6_i32 = arith.constant 6 : i32
    %445 = arith.addi %444, %c6_i32 : i32
    %446 = arith.index_cast %445 : i32 to index
    %447 = memref.load %arg1[%446] : memref<256xf32, #tpu.memory_space<smem>>
    %c0_209 = arith.constant 0 : index
    %c0_210 = arith.constant 0 : index
    %448 = vector.load %arg6[%c0_209, %c0_210] : memref<23x128xf32, #tpu.memory_space<vmem>>, vector<16x128xf32>
    %449 = vector.broadcast %447 : f32 to vector<16x128xf32>
    %450 = arith.mulf %449, %448 : vector<16x128xf32>
    %451 = arith.addf %435, %450 : vector<16x128xf32>
    %c8_i32_211 = arith.constant 8 : i32
    %452 = arith.addi %6, %c8_i32_211 : i32
    %c6_i32_212 = arith.constant 6 : i32
    %453 = arith.addi %452, %c6_i32_212 : i32
    %454 = arith.index_cast %453 : i32 to index
    %455 = memref.load %arg1[%454] : memref<256xf32, #tpu.memory_space<smem>>
    %c1_213 = arith.constant 1 : index
    %c0_214 = arith.constant 0 : index
    %456 = vector.load %arg6[%c1_213, %c0_214] : memref<23x128xf32, #tpu.memory_space<vmem>>, vector<16x128xf32>
    %457 = vector.broadcast %455 : f32 to vector<16x128xf32>
    %458 = arith.mulf %457, %456 : vector<16x128xf32>
    %459 = arith.addf %451, %458 : vector<16x128xf32>
    %c16_i32_215 = arith.constant 16 : i32
    %460 = arith.addi %6, %c16_i32_215 : i32
    %c6_i32_216 = arith.constant 6 : i32
    %461 = arith.addi %460, %c6_i32_216 : i32
    %462 = arith.index_cast %461 : i32 to index
    %463 = memref.load %arg1[%462] : memref<256xf32, #tpu.memory_space<smem>>
    %c2_217 = arith.constant 2 : index
    %c0_218 = arith.constant 0 : index
    %464 = vector.load %arg6[%c2_217, %c0_218] : memref<23x128xf32, #tpu.memory_space<vmem>>, vector<16x128xf32>
    %465 = vector.broadcast %463 : f32 to vector<16x128xf32>
    %466 = arith.mulf %465, %464 : vector<16x128xf32>
    %467 = arith.addf %459, %466 : vector<16x128xf32>
    %c24_i32_219 = arith.constant 24 : i32
    %468 = arith.addi %6, %c24_i32_219 : i32
    %c6_i32_220 = arith.constant 6 : i32
    %469 = arith.addi %468, %c6_i32_220 : i32
    %470 = arith.index_cast %469 : i32 to index
    %471 = memref.load %arg1[%470] : memref<256xf32, #tpu.memory_space<smem>>
    %c3_221 = arith.constant 3 : index
    %c0_222 = arith.constant 0 : index
    %472 = vector.load %arg6[%c3_221, %c0_222] : memref<23x128xf32, #tpu.memory_space<vmem>>, vector<16x128xf32>
    %473 = vector.broadcast %471 : f32 to vector<16x128xf32>
    %474 = arith.mulf %473, %472 : vector<16x128xf32>
    %475 = arith.addf %467, %474 : vector<16x128xf32>
    %c32_i32_223 = arith.constant 32 : i32
    %476 = arith.addi %6, %c32_i32_223 : i32
    %c6_i32_224 = arith.constant 6 : i32
    %477 = arith.addi %476, %c6_i32_224 : i32
    %478 = arith.index_cast %477 : i32 to index
    %479 = memref.load %arg1[%478] : memref<256xf32, #tpu.memory_space<smem>>
    %c4_225 = arith.constant 4 : index
    %c0_226 = arith.constant 0 : index
    %480 = vector.load %arg6[%c4_225, %c0_226] : memref<23x128xf32, #tpu.memory_space<vmem>>, vector<16x128xf32>
    %481 = vector.broadcast %479 : f32 to vector<16x128xf32>
    %482 = arith.mulf %481, %480 : vector<16x128xf32>
    %483 = arith.addf %475, %482 : vector<16x128xf32>
    %c40_i32_227 = arith.constant 40 : i32
    %484 = arith.addi %6, %c40_i32_227 : i32
    %c6_i32_228 = arith.constant 6 : i32
    %485 = arith.addi %484, %c6_i32_228 : i32
    %486 = arith.index_cast %485 : i32 to index
    %487 = memref.load %arg1[%486] : memref<256xf32, #tpu.memory_space<smem>>
    %c5_229 = arith.constant 5 : index
    %c0_230 = arith.constant 0 : index
    %488 = vector.load %arg6[%c5_229, %c0_230] : memref<23x128xf32, #tpu.memory_space<vmem>>, vector<16x128xf32>
    %489 = vector.broadcast %487 : f32 to vector<16x128xf32>
    %490 = arith.mulf %489, %488 : vector<16x128xf32>
    %491 = arith.addf %483, %490 : vector<16x128xf32>
    %c48_i32_231 = arith.constant 48 : i32
    %492 = arith.addi %6, %c48_i32_231 : i32
    %c6_i32_232 = arith.constant 6 : i32
    %493 = arith.addi %492, %c6_i32_232 : i32
    %494 = arith.index_cast %493 : i32 to index
    %495 = memref.load %arg1[%494] : memref<256xf32, #tpu.memory_space<smem>>
    %c6_233 = arith.constant 6 : index
    %c0_234 = arith.constant 0 : index
    %496 = vector.load %arg6[%c6_233, %c0_234] : memref<23x128xf32, #tpu.memory_space<vmem>>, vector<16x128xf32>
    %497 = vector.broadcast %495 : f32 to vector<16x128xf32>
    %498 = arith.mulf %497, %496 : vector<16x128xf32>
    %499 = arith.addf %491, %498 : vector<16x128xf32>
    %c56_i32_235 = arith.constant 56 : i32
    %500 = arith.addi %6, %c56_i32_235 : i32
    %c6_i32_236 = arith.constant 6 : i32
    %501 = arith.addi %500, %c6_i32_236 : i32
    %502 = arith.index_cast %501 : i32 to index
    %503 = memref.load %arg1[%502] : memref<256xf32, #tpu.memory_space<smem>>
    %c7_237 = arith.constant 7 : index
    %c0_238 = arith.constant 0 : index
    %504 = vector.load %arg6[%c7_237, %c0_238] : memref<23x128xf32, #tpu.memory_space<vmem>>, vector<16x128xf32>
    %505 = vector.broadcast %503 : f32 to vector<16x128xf32>
    %506 = arith.mulf %505, %504 : vector<16x128xf32>
    %507 = arith.addf %499, %506 : vector<16x128xf32>
    %c0_239 = arith.constant 0 : index
    %c0_240 = arith.constant 0 : index
    %c7_241 = arith.constant 7 : index
    %508 = vector.load %arg4[%c0_239, %c0_240, %c7_241] : memref<2x23x256xf32, #tpu.memory_space<vmem>>, vector<1x23x128xf32>
    %509 = vector.shape_cast %508 : vector<1x23x128xf32> to vector<23x128xf32>
    %510 = vector.broadcast %3 : f32 to vector<23x128xf32>
    %511 = arith.subf %509, %510 : vector<23x128xf32>
    %c0_242 = arith.constant 0 : index
    %c0_243 = arith.constant 0 : index
    %512 = vector.load %arg6[%c0_242, %c0_243] : memref<23x128xf32, #tpu.memory_space<vmem>>, vector<23x128xf32>
    tpu.vector_store %arg6[%c0_242, %c0_243], %511 {strides = array<i32>} : memref<23x128xf32, #tpu.memory_space<vmem>>, vector<23x128xf32>,
    %513 = arith.mulf %511, %511 : vector<23x128xf32>
    %514 = arith.addf %442, %511 : vector<23x128xf32>
    %515 = arith.addf %443, %513 : vector<23x128xf32>
    %c0_i32_244 = arith.constant 0 : i32
    %516 = arith.addi %6, %c0_i32_244 : i32
    %c7_i32 = arith.constant 7 : i32
    %517 = arith.addi %516, %c7_i32 : i32
    %518 = arith.index_cast %517 : i32 to index
    %519 = memref.load %arg1[%518] : memref<256xf32, #tpu.memory_space<smem>>
    %c0_245 = arith.constant 0 : index
    %c0_246 = arith.constant 0 : index
    %520 = vector.load %arg6[%c0_245, %c0_246] : memref<23x128xf32, #tpu.memory_space<vmem>>, vector<16x128xf32>
    %521 = vector.broadcast %519 : f32 to vector<16x128xf32>
    %522 = arith.mulf %521, %520 : vector<16x128xf32>
    %523 = arith.addf %507, %522 : vector<16x128xf32>
    %c8_i32_247 = arith.constant 8 : i32
    %524 = arith.addi %6, %c8_i32_247 : i32
    %c7_i32_248 = arith.constant 7 : i32
    %525 = arith.addi %524, %c7_i32_248 : i32
    %526 = arith.index_cast %525 : i32 to index
    %527 = memref.load %arg1[%526] : memref<256xf32, #tpu.memory_space<smem>>
    %c1_249 = arith.constant 1 : index
    %c0_250 = arith.constant 0 : index
    %528 = vector.load %arg6[%c1_249, %c0_250] : memref<23x128xf32, #tpu.memory_space<vmem>>, vector<16x128xf32>
    %529 = vector.broadcast %527 : f32 to vector<16x128xf32>
    %530 = arith.mulf %529, %528 : vector<16x128xf32>
    %531 = arith.addf %523, %530 : vector<16x128xf32>
    %c16_i32_251 = arith.constant 16 : i32
    %532 = arith.addi %6, %c16_i32_251 : i32
    %c7_i32_252 = arith.constant 7 : i32
    %533 = arith.addi %532, %c7_i32_252 : i32
    %534 = arith.index_cast %533 : i32 to index
    %535 = memref.load %arg1[%534] : memref<256xf32, #tpu.memory_space<smem>>
    %c2_253 = arith.constant 2 : index
    %c0_254 = arith.constant 0 : index
    %536 = vector.load %arg6[%c2_253, %c0_254] : memref<23x128xf32, #tpu.memory_space<vmem>>, vector<16x128xf32>
    %537 = vector.broadcast %535 : f32 to vector<16x128xf32>
    %538 = arith.mulf %537, %536 : vector<16x128xf32>
    %539 = arith.addf %531, %538 : vector<16x128xf32>
    %c24_i32_255 = arith.constant 24 : i32
    %540 = arith.addi %6, %c24_i32_255 : i32
    %c7_i32_256 = arith.constant 7 : i32
    %541 = arith.addi %540, %c7_i32_256 : i32
    %542 = arith.index_cast %541 : i32 to index
    %543 = memref.load %arg1[%542] : memref<256xf32, #tpu.memory_space<smem>>
    %c3_257 = arith.constant 3 : index
    %c0_258 = arith.constant 0 : index
    %544 = vector.load %arg6[%c3_257, %c0_258] : memref<23x128xf32, #tpu.memory_space<vmem>>, vector<16x128xf32>
    %545 = vector.broadcast %543 : f32 to vector<16x128xf32>
    %546 = arith.mulf %545, %544 : vector<16x128xf32>
    %547 = arith.addf %539, %546 : vector<16x128xf32>
    %c32_i32_259 = arith.constant 32 : i32
    %548 = arith.addi %6, %c32_i32_259 : i32
    %c7_i32_260 = arith.constant 7 : i32
    %549 = arith.addi %548, %c7_i32_260 : i32
    %550 = arith.index_cast %549 : i32 to index
    %551 = memref.load %arg1[%550] : memref<256xf32, #tpu.memory_space<smem>>
    %c4_261 = arith.constant 4 : index
    %c0_262 = arith.constant 0 : index
    %552 = vector.load %arg6[%c4_261, %c0_262] : memref<23x128xf32, #tpu.memory_space<vmem>>, vector<16x128xf32>
    %553 = vector.broadcast %551 : f32 to vector<16x128xf32>
    %554 = arith.mulf %553, %552 : vector<16x128xf32>
    %555 = arith.addf %547, %554 : vector<16x128xf32>
    %c40_i32_263 = arith.constant 40 : i32
    %556 = arith.addi %6, %c40_i32_263 : i32
    %c7_i32_264 = arith.constant 7 : i32
    %557 = arith.addi %556, %c7_i32_264 : i32
    %558 = arith.index_cast %557 : i32 to index
    %559 = memref.load %arg1[%558] : memref<256xf32, #tpu.memory_space<smem>>
    %c5_265 = arith.constant 5 : index
    %c0_266 = arith.constant 0 : index
    %560 = vector.load %arg6[%c5_265, %c0_266] : memref<23x128xf32, #tpu.memory_space<vmem>>, vector<16x128xf32>
    %561 = vector.broadcast %559 : f32 to vector<16x128xf32>
    %562 = arith.mulf %561, %560 : vector<16x128xf32>
    %563 = arith.addf %555, %562 : vector<16x128xf32>
    %c48_i32_267 = arith.constant 48 : i32
    %564 = arith.addi %6, %c48_i32_267 : i32
    %c7_i32_268 = arith.constant 7 : i32
    %565 = arith.addi %564, %c7_i32_268 : i32
    %566 = arith.index_cast %565 : i32 to index
    %567 = memref.load %arg1[%566] : memref<256xf32, #tpu.memory_space<smem>>
    %c6_269 = arith.constant 6 : index
    %c0_270 = arith.constant 0 : index
    %568 = vector.load %arg6[%c6_269, %c0_270] : memref<23x128xf32, #tpu.memory_space<vmem>>, vector<16x128xf32>
    %569 = vector.broadcast %567 : f32 to vector<16x128xf32>
    %570 = arith.mulf %569, %568 : vector<16x128xf32>
    %571 = arith.addf %563, %570 : vector<16x128xf32>
    %c56_i32_271 = arith.constant 56 : i32
    %572 = arith.addi %6, %c56_i32_271 : i32
    %c7_i32_272 = arith.constant 7 : i32
    %573 = arith.addi %572, %c7_i32_272 : i32
    %574 = arith.index_cast %573 : i32 to index
    %575 = memref.load %arg1[%574] : memref<256xf32, #tpu.memory_space<smem>>
    %c7_273 = arith.constant 7 : index
    %c0_274 = arith.constant 0 : index
    %576 = vector.load %arg6[%c7_273, %c0_274] : memref<23x128xf32, #tpu.memory_space<vmem>>, vector<16x128xf32>
    %577 = vector.broadcast %575 : f32 to vector<16x128xf32>
    %578 = arith.mulf %577, %576 : vector<16x128xf32>
    %579 = arith.addf %571, %578 : vector<16x128xf32>
    %c0_275 = arith.constant 0 : index
    %c0_276 = arith.constant 0 : index
    %580 = vector.load %arg6[%c0_275, %c0_276] : memref<23x128xf32, #tpu.memory_space<vmem>>, vector<23x128xf32>
    tpu.vector_store %arg6[%c0_275, %c0_276], %514 {strides = array<i32>} : memref<23x128xf32, #tpu.memory_space<vmem>>, vector<23x128xf32>,
    %c0_277 = arith.constant 0 : index
    %c0_278 = arith.constant 0 : index
    %581 = vector.load %arg7[%c0_277, %c0_278] : memref<23x128xf32, #tpu.memory_space<vmem>>, vector<23x128xf32>
    tpu.vector_store %arg7[%c0_277, %c0_278], %515 {strides = array<i32>} : memref<23x128xf32, #tpu.memory_space<vmem>>, vector<23x128xf32>,
    %c0_279 = arith.constant 0 : index
    %c0_280 = arith.constant 0 : index
    %582 = vector.load %arg6[%c0_279, %c0_280] : memref<23x128xf32, #tpu.memory_space<vmem>>, vector<16x128xf32>
    %c0_281 = arith.constant 0 : index
    %c0_282 = arith.constant 0 : index
    %583 = vector.load %arg7[%c0_281, %c0_282] : memref<23x128xf32, #tpu.memory_space<vmem>>, vector<16x128xf32>
    %c1_283 = arith.constant 1 : index
    %c0_284 = arith.constant 0 : index
    %584 = vector.load %arg6[%c1_283, %c0_284] : memref<23x128xf32, #tpu.memory_space<vmem>>, vector<16x128xf32>
    %585 = arith.addf %582, %584 : vector<16x128xf32>
    %c1_285 = arith.constant 1 : index
    %c0_286 = arith.constant 0 : index
    %586 = vector.load %arg7[%c1_285, %c0_286] : memref<23x128xf32, #tpu.memory_space<vmem>>, vector<16x128xf32>
    %587 = arith.addf %583, %586 : vector<16x128xf32>
    %c2_287 = arith.constant 2 : index
    %c0_288 = arith.constant 0 : index
    %588 = vector.load %arg6[%c2_287, %c0_288] : memref<23x128xf32, #tpu.memory_space<vmem>>, vector<16x128xf32>
    %589 = arith.addf %585, %588 : vector<16x128xf32>
    %c2_289 = arith.constant 2 : index
    %c0_290 = arith.constant 0 : index
    %590 = vector.load %arg7[%c2_289, %c0_290] : memref<23x128xf32, #tpu.memory_space<vmem>>, vector<16x128xf32>
    %591 = arith.addf %587, %590 : vector<16x128xf32>
    %c3_291 = arith.constant 3 : index
    %c0_292 = arith.constant 0 : index
    %592 = vector.load %arg6[%c3_291, %c0_292] : memref<23x128xf32, #tpu.memory_space<vmem>>, vector<16x128xf32>
    %593 = arith.addf %589, %592 : vector<16x128xf32>
    %c3_293 = arith.constant 3 : index
    %c0_294 = arith.constant 0 : index
    %594 = vector.load %arg7[%c3_293, %c0_294] : memref<23x128xf32, #tpu.memory_space<vmem>>, vector<16x128xf32>
    %595 = arith.addf %591, %594 : vector<16x128xf32>
    %c4_295 = arith.constant 4 : index
    %c0_296 = arith.constant 0 : index
    %596 = vector.load %arg6[%c4_295, %c0_296] : memref<23x128xf32, #tpu.memory_space<vmem>>, vector<16x128xf32>
    %597 = arith.addf %593, %596 : vector<16x128xf32>
    %c4_297 = arith.constant 4 : index
    %c0_298 = arith.constant 0 : index
    %598 = vector.load %arg7[%c4_297, %c0_298] : memref<23x128xf32, #tpu.memory_space<vmem>>, vector<16x128xf32>
    %599 = arith.addf %595, %598 : vector<16x128xf32>
    %c5_299 = arith.constant 5 : index
    %c0_300 = arith.constant 0 : index
    %600 = vector.load %arg6[%c5_299, %c0_300] : memref<23x128xf32, #tpu.memory_space<vmem>>, vector<16x128xf32>
    %601 = arith.addf %597, %600 : vector<16x128xf32>
    %c5_301 = arith.constant 5 : index
    %c0_302 = arith.constant 0 : index
    %602 = vector.load %arg7[%c5_301, %c0_302] : memref<23x128xf32, #tpu.memory_space<vmem>>, vector<16x128xf32>
    %603 = arith.addf %599, %602 : vector<16x128xf32>
    %c6_303 = arith.constant 6 : index
    %c0_304 = arith.constant 0 : index
    %604 = vector.load %arg6[%c6_303, %c0_304] : memref<23x128xf32, #tpu.memory_space<vmem>>, vector<16x128xf32>
    %605 = arith.addf %601, %604 : vector<16x128xf32>
    %c6_305 = arith.constant 6 : index
    %c0_306 = arith.constant 0 : index
    %606 = vector.load %arg7[%c6_305, %c0_306] : memref<23x128xf32, #tpu.memory_space<vmem>>, vector<16x128xf32>
    %607 = arith.addf %603, %606 : vector<16x128xf32>
    %c7_307 = arith.constant 7 : index
    %c0_308 = arith.constant 0 : index
    %608 = vector.load %arg6[%c7_307, %c0_308] : memref<23x128xf32, #tpu.memory_space<vmem>>, vector<16x128xf32>
    %609 = arith.addf %605, %608 : vector<16x128xf32>
    %c7_309 = arith.constant 7 : index
    %c0_310 = arith.constant 0 : index
    %610 = vector.load %arg7[%c7_309, %c0_310] : memref<23x128xf32, #tpu.memory_space<vmem>>, vector<16x128xf32>
    %611 = arith.addf %607, %610 : vector<16x128xf32>
    %612 = arith.mulf %609, %609 : vector<16x128xf32>
    %cst = arith.constant 1.562500e-02 : f32
    %613 = vector.broadcast %cst : f32 to vector<16x128xf32>
    %614 = arith.mulf %612, %613 : vector<16x128xf32>
    %615 = arith.subf %611, %614 : vector<16x128xf32>
    %cst_311 = arith.constant 0.000000e+00 : f32
    %616 = vector.broadcast %cst_311 : f32 to vector<16x128xf32>
    %617 = arith.maximumf %615, %616 : vector<16x128xf32>
    %618 = vector.broadcast %5 : f32 to vector<16x128xf32>
    %619 = arith.mulf %617, %618 : vector<16x128xf32>
    %cst_312 = arith.constant 0.000000e+00 : f32
    %620 = vector.broadcast %cst_312 : f32 to vector<16x128xf32>
    %621 = arith.cmpf ogt, %619, %620 : vector<16x128xf32>
    %622 = math.rsqrt %619 : vector<16x128xf32>
    %623 = arith.mulf %579, %622 : vector<16x128xf32>
    %cst_313 = arith.constant 0.000000e+00 : f32
    %624 = vector.broadcast %cst_313 : f32 to vector<16x128xf32>
    %625 = arith.select %621, %623, %624 : vector<16x128xi1>, vector<16x128xf32>
    %c0_314 = arith.constant 0 : index
    %c0_315 = arith.constant 0 : index
    %c0_316 = arith.constant 0 : index
    %626 = vector.load %arg5[%c0_314, %c0_315, %c0_316] : memref<2x16x128xf32, #tpu.memory_space<vmem>>, vector<1x16x128xf32>
    %627 = vector.shape_cast %626 : vector<1x16x128xf32> to vector<16x128xf32>
    %628 = vector.shape_cast %625 : vector<16x128xf32> to vector<1x16x128xf32>
    tpu.vector_store %arg5[%c0_314, %c0_315, %c0_316], %628 {strides = array<i32>} : memref<2x16x128xf32, #tpu.memory_space<vmem>>, vector<1x16x128xf32>,
    %c2_i32_317 = arith.constant 2 : i32
    %629 = arith.muli %arg0, %c2_i32_317 : i32
    %c1_i32_318 = arith.constant 1 : i32
    %630 = arith.addi %629, %c1_i32_318 : i32
    %631 = arith.index_cast %630 : i32 to index
    %632 = memref.load %arg3[%631] : memref<4xf32, #tpu.memory_space<smem>>
    %633 = arith.index_cast %630 : i32 to index
    %634 = memref.load %arg2[%633] : memref<4xf32, #tpu.memory_space<smem>>
    %c64_i32_319 = arith.constant 64 : i32
    %635 = arith.muli %630, %c64_i32_319 : i32
    %c1_320 = arith.constant 1 : index
    %c0_321 = arith.constant 0 : index
    %c0_322 = arith.constant 0 : index
    %636 = vector.load %arg4[%c1_320, %c0_321, %c0_322] : memref<2x23x256xf32, #tpu.memory_space<vmem>>, vector<1x23x128xf32>
    %637 = vector.shape_cast %636 : vector<1x23x128xf32> to vector<23x128xf32>
    %638 = vector.broadcast %632 : f32 to vector<23x128xf32>
    %639 = arith.subf %637, %638 : vector<23x128xf32>
    %c0_323 = arith.constant 0 : index
    %c0_324 = arith.constant 0 : index
    %640 = vector.load %arg6[%c0_323, %c0_324] : memref<23x128xf32, #tpu.memory_space<vmem>>, vector<23x128xf32>
    tpu.vector_store %arg6[%c0_323, %c0_324], %639 {strides = array<i32>} : memref<23x128xf32, #tpu.memory_space<vmem>>, vector<23x128xf32>,
    %641 = arith.mulf %639, %639 : vector<23x128xf32>
    %c0_i32_325 = arith.constant 0 : i32
    %642 = arith.addi %635, %c0_i32_325 : i32
    %c0_i32_326 = arith.constant 0 : i32
    %643 = arith.addi %642, %c0_i32_326 : i32
    %644 = arith.index_cast %643 : i32 to index
    %645 = memref.load %arg1[%644] : memref<256xf32, #tpu.memory_space<smem>>
    %c0_327 = arith.constant 0 : index
    %c0_328 = arith.constant 0 : index
    %646 = vector.load %arg6[%c0_327, %c0_328] : memref<23x128xf32, #tpu.memory_space<vmem>>, vector<16x128xf32>
    %647 = vector.broadcast %645 : f32 to vector<16x128xf32>
    %648 = arith.mulf %647, %646 : vector<16x128xf32>
    %c8_i32_329 = arith.constant 8 : i32
    %649 = arith.addi %635, %c8_i32_329 : i32
    %c0_i32_330 = arith.constant 0 : i32
    %650 = arith.addi %649, %c0_i32_330 : i32
    %651 = arith.index_cast %650 : i32 to index
    %652 = memref.load %arg1[%651] : memref<256xf32, #tpu.memory_space<smem>>
    %c1_331 = arith.constant 1 : index
    %c0_332 = arith.constant 0 : index
    %653 = vector.load %arg6[%c1_331, %c0_332] : memref<23x128xf32, #tpu.memory_space<vmem>>, vector<16x128xf32>
    %654 = vector.broadcast %652 : f32 to vector<16x128xf32>
    %655 = arith.mulf %654, %653 : vector<16x128xf32>
    %656 = arith.addf %648, %655 : vector<16x128xf32>
    %c16_i32_333 = arith.constant 16 : i32
    %657 = arith.addi %635, %c16_i32_333 : i32
    %c0_i32_334 = arith.constant 0 : i32
    %658 = arith.addi %657, %c0_i32_334 : i32
    %659 = arith.index_cast %658 : i32 to index
    %660 = memref.load %arg1[%659] : memref<256xf32, #tpu.memory_space<smem>>
    %c2_335 = arith.constant 2 : index
    %c0_336 = arith.constant 0 : index
    %661 = vector.load %arg6[%c2_335, %c0_336] : memref<23x128xf32, #tpu.memory_space<vmem>>, vector<16x128xf32>
    %662 = vector.broadcast %660 : f32 to vector<16x128xf32>
    %663 = arith.mulf %662, %661 : vector<16x128xf32>
    %664 = arith.addf %656, %663 : vector<16x128xf32>
    %c24_i32_337 = arith.constant 24 : i32
    %665 = arith.addi %635, %c24_i32_337 : i32
    %c0_i32_338 = arith.constant 0 : i32
    %666 = arith.addi %665, %c0_i32_338 : i32
    %667 = arith.index_cast %666 : i32 to index
    %668 = memref.load %arg1[%667] : memref<256xf32, #tpu.memory_space<smem>>
    %c3_339 = arith.constant 3 : index
    %c0_340 = arith.constant 0 : index
    %669 = vector.load %arg6[%c3_339, %c0_340] : memref<23x128xf32, #tpu.memory_space<vmem>>, vector<16x128xf32>
    %670 = vector.broadcast %668 : f32 to vector<16x128xf32>
    %671 = arith.mulf %670, %669 : vector<16x128xf32>
    %672 = arith.addf %664, %671 : vector<16x128xf32>
    %c32_i32_341 = arith.constant 32 : i32
    %673 = arith.addi %635, %c32_i32_341 : i32
    %c0_i32_342 = arith.constant 0 : i32
    %674 = arith.addi %673, %c0_i32_342 : i32
    %675 = arith.index_cast %674 : i32 to index
    %676 = memref.load %arg1[%675] : memref<256xf32, #tpu.memory_space<smem>>
    %c4_343 = arith.constant 4 : index
    %c0_344 = arith.constant 0 : index
    %677 = vector.load %arg6[%c4_343, %c0_344] : memref<23x128xf32, #tpu.memory_space<vmem>>, vector<16x128xf32>
    %678 = vector.broadcast %676 : f32 to vector<16x128xf32>
    %679 = arith.mulf %678, %677 : vector<16x128xf32>
    %680 = arith.addf %672, %679 : vector<16x128xf32>
    %c40_i32_345 = arith.constant 40 : i32
    %681 = arith.addi %635, %c40_i32_345 : i32
    %c0_i32_346 = arith.constant 0 : i32
    %682 = arith.addi %681, %c0_i32_346 : i32
    %683 = arith.index_cast %682 : i32 to index
    %684 = memref.load %arg1[%683] : memref<256xf32, #tpu.memory_space<smem>>
    %c5_347 = arith.constant 5 : index
    %c0_348 = arith.constant 0 : index
    %685 = vector.load %arg6[%c5_347, %c0_348] : memref<23x128xf32, #tpu.memory_space<vmem>>, vector<16x128xf32>
    %686 = vector.broadcast %684 : f32 to vector<16x128xf32>
    %687 = arith.mulf %686, %685 : vector<16x128xf32>
    %688 = arith.addf %680, %687 : vector<16x128xf32>
    %c48_i32_349 = arith.constant 48 : i32
    %689 = arith.addi %635, %c48_i32_349 : i32
    %c0_i32_350 = arith.constant 0 : i32
    %690 = arith.addi %689, %c0_i32_350 : i32
    %691 = arith.index_cast %690 : i32 to index
    %692 = memref.load %arg1[%691] : memref<256xf32, #tpu.memory_space<smem>>
    %c6_351 = arith.constant 6 : index
    %c0_352 = arith.constant 0 : index
    %693 = vector.load %arg6[%c6_351, %c0_352] : memref<23x128xf32, #tpu.memory_space<vmem>>, vector<16x128xf32>
    %694 = vector.broadcast %692 : f32 to vector<16x128xf32>
    %695 = arith.mulf %694, %693 : vector<16x128xf32>
    %696 = arith.addf %688, %695 : vector<16x128xf32>
    %c56_i32_353 = arith.constant 56 : i32
    %697 = arith.addi %635, %c56_i32_353 : i32
    %c0_i32_354 = arith.constant 0 : i32
    %698 = arith.addi %697, %c0_i32_354 : i32
    %699 = arith.index_cast %698 : i32 to index
    %700 = memref.load %arg1[%699] : memref<256xf32, #tpu.memory_space<smem>>
    %c7_355 = arith.constant 7 : index
    %c0_356 = arith.constant 0 : index
    %701 = vector.load %arg6[%c7_355, %c0_356] : memref<23x128xf32, #tpu.memory_space<vmem>>, vector<16x128xf32>
    %702 = vector.broadcast %700 : f32 to vector<16x128xf32>
    %703 = arith.mulf %702, %701 : vector<16x128xf32>
    %704 = arith.addf %696, %703 : vector<16x128xf32>
    %c1_357 = arith.constant 1 : index
    %c0_358 = arith.constant 0 : index
    %c1_359 = arith.constant 1 : index
    %705 = vector.load %arg4[%c1_357, %c0_358, %c1_359] : memref<2x23x256xf32, #tpu.memory_space<vmem>>, vector<1x23x128xf32>
    %706 = vector.shape_cast %705 : vector<1x23x128xf32> to vector<23x128xf32>
    %707 = vector.broadcast %632 : f32 to vector<23x128xf32>
    %708 = arith.subf %706, %707 : vector<23x128xf32>
    %c0_360 = arith.constant 0 : index
    %c0_361 = arith.constant 0 : index
    %709 = vector.load %arg6[%c0_360, %c0_361] : memref<23x128xf32, #tpu.memory_space<vmem>>, vector<23x128xf32>
    tpu.vector_store %arg6[%c0_360, %c0_361], %708 {strides = array<i32>} : memref<23x128xf32, #tpu.memory_space<vmem>>, vector<23x128xf32>,
    %710 = arith.mulf %708, %708 : vector<23x128xf32>
    %711 = arith.addf %639, %708 : vector<23x128xf32>
    %712 = arith.addf %641, %710 : vector<23x128xf32>
    %c0_i32_362 = arith.constant 0 : i32
    %713 = arith.addi %635, %c0_i32_362 : i32
    %c1_i32_363 = arith.constant 1 : i32
    %714 = arith.addi %713, %c1_i32_363 : i32
    %715 = arith.index_cast %714 : i32 to index
    %716 = memref.load %arg1[%715] : memref<256xf32, #tpu.memory_space<smem>>
    %c0_364 = arith.constant 0 : index
    %c0_365 = arith.constant 0 : index
    %717 = vector.load %arg6[%c0_364, %c0_365] : memref<23x128xf32, #tpu.memory_space<vmem>>, vector<16x128xf32>
    %718 = vector.broadcast %716 : f32 to vector<16x128xf32>
    %719 = arith.mulf %718, %717 : vector<16x128xf32>
    %720 = arith.addf %704, %719 : vector<16x128xf32>
    %c8_i32_366 = arith.constant 8 : i32
    %721 = arith.addi %635, %c8_i32_366 : i32
    %c1_i32_367 = arith.constant 1 : i32
    %722 = arith.addi %721, %c1_i32_367 : i32
    %723 = arith.index_cast %722 : i32 to index
    %724 = memref.load %arg1[%723] : memref<256xf32, #tpu.memory_space<smem>>
    %c1_368 = arith.constant 1 : index
    %c0_369 = arith.constant 0 : index
    %725 = vector.load %arg6[%c1_368, %c0_369] : memref<23x128xf32, #tpu.memory_space<vmem>>, vector<16x128xf32>
    %726 = vector.broadcast %724 : f32 to vector<16x128xf32>
    %727 = arith.mulf %726, %725 : vector<16x128xf32>
    %728 = arith.addf %720, %727 : vector<16x128xf32>
    %c16_i32_370 = arith.constant 16 : i32
    %729 = arith.addi %635, %c16_i32_370 : i32
    %c1_i32_371 = arith.constant 1 : i32
    %730 = arith.addi %729, %c1_i32_371 : i32
    %731 = arith.index_cast %730 : i32 to index
    %732 = memref.load %arg1[%731] : memref<256xf32, #tpu.memory_space<smem>>
    %c2_372 = arith.constant 2 : index
    %c0_373 = arith.constant 0 : index
    %733 = vector.load %arg6[%c2_372, %c0_373] : memref<23x128xf32, #tpu.memory_space<vmem>>, vector<16x128xf32>
    %734 = vector.broadcast %732 : f32 to vector<16x128xf32>
    %735 = arith.mulf %734, %733 : vector<16x128xf32>
    %736 = arith.addf %728, %735 : vector<16x128xf32>
    %c24_i32_374 = arith.constant 24 : i32
    %737 = arith.addi %635, %c24_i32_374 : i32
    %c1_i32_375 = arith.constant 1 : i32
    %738 = arith.addi %737, %c1_i32_375 : i32
    %739 = arith.index_cast %738 : i32 to index
    %740 = memref.load %arg1[%739] : memref<256xf32, #tpu.memory_space<smem>>
    %c3_376 = arith.constant 3 : index
    %c0_377 = arith.constant 0 : index
    %741 = vector.load %arg6[%c3_376, %c0_377] : memref<23x128xf32, #tpu.memory_space<vmem>>, vector<16x128xf32>
    %742 = vector.broadcast %740 : f32 to vector<16x128xf32>
    %743 = arith.mulf %742, %741 : vector<16x128xf32>
    %744 = arith.addf %736, %743 : vector<16x128xf32>
    %c32_i32_378 = arith.constant 32 : i32
    %745 = arith.addi %635, %c32_i32_378 : i32
    %c1_i32_379 = arith.constant 1 : i32
    %746 = arith.addi %745, %c1_i32_379 : i32
    %747 = arith.index_cast %746 : i32 to index
    %748 = memref.load %arg1[%747] : memref<256xf32, #tpu.memory_space<smem>>
    %c4_380 = arith.constant 4 : index
    %c0_381 = arith.constant 0 : index
    %749 = vector.load %arg6[%c4_380, %c0_381] : memref<23x128xf32, #tpu.memory_space<vmem>>, vector<16x128xf32>
    %750 = vector.broadcast %748 : f32 to vector<16x128xf32>
    %751 = arith.mulf %750, %749 : vector<16x128xf32>
    %752 = arith.addf %744, %751 : vector<16x128xf32>
    %c40_i32_382 = arith.constant 40 : i32
    %753 = arith.addi %635, %c40_i32_382 : i32
    %c1_i32_383 = arith.constant 1 : i32
    %754 = arith.addi %753, %c1_i32_383 : i32
    %755 = arith.index_cast %754 : i32 to index
    %756 = memref.load %arg1[%755] : memref<256xf32, #tpu.memory_space<smem>>
    %c5_384 = arith.constant 5 : index
    %c0_385 = arith.constant 0 : index
    %757 = vector.load %arg6[%c5_384, %c0_385] : memref<23x128xf32, #tpu.memory_space<vmem>>, vector<16x128xf32>
    %758 = vector.broadcast %756 : f32 to vector<16x128xf32>
    %759 = arith.mulf %758, %757 : vector<16x128xf32>
    %760 = arith.addf %752, %759 : vector<16x128xf32>
    %c48_i32_386 = arith.constant 48 : i32
    %761 = arith.addi %635, %c48_i32_386 : i32
    %c1_i32_387 = arith.constant 1 : i32
    %762 = arith.addi %761, %c1_i32_387 : i32
    %763 = arith.index_cast %762 : i32 to index
    %764 = memref.load %arg1[%763] : memref<256xf32, #tpu.memory_space<smem>>
    %c6_388 = arith.constant 6 : index
    %c0_389 = arith.constant 0 : index
    %765 = vector.load %arg6[%c6_388, %c0_389] : memref<23x128xf32, #tpu.memory_space<vmem>>, vector<16x128xf32>
    %766 = vector.broadcast %764 : f32 to vector<16x128xf32>
    %767 = arith.mulf %766, %765 : vector<16x128xf32>
    %768 = arith.addf %760, %767 : vector<16x128xf32>
    %c56_i32_390 = arith.constant 56 : i32
    %769 = arith.addi %635, %c56_i32_390 : i32
    %c1_i32_391 = arith.constant 1 : i32
    %770 = arith.addi %769, %c1_i32_391 : i32
    %771 = arith.index_cast %770 : i32 to index
    %772 = memref.load %arg1[%771] : memref<256xf32, #tpu.memory_space<smem>>
    %c7_392 = arith.constant 7 : index
    %c0_393 = arith.constant 0 : index
    %773 = vector.load %arg6[%c7_392, %c0_393] : memref<23x128xf32, #tpu.memory_space<vmem>>, vector<16x128xf32>
    %774 = vector.broadcast %772 : f32 to vector<16x128xf32>
    %775 = arith.mulf %774, %773 : vector<16x128xf32>
    %776 = arith.addf %768, %775 : vector<16x128xf32>
    %c1_394 = arith.constant 1 : index
    %c0_395 = arith.constant 0 : index
    %c2_396 = arith.constant 2 : index
    %777 = vector.load %arg4[%c1_394, %c0_395, %c2_396] : memref<2x23x256xf32, #tpu.memory_space<vmem>>, vector<1x23x128xf32>
    %778 = vector.shape_cast %777 : vector<1x23x128xf32> to vector<23x128xf32>
    %779 = vector.broadcast %632 : f32 to vector<23x128xf32>
    %780 = arith.subf %778, %779 : vector<23x128xf32>
    %c0_397 = arith.constant 0 : index
    %c0_398 = arith.constant 0 : index
    %781 = vector.load %arg6[%c0_397, %c0_398] : memref<23x128xf32, #tpu.memory_space<vmem>>, vector<23x128xf32>
    tpu.vector_store %arg6[%c0_397, %c0_398], %780 {strides = array<i32>} : memref<23x128xf32, #tpu.memory_space<vmem>>, vector<23x128xf32>,
    %782 = arith.mulf %780, %780 : vector<23x128xf32>
    %783 = arith.addf %711, %780 : vector<23x128xf32>
    %784 = arith.addf %712, %782 : vector<23x128xf32>
    %c0_i32_399 = arith.constant 0 : i32
    %785 = arith.addi %635, %c0_i32_399 : i32
    %c2_i32_400 = arith.constant 2 : i32
    %786 = arith.addi %785, %c2_i32_400 : i32
    %787 = arith.index_cast %786 : i32 to index
    %788 = memref.load %arg1[%787] : memref<256xf32, #tpu.memory_space<smem>>
    %c0_401 = arith.constant 0 : index
    %c0_402 = arith.constant 0 : index
    %789 = vector.load %arg6[%c0_401, %c0_402] : memref<23x128xf32, #tpu.memory_space<vmem>>, vector<16x128xf32>
    %790 = vector.broadcast %788 : f32 to vector<16x128xf32>
    %791 = arith.mulf %790, %789 : vector<16x128xf32>
    %792 = arith.addf %776, %791 : vector<16x128xf32>
    %c8_i32_403 = arith.constant 8 : i32
    %793 = arith.addi %635, %c8_i32_403 : i32
    %c2_i32_404 = arith.constant 2 : i32
    %794 = arith.addi %793, %c2_i32_404 : i32
    %795 = arith.index_cast %794 : i32 to index
    %796 = memref.load %arg1[%795] : memref<256xf32, #tpu.memory_space<smem>>
    %c1_405 = arith.constant 1 : index
    %c0_406 = arith.constant 0 : index
    %797 = vector.load %arg6[%c1_405, %c0_406] : memref<23x128xf32, #tpu.memory_space<vmem>>, vector<16x128xf32>
    %798 = vector.broadcast %796 : f32 to vector<16x128xf32>
    %799 = arith.mulf %798, %797 : vector<16x128xf32>
    %800 = arith.addf %792, %799 : vector<16x128xf32>
    %c16_i32_407 = arith.constant 16 : i32
    %801 = arith.addi %635, %c16_i32_407 : i32
    %c2_i32_408 = arith.constant 2 : i32
    %802 = arith.addi %801, %c2_i32_408 : i32
    %803 = arith.index_cast %802 : i32 to index
    %804 = memref.load %arg1[%803] : memref<256xf32, #tpu.memory_space<smem>>
    %c2_409 = arith.constant 2 : index
    %c0_410 = arith.constant 0 : index
    %805 = vector.load %arg6[%c2_409, %c0_410] : memref<23x128xf32, #tpu.memory_space<vmem>>, vector<16x128xf32>
    %806 = vector.broadcast %804 : f32 to vector<16x128xf32>
    %807 = arith.mulf %806, %805 : vector<16x128xf32>
    %808 = arith.addf %800, %807 : vector<16x128xf32>
    %c24_i32_411 = arith.constant 24 : i32
    %809 = arith.addi %635, %c24_i32_411 : i32
    %c2_i32_412 = arith.constant 2 : i32
    %810 = arith.addi %809, %c2_i32_412 : i32
    %811 = arith.index_cast %810 : i32 to index
    %812 = memref.load %arg1[%811] : memref<256xf32, #tpu.memory_space<smem>>
    %c3_413 = arith.constant 3 : index
    %c0_414 = arith.constant 0 : index
    %813 = vector.load %arg6[%c3_413, %c0_414] : memref<23x128xf32, #tpu.memory_space<vmem>>, vector<16x128xf32>
    %814 = vector.broadcast %812 : f32 to vector<16x128xf32>
    %815 = arith.mulf %814, %813 : vector<16x128xf32>
    %816 = arith.addf %808, %815 : vector<16x128xf32>
    %c32_i32_415 = arith.constant 32 : i32
    %817 = arith.addi %635, %c32_i32_415 : i32
    %c2_i32_416 = arith.constant 2 : i32
    %818 = arith.addi %817, %c2_i32_416 : i32
    %819 = arith.index_cast %818 : i32 to index
    %820 = memref.load %arg1[%819] : memref<256xf32, #tpu.memory_space<smem>>
    %c4_417 = arith.constant 4 : index
    %c0_418 = arith.constant 0 : index
    %821 = vector.load %arg6[%c4_417, %c0_418] : memref<23x128xf32, #tpu.memory_space<vmem>>, vector<16x128xf32>
    %822 = vector.broadcast %820 : f32 to vector<16x128xf32>
    %823 = arith.mulf %822, %821 : vector<16x128xf32>
    %824 = arith.addf %816, %823 : vector<16x128xf32>
    %c40_i32_419 = arith.constant 40 : i32
    %825 = arith.addi %635, %c40_i32_419 : i32
    %c2_i32_420 = arith.constant 2 : i32
    %826 = arith.addi %825, %c2_i32_420 : i32
    %827 = arith.index_cast %826 : i32 to index
    %828 = memref.load %arg1[%827] : memref<256xf32, #tpu.memory_space<smem>>
    %c5_421 = arith.constant 5 : index
    %c0_422 = arith.constant 0 : index
    %829 = vector.load %arg6[%c5_421, %c0_422] : memref<23x128xf32, #tpu.memory_space<vmem>>, vector<16x128xf32>
    %830 = vector.broadcast %828 : f32 to vector<16x128xf32>
    %831 = arith.mulf %830, %829 : vector<16x128xf32>
    %832 = arith.addf %824, %831 : vector<16x128xf32>
    %c48_i32_423 = arith.constant 48 : i32
    %833 = arith.addi %635, %c48_i32_423 : i32
    %c2_i32_424 = arith.constant 2 : i32
    %834 = arith.addi %833, %c2_i32_424 : i32
    %835 = arith.index_cast %834 : i32 to index
    %836 = memref.load %arg1[%835] : memref<256xf32, #tpu.memory_space<smem>>
    %c6_425 = arith.constant 6 : index
    %c0_426 = arith.constant 0 : index
    %837 = vector.load %arg6[%c6_425, %c0_426] : memref<23x128xf32, #tpu.memory_space<vmem>>, vector<16x128xf32>
    %838 = vector.broadcast %836 : f32 to vector<16x128xf32>
    %839 = arith.mulf %838, %837 : vector<16x128xf32>
    %840 = arith.addf %832, %839 : vector<16x128xf32>
    %c56_i32_427 = arith.constant 56 : i32
    %841 = arith.addi %635, %c56_i32_427 : i32
    %c2_i32_428 = arith.constant 2 : i32
    %842 = arith.addi %841, %c2_i32_428 : i32
    %843 = arith.index_cast %842 : i32 to index
    %844 = memref.load %arg1[%843] : memref<256xf32, #tpu.memory_space<smem>>
    %c7_429 = arith.constant 7 : index
    %c0_430 = arith.constant 0 : index
    %845 = vector.load %arg6[%c7_429, %c0_430] : memref<23x128xf32, #tpu.memory_space<vmem>>, vector<16x128xf32>
    %846 = vector.broadcast %844 : f32 to vector<16x128xf32>
    %847 = arith.mulf %846, %845 : vector<16x128xf32>
    %848 = arith.addf %840, %847 : vector<16x128xf32>
    %c1_431 = arith.constant 1 : index
    %c0_432 = arith.constant 0 : index
    %c3_433 = arith.constant 3 : index
    %849 = vector.load %arg4[%c1_431, %c0_432, %c3_433] : memref<2x23x256xf32, #tpu.memory_space<vmem>>, vector<1x23x128xf32>
    %850 = vector.shape_cast %849 : vector<1x23x128xf32> to vector<23x128xf32>
    %851 = vector.broadcast %632 : f32 to vector<23x128xf32>
    %852 = arith.subf %850, %851 : vector<23x128xf32>
    %c0_434 = arith.constant 0 : index
    %c0_435 = arith.constant 0 : index
    %853 = vector.load %arg6[%c0_434, %c0_435] : memref<23x128xf32, #tpu.memory_space<vmem>>, vector<23x128xf32>
    tpu.vector_store %arg6[%c0_434, %c0_435], %852 {strides = array<i32>} : memref<23x128xf32, #tpu.memory_space<vmem>>, vector<23x128xf32>,
    %854 = arith.mulf %852, %852 : vector<23x128xf32>
    %855 = arith.addf %783, %852 : vector<23x128xf32>
    %856 = arith.addf %784, %854 : vector<23x128xf32>
    %c0_i32_436 = arith.constant 0 : i32
    %857 = arith.addi %635, %c0_i32_436 : i32
    %c3_i32_437 = arith.constant 3 : i32
    %858 = arith.addi %857, %c3_i32_437 : i32
    %859 = arith.index_cast %858 : i32 to index
    %860 = memref.load %arg1[%859] : memref<256xf32, #tpu.memory_space<smem>>
    %c0_438 = arith.constant 0 : index
    %c0_439 = arith.constant 0 : index
    %861 = vector.load %arg6[%c0_438, %c0_439] : memref<23x128xf32, #tpu.memory_space<vmem>>, vector<16x128xf32>
    %862 = vector.broadcast %860 : f32 to vector<16x128xf32>
    %863 = arith.mulf %862, %861 : vector<16x128xf32>
    %864 = arith.addf %848, %863 : vector<16x128xf32>
    %c8_i32_440 = arith.constant 8 : i32
    %865 = arith.addi %635, %c8_i32_440 : i32
    %c3_i32_441 = arith.constant 3 : i32
    %866 = arith.addi %865, %c3_i32_441 : i32
    %867 = arith.index_cast %866 : i32 to index
    %868 = memref.load %arg1[%867] : memref<256xf32, #tpu.memory_space<smem>>
    %c1_442 = arith.constant 1 : index
    %c0_443 = arith.constant 0 : index
    %869 = vector.load %arg6[%c1_442, %c0_443] : memref<23x128xf32, #tpu.memory_space<vmem>>, vector<16x128xf32>
    %870 = vector.broadcast %868 : f32 to vector<16x128xf32>
    %871 = arith.mulf %870, %869 : vector<16x128xf32>
    %872 = arith.addf %864, %871 : vector<16x128xf32>
    %c16_i32_444 = arith.constant 16 : i32
    %873 = arith.addi %635, %c16_i32_444 : i32
    %c3_i32_445 = arith.constant 3 : i32
    %874 = arith.addi %873, %c3_i32_445 : i32
    %875 = arith.index_cast %874 : i32 to index
    %876 = memref.load %arg1[%875] : memref<256xf32, #tpu.memory_space<smem>>
    %c2_446 = arith.constant 2 : index
    %c0_447 = arith.constant 0 : index
    %877 = vector.load %arg6[%c2_446, %c0_447] : memref<23x128xf32, #tpu.memory_space<vmem>>, vector<16x128xf32>
    %878 = vector.broadcast %876 : f32 to vector<16x128xf32>
    %879 = arith.mulf %878, %877 : vector<16x128xf32>
    %880 = arith.addf %872, %879 : vector<16x128xf32>
    %c24_i32_448 = arith.constant 24 : i32
    %881 = arith.addi %635, %c24_i32_448 : i32
    %c3_i32_449 = arith.constant 3 : i32
    %882 = arith.addi %881, %c3_i32_449 : i32
    %883 = arith.index_cast %882 : i32 to index
    %884 = memref.load %arg1[%883] : memref<256xf32, #tpu.memory_space<smem>>
    %c3_450 = arith.constant 3 : index
    %c0_451 = arith.constant 0 : index
    %885 = vector.load %arg6[%c3_450, %c0_451] : memref<23x128xf32, #tpu.memory_space<vmem>>, vector<16x128xf32>
    %886 = vector.broadcast %884 : f32 to vector<16x128xf32>
    %887 = arith.mulf %886, %885 : vector<16x128xf32>
    %888 = arith.addf %880, %887 : vector<16x128xf32>
    %c32_i32_452 = arith.constant 32 : i32
    %889 = arith.addi %635, %c32_i32_452 : i32
    %c3_i32_453 = arith.constant 3 : i32
    %890 = arith.addi %889, %c3_i32_453 : i32
    %891 = arith.index_cast %890 : i32 to index
    %892 = memref.load %arg1[%891] : memref<256xf32, #tpu.memory_space<smem>>
    %c4_454 = arith.constant 4 : index
    %c0_455 = arith.constant 0 : index
    %893 = vector.load %arg6[%c4_454, %c0_455] : memref<23x128xf32, #tpu.memory_space<vmem>>, vector<16x128xf32>
    %894 = vector.broadcast %892 : f32 to vector<16x128xf32>
    %895 = arith.mulf %894, %893 : vector<16x128xf32>
    %896 = arith.addf %888, %895 : vector<16x128xf32>
    %c40_i32_456 = arith.constant 40 : i32
    %897 = arith.addi %635, %c40_i32_456 : i32
    %c3_i32_457 = arith.constant 3 : i32
    %898 = arith.addi %897, %c3_i32_457 : i32
    %899 = arith.index_cast %898 : i32 to index
    %900 = memref.load %arg1[%899] : memref<256xf32, #tpu.memory_space<smem>>
    %c5_458 = arith.constant 5 : index
    %c0_459 = arith.constant 0 : index
    %901 = vector.load %arg6[%c5_458, %c0_459] : memref<23x128xf32, #tpu.memory_space<vmem>>, vector<16x128xf32>
    %902 = vector.broadcast %900 : f32 to vector<16x128xf32>
    %903 = arith.mulf %902, %901 : vector<16x128xf32>
    %904 = arith.addf %896, %903 : vector<16x128xf32>
    %c48_i32_460 = arith.constant 48 : i32
    %905 = arith.addi %635, %c48_i32_460 : i32
    %c3_i32_461 = arith.constant 3 : i32
    %906 = arith.addi %905, %c3_i32_461 : i32
    %907 = arith.index_cast %906 : i32 to index
    %908 = memref.load %arg1[%907] : memref<256xf32, #tpu.memory_space<smem>>
    %c6_462 = arith.constant 6 : index
    %c0_463 = arith.constant 0 : index
    %909 = vector.load %arg6[%c6_462, %c0_463] : memref<23x128xf32, #tpu.memory_space<vmem>>, vector<16x128xf32>
    %910 = vector.broadcast %908 : f32 to vector<16x128xf32>
    %911 = arith.mulf %910, %909 : vector<16x128xf32>
    %912 = arith.addf %904, %911 : vector<16x128xf32>
    %c56_i32_464 = arith.constant 56 : i32
    %913 = arith.addi %635, %c56_i32_464 : i32
    %c3_i32_465 = arith.constant 3 : i32
    %914 = arith.addi %913, %c3_i32_465 : i32
    %915 = arith.index_cast %914 : i32 to index
    %916 = memref.load %arg1[%915] : memref<256xf32, #tpu.memory_space<smem>>
    %c7_466 = arith.constant 7 : index
    %c0_467 = arith.constant 0 : index
    %917 = vector.load %arg6[%c7_466, %c0_467] : memref<23x128xf32, #tpu.memory_space<vmem>>, vector<16x128xf32>
    %918 = vector.broadcast %916 : f32 to vector<16x128xf32>
    %919 = arith.mulf %918, %917 : vector<16x128xf32>
    %920 = arith.addf %912, %919 : vector<16x128xf32>
    %c1_468 = arith.constant 1 : index
    %c0_469 = arith.constant 0 : index
    %c4_470 = arith.constant 4 : index
    %921 = vector.load %arg4[%c1_468, %c0_469, %c4_470] : memref<2x23x256xf32, #tpu.memory_space<vmem>>, vector<1x23x128xf32>
    %922 = vector.shape_cast %921 : vector<1x23x128xf32> to vector<23x128xf32>
    %923 = vector.broadcast %632 : f32 to vector<23x128xf32>
    %924 = arith.subf %922, %923 : vector<23x128xf32>
    %c0_471 = arith.constant 0 : index
    %c0_472 = arith.constant 0 : index
    %925 = vector.load %arg6[%c0_471, %c0_472] : memref<23x128xf32, #tpu.memory_space<vmem>>, vector<23x128xf32>
    tpu.vector_store %arg6[%c0_471, %c0_472], %924 {strides = array<i32>} : memref<23x128xf32, #tpu.memory_space<vmem>>, vector<23x128xf32>,
    %926 = arith.mulf %924, %924 : vector<23x128xf32>
    %927 = arith.addf %855, %924 : vector<23x128xf32>
    %928 = arith.addf %856, %926 : vector<23x128xf32>
    %c0_i32_473 = arith.constant 0 : i32
    %929 = arith.addi %635, %c0_i32_473 : i32
    %c4_i32_474 = arith.constant 4 : i32
    %930 = arith.addi %929, %c4_i32_474 : i32
    %931 = arith.index_cast %930 : i32 to index
    %932 = memref.load %arg1[%931] : memref<256xf32, #tpu.memory_space<smem>>
    %c0_475 = arith.constant 0 : index
    %c0_476 = arith.constant 0 : index
    %933 = vector.load %arg6[%c0_475, %c0_476] : memref<23x128xf32, #tpu.memory_space<vmem>>, vector<16x128xf32>
    %934 = vector.broadcast %932 : f32 to vector<16x128xf32>
    %935 = arith.mulf %934, %933 : vector<16x128xf32>
    %936 = arith.addf %920, %935 : vector<16x128xf32>
    %c8_i32_477 = arith.constant 8 : i32
    %937 = arith.addi %635, %c8_i32_477 : i32
    %c4_i32_478 = arith.constant 4 : i32
    %938 = arith.addi %937, %c4_i32_478 : i32
    %939 = arith.index_cast %938 : i32 to index
    %940 = memref.load %arg1[%939] : memref<256xf32, #tpu.memory_space<smem>>
    %c1_479 = arith.constant 1 : index
    %c0_480 = arith.constant 0 : index
    %941 = vector.load %arg6[%c1_479, %c0_480] : memref<23x128xf32, #tpu.memory_space<vmem>>, vector<16x128xf32>
    %942 = vector.broadcast %940 : f32 to vector<16x128xf32>
    %943 = arith.mulf %942, %941 : vector<16x128xf32>
    %944 = arith.addf %936, %943 : vector<16x128xf32>
    %c16_i32_481 = arith.constant 16 : i32
    %945 = arith.addi %635, %c16_i32_481 : i32
    %c4_i32_482 = arith.constant 4 : i32
    %946 = arith.addi %945, %c4_i32_482 : i32
    %947 = arith.index_cast %946 : i32 to index
    %948 = memref.load %arg1[%947] : memref<256xf32, #tpu.memory_space<smem>>
    %c2_483 = arith.constant 2 : index
    %c0_484 = arith.constant 0 : index
    %949 = vector.load %arg6[%c2_483, %c0_484] : memref<23x128xf32, #tpu.memory_space<vmem>>, vector<16x128xf32>
    %950 = vector.broadcast %948 : f32 to vector<16x128xf32>
    %951 = arith.mulf %950, %949 : vector<16x128xf32>
    %952 = arith.addf %944, %951 : vector<16x128xf32>
    %c24_i32_485 = arith.constant 24 : i32
    %953 = arith.addi %635, %c24_i32_485 : i32
    %c4_i32_486 = arith.constant 4 : i32
    %954 = arith.addi %953, %c4_i32_486 : i32
    %955 = arith.index_cast %954 : i32 to index
    %956 = memref.load %arg1[%955] : memref<256xf32, #tpu.memory_space<smem>>
    %c3_487 = arith.constant 3 : index
    %c0_488 = arith.constant 0 : index
    %957 = vector.load %arg6[%c3_487, %c0_488] : memref<23x128xf32, #tpu.memory_space<vmem>>, vector<16x128xf32>
    %958 = vector.broadcast %956 : f32 to vector<16x128xf32>
    %959 = arith.mulf %958, %957 : vector<16x128xf32>
    %960 = arith.addf %952, %959 : vector<16x128xf32>
    %c32_i32_489 = arith.constant 32 : i32
    %961 = arith.addi %635, %c32_i32_489 : i32
    %c4_i32_490 = arith.constant 4 : i32
    %962 = arith.addi %961, %c4_i32_490 : i32
    %963 = arith.index_cast %962 : i32 to index
    %964 = memref.load %arg1[%963] : memref<256xf32, #tpu.memory_space<smem>>
    %c4_491 = arith.constant 4 : index
    %c0_492 = arith.constant 0 : index
    %965 = vector.load %arg6[%c4_491, %c0_492] : memref<23x128xf32, #tpu.memory_space<vmem>>, vector<16x128xf32>
    %966 = vector.broadcast %964 : f32 to vector<16x128xf32>
    %967 = arith.mulf %966, %965 : vector<16x128xf32>
    %968 = arith.addf %960, %967 : vector<16x128xf32>
    %c40_i32_493 = arith.constant 40 : i32
    %969 = arith.addi %635, %c40_i32_493 : i32
    %c4_i32_494 = arith.constant 4 : i32
    %970 = arith.addi %969, %c4_i32_494 : i32
    %971 = arith.index_cast %970 : i32 to index
    %972 = memref.load %arg1[%971] : memref<256xf32, #tpu.memory_space<smem>>
    %c5_495 = arith.constant 5 : index
    %c0_496 = arith.constant 0 : index
    %973 = vector.load %arg6[%c5_495, %c0_496] : memref<23x128xf32, #tpu.memory_space<vmem>>, vector<16x128xf32>
    %974 = vector.broadcast %972 : f32 to vector<16x128xf32>
    %975 = arith.mulf %974, %973 : vector<16x128xf32>
    %976 = arith.addf %968, %975 : vector<16x128xf32>
    %c48_i32_497 = arith.constant 48 : i32
    %977 = arith.addi %635, %c48_i32_497 : i32
    %c4_i32_498 = arith.constant 4 : i32
    %978 = arith.addi %977, %c4_i32_498 : i32
    %979 = arith.index_cast %978 : i32 to index
    %980 = memref.load %arg1[%979] : memref<256xf32, #tpu.memory_space<smem>>
    %c6_499 = arith.constant 6 : index
    %c0_500 = arith.constant 0 : index
    %981 = vector.load %arg6[%c6_499, %c0_500] : memref<23x128xf32, #tpu.memory_space<vmem>>, vector<16x128xf32>
    %982 = vector.broadcast %980 : f32 to vector<16x128xf32>
    %983 = arith.mulf %982, %981 : vector<16x128xf32>
    %984 = arith.addf %976, %983 : vector<16x128xf32>
    %c56_i32_501 = arith.constant 56 : i32
    %985 = arith.addi %635, %c56_i32_501 : i32
    %c4_i32_502 = arith.constant 4 : i32
    %986 = arith.addi %985, %c4_i32_502 : i32
    %987 = arith.index_cast %986 : i32 to index
    %988 = memref.load %arg1[%987] : memref<256xf32, #tpu.memory_space<smem>>
    %c7_503 = arith.constant 7 : index
    %c0_504 = arith.constant 0 : index
    %989 = vector.load %arg6[%c7_503, %c0_504] : memref<23x128xf32, #tpu.memory_space<vmem>>, vector<16x128xf32>
    %990 = vector.broadcast %988 : f32 to vector<16x128xf32>
    %991 = arith.mulf %990, %989 : vector<16x128xf32>
    %992 = arith.addf %984, %991 : vector<16x128xf32>
    %c1_505 = arith.constant 1 : index
    %c0_506 = arith.constant 0 : index
    %c5_507 = arith.constant 5 : index
    %993 = vector.load %arg4[%c1_505, %c0_506, %c5_507] : memref<2x23x256xf32, #tpu.memory_space<vmem>>, vector<1x23x128xf32>
    %994 = vector.shape_cast %993 : vector<1x23x128xf32> to vector<23x128xf32>
    %995 = vector.broadcast %632 : f32 to vector<23x128xf32>
    %996 = arith.subf %994, %995 : vector<23x128xf32>
    %c0_508 = arith.constant 0 : index
    %c0_509 = arith.constant 0 : index
    %997 = vector.load %arg6[%c0_508, %c0_509] : memref<23x128xf32, #tpu.memory_space<vmem>>, vector<23x128xf32>
    tpu.vector_store %arg6[%c0_508, %c0_509], %996 {strides = array<i32>} : memref<23x128xf32, #tpu.memory_space<vmem>>, vector<23x128xf32>,
    %998 = arith.mulf %996, %996 : vector<23x128xf32>
    %999 = arith.addf %927, %996 : vector<23x128xf32>
    %1000 = arith.addf %928, %998 : vector<23x128xf32>
    %c0_i32_510 = arith.constant 0 : i32
    %1001 = arith.addi %635, %c0_i32_510 : i32
    %c5_i32_511 = arith.constant 5 : i32
    %1002 = arith.addi %1001, %c5_i32_511 : i32
    %1003 = arith.index_cast %1002 : i32 to index
    %1004 = memref.load %arg1[%1003] : memref<256xf32, #tpu.memory_space<smem>>
    %c0_512 = arith.constant 0 : index
    %c0_513 = arith.constant 0 : index
    %1005 = vector.load %arg6[%c0_512, %c0_513] : memref<23x128xf32, #tpu.memory_space<vmem>>, vector<16x128xf32>
    %1006 = vector.broadcast %1004 : f32 to vector<16x128xf32>
    %1007 = arith.mulf %1006, %1005 : vector<16x128xf32>
    %1008 = arith.addf %992, %1007 : vector<16x128xf32>
    %c8_i32_514 = arith.constant 8 : i32
    %1009 = arith.addi %635, %c8_i32_514 : i32
    %c5_i32_515 = arith.constant 5 : i32
    %1010 = arith.addi %1009, %c5_i32_515 : i32
    %1011 = arith.index_cast %1010 : i32 to index
    %1012 = memref.load %arg1[%1011] : memref<256xf32, #tpu.memory_space<smem>>
    %c1_516 = arith.constant 1 : index
    %c0_517 = arith.constant 0 : index
    %1013 = vector.load %arg6[%c1_516, %c0_517] : memref<23x128xf32, #tpu.memory_space<vmem>>, vector<16x128xf32>
    %1014 = vector.broadcast %1012 : f32 to vector<16x128xf32>
    %1015 = arith.mulf %1014, %1013 : vector<16x128xf32>
    %1016 = arith.addf %1008, %1015 : vector<16x128xf32>
    %c16_i32_518 = arith.constant 16 : i32
    %1017 = arith.addi %635, %c16_i32_518 : i32
    %c5_i32_519 = arith.constant 5 : i32
    %1018 = arith.addi %1017, %c5_i32_519 : i32
    %1019 = arith.index_cast %1018 : i32 to index
    %1020 = memref.load %arg1[%1019] : memref<256xf32, #tpu.memory_space<smem>>
    %c2_520 = arith.constant 2 : index
    %c0_521 = arith.constant 0 : index
    %1021 = vector.load %arg6[%c2_520, %c0_521] : memref<23x128xf32, #tpu.memory_space<vmem>>, vector<16x128xf32>
    %1022 = vector.broadcast %1020 : f32 to vector<16x128xf32>
    %1023 = arith.mulf %1022, %1021 : vector<16x128xf32>
    %1024 = arith.addf %1016, %1023 : vector<16x128xf32>
    %c24_i32_522 = arith.constant 24 : i32
    %1025 = arith.addi %635, %c24_i32_522 : i32
    %c5_i32_523 = arith.constant 5 : i32
    %1026 = arith.addi %1025, %c5_i32_523 : i32
    %1027 = arith.index_cast %1026 : i32 to index
    %1028 = memref.load %arg1[%1027] : memref<256xf32, #tpu.memory_space<smem>>
    %c3_524 = arith.constant 3 : index
    %c0_525 = arith.constant 0 : index
    %1029 = vector.load %arg6[%c3_524, %c0_525] : memref<23x128xf32, #tpu.memory_space<vmem>>, vector<16x128xf32>
    %1030 = vector.broadcast %1028 : f32 to vector<16x128xf32>
    %1031 = arith.mulf %1030, %1029 : vector<16x128xf32>
    %1032 = arith.addf %1024, %1031 : vector<16x128xf32>
    %c32_i32_526 = arith.constant 32 : i32
    %1033 = arith.addi %635, %c32_i32_526 : i32
    %c5_i32_527 = arith.constant 5 : i32
    %1034 = arith.addi %1033, %c5_i32_527 : i32
    %1035 = arith.index_cast %1034 : i32 to index
    %1036 = memref.load %arg1[%1035] : memref<256xf32, #tpu.memory_space<smem>>
    %c4_528 = arith.constant 4 : index
    %c0_529 = arith.constant 0 : index
    %1037 = vector.load %arg6[%c4_528, %c0_529] : memref<23x128xf32, #tpu.memory_space<vmem>>, vector<16x128xf32>
    %1038 = vector.broadcast %1036 : f32 to vector<16x128xf32>
    %1039 = arith.mulf %1038, %1037 : vector<16x128xf32>
    %1040 = arith.addf %1032, %1039 : vector<16x128xf32>
    %c40_i32_530 = arith.constant 40 : i32
    %1041 = arith.addi %635, %c40_i32_530 : i32
    %c5_i32_531 = arith.constant 5 : i32
    %1042 = arith.addi %1041, %c5_i32_531 : i32
    %1043 = arith.index_cast %1042 : i32 to index
    %1044 = memref.load %arg1[%1043] : memref<256xf32, #tpu.memory_space<smem>>
    %c5_532 = arith.constant 5 : index
    %c0_533 = arith.constant 0 : index
    %1045 = vector.load %arg6[%c5_532, %c0_533] : memref<23x128xf32, #tpu.memory_space<vmem>>, vector<16x128xf32>
    %1046 = vector.broadcast %1044 : f32 to vector<16x128xf32>
    %1047 = arith.mulf %1046, %1045 : vector<16x128xf32>
    %1048 = arith.addf %1040, %1047 : vector<16x128xf32>
    %c48_i32_534 = arith.constant 48 : i32
    %1049 = arith.addi %635, %c48_i32_534 : i32
    %c5_i32_535 = arith.constant 5 : i32
    %1050 = arith.addi %1049, %c5_i32_535 : i32
    %1051 = arith.index_cast %1050 : i32 to index
    %1052 = memref.load %arg1[%1051] : memref<256xf32, #tpu.memory_space<smem>>
    %c6_536 = arith.constant 6 : index
    %c0_537 = arith.constant 0 : index
    %1053 = vector.load %arg6[%c6_536, %c0_537] : memref<23x128xf32, #tpu.memory_space<vmem>>, vector<16x128xf32>
    %1054 = vector.broadcast %1052 : f32 to vector<16x128xf32>
    %1055 = arith.mulf %1054, %1053 : vector<16x128xf32>
    %1056 = arith.addf %1048, %1055 : vector<16x128xf32>
    %c56_i32_538 = arith.constant 56 : i32
    %1057 = arith.addi %635, %c56_i32_538 : i32
    %c5_i32_539 = arith.constant 5 : i32
    %1058 = arith.addi %1057, %c5_i32_539 : i32
    %1059 = arith.index_cast %1058 : i32 to index
    %1060 = memref.load %arg1[%1059] : memref<256xf32, #tpu.memory_space<smem>>
    %c7_540 = arith.constant 7 : index
    %c0_541 = arith.constant 0 : index
    %1061 = vector.load %arg6[%c7_540, %c0_541] : memref<23x128xf32, #tpu.memory_space<vmem>>, vector<16x128xf32>
    %1062 = vector.broadcast %1060 : f32 to vector<16x128xf32>
    %1063 = arith.mulf %1062, %1061 : vector<16x128xf32>
    %1064 = arith.addf %1056, %1063 : vector<16x128xf32>
    %c1_542 = arith.constant 1 : index
    %c0_543 = arith.constant 0 : index
    %c6_544 = arith.constant 6 : index
    %1065 = vector.load %arg4[%c1_542, %c0_543, %c6_544] : memref<2x23x256xf32, #tpu.memory_space<vmem>>, vector<1x23x128xf32>
    %1066 = vector.shape_cast %1065 : vector<1x23x128xf32> to vector<23x128xf32>
    %1067 = vector.broadcast %632 : f32 to vector<23x128xf32>
    %1068 = arith.subf %1066, %1067 : vector<23x128xf32>
    %c0_545 = arith.constant 0 : index
    %c0_546 = arith.constant 0 : index
    %1069 = vector.load %arg6[%c0_545, %c0_546] : memref<23x128xf32, #tpu.memory_space<vmem>>, vector<23x128xf32>
    tpu.vector_store %arg6[%c0_545, %c0_546], %1068 {strides = array<i32>} : memref<23x128xf32, #tpu.memory_space<vmem>>, vector<23x128xf32>,
    %1070 = arith.mulf %1068, %1068 : vector<23x128xf32>
    %1071 = arith.addf %999, %1068 : vector<23x128xf32>
    %1072 = arith.addf %1000, %1070 : vector<23x128xf32>
    %c0_i32_547 = arith.constant 0 : i32
    %1073 = arith.addi %635, %c0_i32_547 : i32
    %c6_i32_548 = arith.constant 6 : i32
    %1074 = arith.addi %1073, %c6_i32_548 : i32
    %1075 = arith.index_cast %1074 : i32 to index
    %1076 = memref.load %arg1[%1075] : memref<256xf32, #tpu.memory_space<smem>>
    %c0_549 = arith.constant 0 : index
    %c0_550 = arith.constant 0 : index
    %1077 = vector.load %arg6[%c0_549, %c0_550] : memref<23x128xf32, #tpu.memory_space<vmem>>, vector<16x128xf32>
    %1078 = vector.broadcast %1076 : f32 to vector<16x128xf32>
    %1079 = arith.mulf %1078, %1077 : vector<16x128xf32>
    %1080 = arith.addf %1064, %1079 : vector<16x128xf32>
    %c8_i32_551 = arith.constant 8 : i32
    %1081 = arith.addi %635, %c8_i32_551 : i32
    %c6_i32_552 = arith.constant 6 : i32
    %1082 = arith.addi %1081, %c6_i32_552 : i32
    %1083 = arith.index_cast %1082 : i32 to index
    %1084 = memref.load %arg1[%1083] : memref<256xf32, #tpu.memory_space<smem>>
    %c1_553 = arith.constant 1 : index
    %c0_554 = arith.constant 0 : index
    %1085 = vector.load %arg6[%c1_553, %c0_554] : memref<23x128xf32, #tpu.memory_space<vmem>>, vector<16x128xf32>
    %1086 = vector.broadcast %1084 : f32 to vector<16x128xf32>
    %1087 = arith.mulf %1086, %1085 : vector<16x128xf32>
    %1088 = arith.addf %1080, %1087 : vector<16x128xf32>
    %c16_i32_555 = arith.constant 16 : i32
    %1089 = arith.addi %635, %c16_i32_555 : i32
    %c6_i32_556 = arith.constant 6 : i32
    %1090 = arith.addi %1089, %c6_i32_556 : i32
    %1091 = arith.index_cast %1090 : i32 to index
    %1092 = memref.load %arg1[%1091] : memref<256xf32, #tpu.memory_space<smem>>
    %c2_557 = arith.constant 2 : index
    %c0_558 = arith.constant 0 : index
    %1093 = vector.load %arg6[%c2_557, %c0_558] : memref<23x128xf32, #tpu.memory_space<vmem>>, vector<16x128xf32>
    %1094 = vector.broadcast %1092 : f32 to vector<16x128xf32>
    %1095 = arith.mulf %1094, %1093 : vector<16x128xf32>
    %1096 = arith.addf %1088, %1095 : vector<16x128xf32>
    %c24_i32_559 = arith.constant 24 : i32
    %1097 = arith.addi %635, %c24_i32_559 : i32
    %c6_i32_560 = arith.constant 6 : i32
    %1098 = arith.addi %1097, %c6_i32_560 : i32
    %1099 = arith.index_cast %1098 : i32 to index
    %1100 = memref.load %arg1[%1099] : memref<256xf32, #tpu.memory_space<smem>>
    %c3_561 = arith.constant 3 : index
    %c0_562 = arith.constant 0 : index
    %1101 = vector.load %arg6[%c3_561, %c0_562] : memref<23x128xf32, #tpu.memory_space<vmem>>, vector<16x128xf32>
    %1102 = vector.broadcast %1100 : f32 to vector<16x128xf32>
    %1103 = arith.mulf %1102, %1101 : vector<16x128xf32>
    %1104 = arith.addf %1096, %1103 : vector<16x128xf32>
    %c32_i32_563 = arith.constant 32 : i32
    %1105 = arith.addi %635, %c32_i32_563 : i32
    %c6_i32_564 = arith.constant 6 : i32
    %1106 = arith.addi %1105, %c6_i32_564 : i32
    %1107 = arith.index_cast %1106 : i32 to index
    %1108 = memref.load %arg1[%1107] : memref<256xf32, #tpu.memory_space<smem>>
    %c4_565 = arith.constant 4 : index
    %c0_566 = arith.constant 0 : index
    %1109 = vector.load %arg6[%c4_565, %c0_566] : memref<23x128xf32, #tpu.memory_space<vmem>>, vector<16x128xf32>
    %1110 = vector.broadcast %1108 : f32 to vector<16x128xf32>
    %1111 = arith.mulf %1110, %1109 : vector<16x128xf32>
    %1112 = arith.addf %1104, %1111 : vector<16x128xf32>
    %c40_i32_567 = arith.constant 40 : i32
    %1113 = arith.addi %635, %c40_i32_567 : i32
    %c6_i32_568 = arith.constant 6 : i32
    %1114 = arith.addi %1113, %c6_i32_568 : i32
    %1115 = arith.index_cast %1114 : i32 to index
    %1116 = memref.load %arg1[%1115] : memref<256xf32, #tpu.memory_space<smem>>
    %c5_569 = arith.constant 5 : index
    %c0_570 = arith.constant 0 : index
    %1117 = vector.load %arg6[%c5_569, %c0_570] : memref<23x128xf32, #tpu.memory_space<vmem>>, vector<16x128xf32>
    %1118 = vector.broadcast %1116 : f32 to vector<16x128xf32>
    %1119 = arith.mulf %1118, %1117 : vector<16x128xf32>
    %1120 = arith.addf %1112, %1119 : vector<16x128xf32>
    %c48_i32_571 = arith.constant 48 : i32
    %1121 = arith.addi %635, %c48_i32_571 : i32
    %c6_i32_572 = arith.constant 6 : i32
    %1122 = arith.addi %1121, %c6_i32_572 : i32
    %1123 = arith.index_cast %1122 : i32 to index
    %1124 = memref.load %arg1[%1123] : memref<256xf32, #tpu.memory_space<smem>>
    %c6_573 = arith.constant 6 : index
    %c0_574 = arith.constant 0 : index
    %1125 = vector.load %arg6[%c6_573, %c0_574] : memref<23x128xf32, #tpu.memory_space<vmem>>, vector<16x128xf32>
    %1126 = vector.broadcast %1124 : f32 to vector<16x128xf32>
    %1127 = arith.mulf %1126, %1125 : vector<16x128xf32>
    %1128 = arith.addf %1120, %1127 : vector<16x128xf32>
    %c56_i32_575 = arith.constant 56 : i32
    %1129 = arith.addi %635, %c56_i32_575 : i32
    %c6_i32_576 = arith.constant 6 : i32
    %1130 = arith.addi %1129, %c6_i32_576 : i32
    %1131 = arith.index_cast %1130 : i32 to index
    %1132 = memref.load %arg1[%1131] : memref<256xf32, #tpu.memory_space<smem>>
    %c7_577 = arith.constant 7 : index
    %c0_578 = arith.constant 0 : index
    %1133 = vector.load %arg6[%c7_577, %c0_578] : memref<23x128xf32, #tpu.memory_space<vmem>>, vector<16x128xf32>
    %1134 = vector.broadcast %1132 : f32 to vector<16x128xf32>
    %1135 = arith.mulf %1134, %1133 : vector<16x128xf32>
    %1136 = arith.addf %1128, %1135 : vector<16x128xf32>
    %c1_579 = arith.constant 1 : index
    %c0_580 = arith.constant 0 : index
    %c7_581 = arith.constant 7 : index
    %1137 = vector.load %arg4[%c1_579, %c0_580, %c7_581] : memref<2x23x256xf32, #tpu.memory_space<vmem>>, vector<1x23x128xf32>
    %1138 = vector.shape_cast %1137 : vector<1x23x128xf32> to vector<23x128xf32>
    %1139 = vector.broadcast %632 : f32 to vector<23x128xf32>
    %1140 = arith.subf %1138, %1139 : vector<23x128xf32>
    %c0_582 = arith.constant 0 : index
    %c0_583 = arith.constant 0 : index
    %1141 = vector.load %arg6[%c0_582, %c0_583] : memref<23x128xf32, #tpu.memory_space<vmem>>, vector<23x128xf32>
    tpu.vector_store %arg6[%c0_582, %c0_583], %1140 {strides = array<i32>} : memref<23x128xf32, #tpu.memory_space<vmem>>, vector<23x128xf32>,
    %1142 = arith.mulf %1140, %1140 : vector<23x128xf32>
    %1143 = arith.addf %1071, %1140 : vector<23x128xf32>
    %1144 = arith.addf %1072, %1142 : vector<23x128xf32>
    %c0_i32_584 = arith.constant 0 : i32
    %1145 = arith.addi %635, %c0_i32_584 : i32
    %c7_i32_585 = arith.constant 7 : i32
    %1146 = arith.addi %1145, %c7_i32_585 : i32
    %1147 = arith.index_cast %1146 : i32 to index
    %1148 = memref.load %arg1[%1147] : memref<256xf32, #tpu.memory_space<smem>>
    %c0_586 = arith.constant 0 : index
    %c0_587 = arith.constant 0 : index
    %1149 = vector.load %arg6[%c0_586, %c0_587] : memref<23x128xf32, #tpu.memory_space<vmem>>, vector<16x128xf32>
    %1150 = vector.broadcast %1148 : f32 to vector<16x128xf32>
    %1151 = arith.mulf %1150, %1149 : vector<16x128xf32>
    %1152 = arith.addf %1136, %1151 : vector<16x128xf32>
    %c8_i32_588 = arith.constant 8 : i32
    %1153 = arith.addi %635, %c8_i32_588 : i32
    %c7_i32_589 = arith.constant 7 : i32
    %1154 = arith.addi %1153, %c7_i32_589 : i32
    %1155 = arith.index_cast %1154 : i32 to index
    %1156 = memref.load %arg1[%1155] : memref<256xf32, #tpu.memory_space<smem>>
    %c1_590 = arith.constant 1 : index
    %c0_591 = arith.constant 0 : index
    %1157 = vector.load %arg6[%c1_590, %c0_591] : memref<23x128xf32, #tpu.memory_space<vmem>>, vector<16x128xf32>
    %1158 = vector.broadcast %1156 : f32 to vector<16x128xf32>
    %1159 = arith.mulf %1158, %1157 : vector<16x128xf32>
    %1160 = arith.addf %1152, %1159 : vector<16x128xf32>
    %c16_i32_592 = arith.constant 16 : i32
    %1161 = arith.addi %635, %c16_i32_592 : i32
    %c7_i32_593 = arith.constant 7 : i32
    %1162 = arith.addi %1161, %c7_i32_593 : i32
    %1163 = arith.index_cast %1162 : i32 to index
    %1164 = memref.load %arg1[%1163] : memref<256xf32, #tpu.memory_space<smem>>
    %c2_594 = arith.constant 2 : index
    %c0_595 = arith.constant 0 : index
    %1165 = vector.load %arg6[%c2_594, %c0_595] : memref<23x128xf32, #tpu.memory_space<vmem>>, vector<16x128xf32>
    %1166 = vector.broadcast %1164 : f32 to vector<16x128xf32>
    %1167 = arith.mulf %1166, %1165 : vector<16x128xf32>
    %1168 = arith.addf %1160, %1167 : vector<16x128xf32>
    %c24_i32_596 = arith.constant 24 : i32
    %1169 = arith.addi %635, %c24_i32_596 : i32
    %c7_i32_597 = arith.constant 7 : i32
    %1170 = arith.addi %1169, %c7_i32_597 : i32
    %1171 = arith.index_cast %1170 : i32 to index
    %1172 = memref.load %arg1[%1171] : memref<256xf32, #tpu.memory_space<smem>>
    %c3_598 = arith.constant 3 : index
    %c0_599 = arith.constant 0 : index
    %1173 = vector.load %arg6[%c3_598, %c0_599] : memref<23x128xf32, #tpu.memory_space<vmem>>, vector<16x128xf32>
    %1174 = vector.broadcast %1172 : f32 to vector<16x128xf32>
    %1175 = arith.mulf %1174, %1173 : vector<16x128xf32>
    %1176 = arith.addf %1168, %1175 : vector<16x128xf32>
    %c32_i32_600 = arith.constant 32 : i32
    %1177 = arith.addi %635, %c32_i32_600 : i32
    %c7_i32_601 = arith.constant 7 : i32
    %1178 = arith.addi %1177, %c7_i32_601 : i32
    %1179 = arith.index_cast %1178 : i32 to index
    %1180 = memref.load %arg1[%1179] : memref<256xf32, #tpu.memory_space<smem>>
    %c4_602 = arith.constant 4 : index
    %c0_603 = arith.constant 0 : index
    %1181 = vector.load %arg6[%c4_602, %c0_603] : memref<23x128xf32, #tpu.memory_space<vmem>>, vector<16x128xf32>
    %1182 = vector.broadcast %1180 : f32 to vector<16x128xf32>
    %1183 = arith.mulf %1182, %1181 : vector<16x128xf32>
    %1184 = arith.addf %1176, %1183 : vector<16x128xf32>
    %c40_i32_604 = arith.constant 40 : i32
    %1185 = arith.addi %635, %c40_i32_604 : i32
    %c7_i32_605 = arith.constant 7 : i32
    %1186 = arith.addi %1185, %c7_i32_605 : i32
    %1187 = arith.index_cast %1186 : i32 to index
    %1188 = memref.load %arg1[%1187] : memref<256xf32, #tpu.memory_space<smem>>
    %c5_606 = arith.constant 5 : index
    %c0_607 = arith.constant 0 : index
    %1189 = vector.load %arg6[%c5_606, %c0_607] : memref<23x128xf32, #tpu.memory_space<vmem>>, vector<16x128xf32>
    %1190 = vector.broadcast %1188 : f32 to vector<16x128xf32>
    %1191 = arith.mulf %1190, %1189 : vector<16x128xf32>
    %1192 = arith.addf %1184, %1191 : vector<16x128xf32>
    %c48_i32_608 = arith.constant 48 : i32
    %1193 = arith.addi %635, %c48_i32_608 : i32
    %c7_i32_609 = arith.constant 7 : i32
    %1194 = arith.addi %1193, %c7_i32_609 : i32
    %1195 = arith.index_cast %1194 : i32 to index
    %1196 = memref.load %arg1[%1195] : memref<256xf32, #tpu.memory_space<smem>>
    %c6_610 = arith.constant 6 : index
    %c0_611 = arith.constant 0 : index
    %1197 = vector.load %arg6[%c6_610, %c0_611] : memref<23x128xf32, #tpu.memory_space<vmem>>, vector<16x128xf32>
    %1198 = vector.broadcast %1196 : f32 to vector<16x128xf32>
    %1199 = arith.mulf %1198, %1197 : vector<16x128xf32>
    %1200 = arith.addf %1192, %1199 : vector<16x128xf32>
    %c56_i32_612 = arith.constant 56 : i32
    %1201 = arith.addi %635, %c56_i32_612 : i32
    %c7_i32_613 = arith.constant 7 : i32
    %1202 = arith.addi %1201, %c7_i32_613 : i32
    %1203 = arith.index_cast %1202 : i32 to index
    %1204 = memref.load %arg1[%1203] : memref<256xf32, #tpu.memory_space<smem>>
    %c7_614 = arith.constant 7 : index
    %c0_615 = arith.constant 0 : index
    %1205 = vector.load %arg6[%c7_614, %c0_615] : memref<23x128xf32, #tpu.memory_space<vmem>>, vector<16x128xf32>
    %1206 = vector.broadcast %1204 : f32 to vector<16x128xf32>
    %1207 = arith.mulf %1206, %1205 : vector<16x128xf32>
    %1208 = arith.addf %1200, %1207 : vector<16x128xf32>
    %c0_616 = arith.constant 0 : index
    %c0_617 = arith.constant 0 : index
    %1209 = vector.load %arg6[%c0_616, %c0_617] : memref<23x128xf32, #tpu.memory_space<vmem>>, vector<23x128xf32>
    tpu.vector_store %arg6[%c0_616, %c0_617], %1143 {strides = array<i32>} : memref<23x128xf32, #tpu.memory_space<vmem>>, vector<23x128xf32>,
    %c0_618 = arith.constant 0 : index
    %c0_619 = arith.constant 0 : index
    %1210 = vector.load %arg7[%c0_618, %c0_619] : memref<23x128xf32, #tpu.memory_space<vmem>>, vector<23x128xf32>
    tpu.vector_store %arg7[%c0_618, %c0_619], %1144 {strides = array<i32>} : memref<23x128xf32, #tpu.memory_space<vmem>>, vector<23x128xf32>,
    %c0_620 = arith.constant 0 : index
    %c0_621 = arith.constant 0 : index
    %1211 = vector.load %arg6[%c0_620, %c0_621] : memref<23x128xf32, #tpu.memory_space<vmem>>, vector<16x128xf32>
    %c0_622 = arith.constant 0 : index
    %c0_623 = arith.constant 0 : index
    %1212 = vector.load %arg7[%c0_622, %c0_623] : memref<23x128xf32, #tpu.memory_space<vmem>>, vector<16x128xf32>
    %c1_624 = arith.constant 1 : index
    %c0_625 = arith.constant 0 : index
    %1213 = vector.load %arg6[%c1_624, %c0_625] : memref<23x128xf32, #tpu.memory_space<vmem>>, vector<16x128xf32>
    %1214 = arith.addf %1211, %1213 : vector<16x128xf32>
    %c1_626 = arith.constant 1 : index
    %c0_627 = arith.constant 0 : index
    %1215 = vector.load %arg7[%c1_626, %c0_627] : memref<23x128xf32, #tpu.memory_space<vmem>>, vector<16x128xf32>
    %1216 = arith.addf %1212, %1215 : vector<16x128xf32>
    %c2_628 = arith.constant 2 : index
    %c0_629 = arith.constant 0 : index
    %1217 = vector.load %arg6[%c2_628, %c0_629] : memref<23x128xf32, #tpu.memory_space<vmem>>, vector<16x128xf32>
    %1218 = arith.addf %1214, %1217 : vector<16x128xf32>
    %c2_630 = arith.constant 2 : index
    %c0_631 = arith.constant 0 : index
    %1219 = vector.load %arg7[%c2_630, %c0_631] : memref<23x128xf32, #tpu.memory_space<vmem>>, vector<16x128xf32>
    %1220 = arith.addf %1216, %1219 : vector<16x128xf32>
    %c3_632 = arith.constant 3 : index
    %c0_633 = arith.constant 0 : index
    %1221 = vector.load %arg6[%c3_632, %c0_633] : memref<23x128xf32, #tpu.memory_space<vmem>>, vector<16x128xf32>
    %1222 = arith.addf %1218, %1221 : vector<16x128xf32>
    %c3_634 = arith.constant 3 : index
    %c0_635 = arith.constant 0 : index
    %1223 = vector.load %arg7[%c3_634, %c0_635] : memref<23x128xf32, #tpu.memory_space<vmem>>, vector<16x128xf32>
    %1224 = arith.addf %1220, %1223 : vector<16x128xf32>
    %c4_636 = arith.constant 4 : index
    %c0_637 = arith.constant 0 : index
    %1225 = vector.load %arg6[%c4_636, %c0_637] : memref<23x128xf32, #tpu.memory_space<vmem>>, vector<16x128xf32>
    %1226 = arith.addf %1222, %1225 : vector<16x128xf32>
    %c4_638 = arith.constant 4 : index
    %c0_639 = arith.constant 0 : index
    %1227 = vector.load %arg7[%c4_638, %c0_639] : memref<23x128xf32, #tpu.memory_space<vmem>>, vector<16x128xf32>
    %1228 = arith.addf %1224, %1227 : vector<16x128xf32>
    %c5_640 = arith.constant 5 : index
    %c0_641 = arith.constant 0 : index
    %1229 = vector.load %arg6[%c5_640, %c0_641] : memref<23x128xf32, #tpu.memory_space<vmem>>, vector<16x128xf32>
    %1230 = arith.addf %1226, %1229 : vector<16x128xf32>
    %c5_642 = arith.constant 5 : index
    %c0_643 = arith.constant 0 : index
    %1231 = vector.load %arg7[%c5_642, %c0_643] : memref<23x128xf32, #tpu.memory_space<vmem>>, vector<16x128xf32>
    %1232 = arith.addf %1228, %1231 : vector<16x128xf32>
    %c6_644 = arith.constant 6 : index
    %c0_645 = arith.constant 0 : index
    %1233 = vector.load %arg6[%c6_644, %c0_645] : memref<23x128xf32, #tpu.memory_space<vmem>>, vector<16x128xf32>
    %1234 = arith.addf %1230, %1233 : vector<16x128xf32>
    %c6_646 = arith.constant 6 : index
    %c0_647 = arith.constant 0 : index
    %1235 = vector.load %arg7[%c6_646, %c0_647] : memref<23x128xf32, #tpu.memory_space<vmem>>, vector<16x128xf32>
    %1236 = arith.addf %1232, %1235 : vector<16x128xf32>
    %c7_648 = arith.constant 7 : index
    %c0_649 = arith.constant 0 : index
    %1237 = vector.load %arg6[%c7_648, %c0_649] : memref<23x128xf32, #tpu.memory_space<vmem>>, vector<16x128xf32>
    %1238 = arith.addf %1234, %1237 : vector<16x128xf32>
    %c7_650 = arith.constant 7 : index
    %c0_651 = arith.constant 0 : index
    %1239 = vector.load %arg7[%c7_650, %c0_651] : memref<23x128xf32, #tpu.memory_space<vmem>>, vector<16x128xf32>
    %1240 = arith.addf %1236, %1239 : vector<16x128xf32>
    %1241 = arith.mulf %1238, %1238 : vector<16x128xf32>
    %cst_652 = arith.constant 1.562500e-02 : f32
    %1242 = vector.broadcast %cst_652 : f32 to vector<16x128xf32>
    %1243 = arith.mulf %1241, %1242 : vector<16x128xf32>
    %1244 = arith.subf %1240, %1243 : vector<16x128xf32>
    %cst_653 = arith.constant 0.000000e+00 : f32
    %1245 = vector.broadcast %cst_653 : f32 to vector<16x128xf32>
    %1246 = arith.maximumf %1244, %1245 : vector<16x128xf32>
    %1247 = vector.broadcast %634 : f32 to vector<16x128xf32>
    %1248 = arith.mulf %1246, %1247 : vector<16x128xf32>
    %cst_654 = arith.constant 0.000000e+00 : f32
    %1249 = vector.broadcast %cst_654 : f32 to vector<16x128xf32>
    %1250 = arith.cmpf ogt, %1248, %1249 : vector<16x128xf32>
    %1251 = math.rsqrt %1248 : vector<16x128xf32>
    %1252 = arith.mulf %1208, %1251 : vector<16x128xf32>
    %cst_655 = arith.constant 0.000000e+00 : f32
    %1253 = vector.broadcast %cst_655 : f32 to vector<16x128xf32>
    %1254 = arith.select %1250, %1252, %1253 : vector<16x128xi1>, vector<16x128xf32>
    %c1_656 = arith.constant 1 : index
    %c0_657 = arith.constant 0 : index
    %c0_658 = arith.constant 0 : index
    %1255 = vector.load %arg5[%c1_656, %c0_657, %c0_658] : memref<2x16x128xf32, #tpu.memory_space<vmem>>, vector<1x16x128xf32>
    %1256 = vector.shape_cast %1255 : vector<1x16x128xf32> to vector<16x128xf32>
    %1257 = vector.shape_cast %1254 : vector<16x128xf32> to vector<1x16x128xf32>
    tpu.vector_store %arg5[%c1_656, %c0_657, %c0_658], %1257 {strides = array<i32>} : memref<2x16x128xf32, #tpu.memory_space<vmem>>, vector<1x16x128xf32>,
    return
  }
  func.func @transform_0(%arg0: i32) -> i32 {
    %c0_i32 = arith.constant 0 : i32
    %c0_i32_0 = arith.constant 0 : i32
    return %c0_i32 : i32
  }
  func.func @transform_1(%arg0: i32) -> i32 {
    %c0_i32 = arith.constant 0 : i32
    %c0_i32_0 = arith.constant 0 : i32
    return %c0_i32 : i32
  }
  func.func @transform_2(%arg0: i32) -> i32 {
    %c0_i32 = arith.constant 0 : i32
    %c0_i32_0 = arith.constant 0 : i32
    return %c0_i32 : i32
  }
  func.func @transform_3(%arg0: i32) -> (i32, i32, i32) {
    %c0_i32 = arith.constant 0 : i32
    %c0_i32_0 = arith.constant 0 : i32
    %c0_i32_1 = arith.constant 0 : i32
    return %arg0, %c0_i32, %c0_i32_0 : i32, i32, i32
  }
  func.func @transform_4(%arg0: i32) -> (i32, i32, i32) {
    %c0_i32 = arith.constant 0 : i32
    %c0_i32_0 = arith.constant 0 : i32
    %c0_i32_1 = arith.constant 0 : i32
    return %arg0, %c0_i32, %c0_i32_0 : i32, i32, i32
  }
}

</mosaic_0001>

<bundles_post_ra>
// kernel: tpu_custom_call.1
= control target key start
LH: loop header
LB: loop body
LE: loop exit
PB: predicated region body
PF: predicated region fallthrough
CT: control target
= control target key end

     0   :  { %s5001_s0 = inlined_call_operand.vmem [shape: f32[256], index: 0, kind: input, shape index: {}]   ;;  %s5002_s1 = inlined_call_operand.vmem [shape: f32[4], index: 1, kind: input, shape index: {}]   ;;  %s5003_s2 = inlined_call_operand.vmem [shape: f32[4], index: 2, kind: input, shape index: {}]   ;;  %s5004_s3 = inlined_call_operand.vmem [shape: f32[4,23,256], index: 3, kind: input, shape index: {}]   ;;  %s5005_s4 = inlined_call_operand.hbm [shape: f32[4,16,128], index: 4, kind: output, shape index: {}]  }
   0x1   :  { %5015 = sst [smem:[#allocation14_spill]] %s5001_s0 }
   0x2   :  { %5016 = sst [smem:[#allocation15_spill]] %s5002_s1 }
   0x3   :  { %5017 = sst [smem:[#allocation16_spill]] %s5003_s2 }
   0x4   :  { %9 = vsyncpa [#allocation6], 0 }
   0x5   :  { %10 = vsyncpa [#allocation8], 0 }
   0x6   :  { %11 = vsyncpa [#allocation5], 0 }
   0x7   :  { %13 = vsyncpa [#allocation5 + $0x1], 0  ;;  %s3116_s15 = smov 0   ;;  %s3118_s16 = smov 0  }
   0x8   :  { %s3120_s17 = smov 0   ;;  %s3122_s18 = smov 0  }
   0x9 LB: > { %s3137_s19 = sadd.s32 4294967295, %s3077_s18   ;;  %s2800_s20 = sadd.s32 4294967294, %s3077_s18   ;;  %s3077_s18 = sphi %s3122_s18, %s5036_s18   ;;  %s3073_s17 = sphi %s3120_s17, %s5035_s17   ;;  %s3069_s16 = sphi %s3118_s16, %s5034_s16   ;;  %s3065_s15 = sphi %s3116_s15, %s5033_s15  }
   0xa   : > { %s3141_s21 = sadd.s32 1, %s3077_s18   ;;  %s115_s22 = sadd.s32 1, %s3073_s17 }
   0xb   : > { %s112_s23 = ssub.s32 %s3077_s18, %s3141_s21  ;;  %p125_p0 = scmp.ne.s32.totalorder %s3073_s17, %s3069_s16 }
   0xc   : > { %p113_p1 = scmp.eq.s32.totalorder %s112_s23, 0  ;;  %p126_p2 = scmp.eq.s32.totalorder %s3137_s19, 1 }
   0xd   : > { %p131_p3 = scmp.ne.s32.totalorder %s3069_s16, %s3065_s15  ;;  %p132_p4 = scmp.eq.s32.totalorder %s2800_s20, 1 }
   0xe   : > { %s3152_s24 = scalar_select %p113_p1, %s3073_s17, %s115_s22  }
   0xf   : > { %p3154_p5 = por %p126_p2, %p125_p0  ;;  %p3158_p6 = por %p132_p4, %p131_p3 }
  0x10   : > { %p2801_p7 = scmp.ge.s32.totalorder %s3077_s18, 1  ;;  %p139_p8 = scmp.lt.s32.totalorder %s3077_s18, 3 }
  0x11   : > { %p2903_p9 = scmp.eq.s32.totalorder %s3137_s19, 0  ;;  %s5021_s1 = sld [smem:[#allocation15_spill]] }
  0x12   : > { %p3165_p10 = pnand %p2801_p7, %p139_p8  ;;  %s5022_s0 = sld [smem:[#allocation14_spill]] }
  0x13   : > { %s5023_s2 = sld [smem:[#allocation16_spill]]  ;;  %s3079_s11 = smov [#allocation7]  }
  0x14   : > { %p2889_p11 = pneg %p3165_p10  ;;  %s3080_s12 = smov [#allocation4]  }
  0x15   : > { %s3081_s13 = smov [#allocation9]  }
  0x16   : > { %p2890_p12 = pnand %p2903_p9, %p2889_p11 }
  0x17   : > { %s161_s30 = sshll.u32 %s5021_s1, 4  ;;  %s162_s30 = int_to_ptr.vmem [resolvable:$true] %s161_s30 }
  0x18   : > { %s151_s7 = sshll.u32 %s5022_s0, 4  ;;  %194 = sbr.rel (%p3165_p10) target bundleno = 661 (0x295), region = 36  ;;  %s152_s7 = int_to_ptr.vmem [resolvable:$true] %s151_s7 }
  0x19   : > { %s171_s10 = sshll.u32 %s5023_s2, 4  ;;  %s172_s10 = int_to_ptr.vmem [resolvable:$true] %s171_s10 }
  0x1a   : > { %2895 = dma.vmem_to_smem (!%p2890_p12), %s162_s30, 16, %s3079_s11, [#allocation8]  }
  0x1b   : > { %2892 = dma.vmem_to_smem (!%p2890_p12), %s152_s7, 32, %s3080_s12, [#allocation6]  }
  0x1c   : > { %2898 = dma.vmem_to_smem (!%p2890_p12), %s172_s10, 16, %s3081_s13, [#allocation8]  }
  0x1d   : > { %3052 = dma.done.wait (%p2903_p9), [#allocation6], 32  }
  0x1e   : > { %3054 = vsyncadd (%p2903_p9), [#allocation6], 4294967264 }
  0x1f   : > { %3056 = dma.done.wait (%p2903_p9), [#allocation8], 32  }
  0x20   : > { %3058 = vsyncadd (%p2903_p9), [#allocation8], 4294967264 }
  0x21   : > { %211 = sfence }
  0x22   : > { %s3193_s14 = sshll.u32 %s3137_s19, 1  ;;  %s3082_s30 = smov 127   ;;  %vm357_vm0 = vcmask 1039360   ;;  %vm505_vm1 = vcmask 1031168   ;;  %vm653_vm2 = vcmask 1022976   ;;  %vm801_vm3 = vcmask 1014784  }
  0x23   : > { %p234_p13 = scmp.lt.s32.totalorder %s3193_s14, 3  ;;  %s242_s20 = sld [smem:[#allocation9 + %s3193_s14]]  ;;  %vm949_vm4 = vcmask 1006592   ;;  %vm1097_vm5 = vcmask 998400   ;;  %vm1245_vm6 = vcmask 990208  }
  0x24   : > { %s3083_s5 = smov 126   ;;  %s3084_s6 = smov 125  }
  0x25   : > { %s235_s22 = scalar_select %p234_p13, %s3193_s14, 3 }
  0x26   : > { %s3313_s7 = sshll.u32 %s3137_s19, 7  ;;  %s5025_s2 = smov 122  }
  0x27   : > { %s2874_s23 = smul.u32 48, %s235_s22  ;;  %s264_s8 = sadd.s32 8, %s3313_s7 }
  0x28   : > { %s3320_s9 = sld [smem:[#allocation4 + %s3313_s7]]  ;;  %s273_s11 = sadd.s32 16, %s3313_s7 }
  0x29   : > { %s3201_s29 = scalar_lea.vmem %s5004_s3, %s2874_s23  ;;  %v3203_v0 = vstv %s242_s20  ;;  %s3323_s10 = sld [smem:[#allocation4 + %s264_s8]] }
  0x2a   : > { %v329_v1 = vld [vmem:[%s3201_s29 + $0x10] sm:$0xff]  ;;  %v327_v2 = vld [vmem:[%s3201_s29] sm:$0xff]  ;;  %v330_v7 = vld [vmem:[%s3201_s29 + $0x18] sm:$0xff]  ;;  %s3326_s12 = sld [smem:[#allocation4 + %s273_s11]]  ;;  %s282_s13 = sadd.s32 24, %s3313_s7 }
  0x2b   : > { %v3208_v3 = vsub.f32 %v329_v1, %v3203_v0  ;;  %v3211_v4 = vsub.f32 %v327_v2, %v3203_v0  ;;  %v331_v5 = vld [vmem:[%s3201_s29 + $0x20] sm:$0x7f]  ;;  %v328_v8 = vld [vmem:[%s3201_s29 + $0x8] sm:$0xff]  ;;  %v3226_v10 = vsub.f32 %v330_v7, %v3203_v0  ;;  %s5011_s20 = smov 124   ;;  %s3338_s22 = sld [smem:[#allocation4 + %s282_s13]] }
  0x2c   : > { %v337_v6 = vsub.f32 %v331_v5, %v3203_v0  ;;  %v332_v9 = vld [vmem:[%s3201_s29 + $0x28] sm:$0x7f]  ;;  %v3229_v11 = vsub.f32 %v328_v8, %v3203_v0  ;;  %v479_v19 = vld [vmem:[%s3201_s29 + $0x20] sm:$0x7f]  ;;  %s291_s23 = sadd.s32 32, %s3313_s7  ;;  %s300_s28 = sadd.s32 40, %s3313_s7 }
  0x2d   : > { %349 = vrot.lane.b32.xlu1 %v3208_v3, %s3082_s30  ;;  %345 = vrot.lane.b32.xlu0 %v3211_v4, %s3082_s30  ;;  %253 = vst [vmem:[#allocation2 + $0x8] sm:$0xff] %v3208_v3  ;;  %v338_v12 = vsub.f32 %v332_v9, %v3203_v0  ;;  %v3239_v13 = vmul.f32 %v3211_v4, %v3211_v4  ;;  %v480_v20 = vld [vmem:[%s3201_s29 + $0x28] sm:$0x7f]  ;;  %v627_v25 = vld [vmem:[%s3201_s29 + $0x20] sm:$0x7f]  ;;  %s3353_s27 = sld [smem:[#allocation4 + %s291_s23]] }
  0x2e   : > { %353 = vrot.lane.b32.xlu2 %v337_v6, %s3082_s30  ;;  %252 = vst [vmem:[#allocation2] sm:$0xff] %v3211_v4  ;;  %v3243_v14 = vmul.f32 %v3229_v11, %v3229_v11  ;;  %v3247_v15 = vmul.f32 %v3208_v3, %v3208_v3  ;;  %v371_v16 = vmul.f32 %v337_v6, %v337_v6  ;;  %v628_v26 = vld [vmem:[%s3201_s29 + $0x28] sm:$0x7f]  ;;  %v247_v27 = vld [vmem:[%s3201_s29 + $0x20] sm:$0x7f]  ;;  %v261_v38 = vstv %s3320_s9  ;;  %s3362_s8 = sld [smem:[#allocation4 + %s300_s28]] }
  0x2f   : > { %v3257_v17 = vmul.f32 %v3226_v10, %v3226_v10  ;;  %v372_v18 = vmul.f32 %v338_v12, %v338_v12  ;;  %v485_v21 = vsub.f32 %v479_v19, %v3203_v0  ;;  %v486_v22 = vsub.f32 %v480_v20, %v3203_v0  ;;  %v775_v34 = vld [vmem:[%s3201_s29 + $0x20] sm:$0x7f]  ;;  %v776_v42 = vld [vmem:[%s3201_s29 + $0x28] sm:$0x7f]  ;;  %s309_s9 = sadd.s32 48, %s3313_s7  ;;  %s318_s11 = sadd.s32 56, %s3313_s7 }
  0x30   : > { %v633_v28 = vsub.f32 %v627_v25, %v3203_v0  ;;  %v3298_v29 = vsub.f32 %v247_v27, %v3203_v0  ;;  %v634_v30 = vsub.f32 %v628_v26, %v3203_v0  ;;  %v268_v39 = vstv %s3323_s10  ;;  %s3369_s10 = sld [smem:[#allocation4 + %s309_s9]]  ;;  %s403_s13 = sadd.s32 1, %s3313_s7 }
  0x31   : > { %v519_v23 = vmul.f32 %v485_v21, %v485_v21  ;;  %v520_v24 = vmul.f32 %v486_v22, %v486_v22  ;;  %v781_v45 = vsub.f32 %v775_v34, %v3203_v0  ;;  %v263_v49 = vmul.f32 %v3208_v3, %v261_v38  ;;  %s412_s23 = sadd.s32 9, %s3313_s7  ;;  %s430_s9 = sadd.s32 25, %s3313_s7 }
  0x32   : > { %254 = vst [vmem:[#allocation2 + $0x10] sm:$0x7f] %v3298_v29  ;;  %v667_v31 = vmul.f32 %v633_v28, %v633_v28  ;;  %v668_v32 = vmul.f32 %v634_v30, %v634_v30  ;;  %v277_v52 = vstv %s3326_s12  ;;  %v782_v53 = vsub.f32 %v776_v42, %v3203_v0  ;;  %s3377_s12 = sld [smem:[#allocation4 + %s318_s11]] }
  0x33   : > { %v262_v54 = vmul.f32 %v3211_v4, %v261_v38  ;;  %v286_v59 = vstv %s3338_s22  ;;  %v295_v5 = vstv %s3353_s27  ;;  %s3385_s22 = sld [smem:[#allocation4 + %s403_s13]]  ;;  %s421_s27 = sadd.s32 17, %s3313_s7 }
  0x34   : > { %s3394_s28 = sld [smem:[#allocation4 + %s412_s23]]  ;;  %s5008_s13 = smov 123  }
  0x35   : > { %351 = vrot.lane.b32.xlu1 %v3226_v10, %s3082_s30  ;;  %347 = vrot.lane.b32.xlu0 %v3229_v11, %s3082_s30  ;;  %v266_v44 = vld [vmem:[#allocation2 + $0x1] sm:$0xff]  ;;  %s3413_s11 = sld [smem:[#allocation4 + %s430_s9]]  ;;  %s457_s23 = sadd.s32 49, %s3313_s7 }
  0x36   : > { %355 = vrot.lane.b32.xlu2 %v338_v12, %s3082_s30  ;;  %v269_v55 = vmul.f32 %v268_v39, %v266_v44  ;;  %v275_v56 = vld [vmem:[#allocation2 + $0x2] sm:$0xff]  ;;  %v313_v27 = vstv %s3369_s10  ;;  %s439_s10 = sadd.s32 33, %s3313_s7  ;;  %s3441_s9 = sld [smem:[#allocation4 + %s457_s23]] }
  0x37   : > { %v278_v61 = vmul.f32 %v277_v52, %v275_v56  ;;  %v284_v62 = vld [vmem:[#allocation2 + $0x3] sm:$0xff] }
  0x38   : > { %v271_v60 = vadd.f32 %v269_v55, %v262_v54  ;;  %v287_v7 = vmul.f32 %v286_v59, %v284_v62  ;;  %v293_v8 = vld [vmem:[#allocation2 + $0x4] sm:$0xff] }
  0x39   : > { %v267_v35 = vld [vmem:[#allocation2 + $0x9] sm:$0xff] }
  0x3a   : > { %v294_v36 = vld [vmem:[#allocation2 + $0xc] sm:$0xff]  ;;  %v270_v50 = vmul.f32 %v268_v39, %v267_v35  ;;  %v280_v6 = vadd.f32 %v278_v61, %v271_v60  ;;  %v322_v35 = vstv %s3377_s12  ;;  %s448_s12 = sadd.s32 41, %s3313_s7 }
  0x3b   : > { %v303_v37 = vld [vmem:[#allocation2 + $0xd] sm:$0xff]  ;;  %v297_v12 = vmul.f32 %v295_v5, %v294_v36 }
  0x3c   : > { %v3340_v40 = vld [vmem:[#allocation2 + $0xe] sm:$0xff]  ;;  %v272_v57 = vadd.f32 %v270_v50, %v263_v49  ;;  %v289_v20 = vadd.f32 %v287_v7, %v280_v6 }
  0x3d   : > { %384 = vrot.lane.b32.xlu1 %v3243_v14, %s3082_s30  ;;  %382 = vrot.lane.b32.xlu0 %v3239_v13, %s3082_s30  ;;  %v3342_v41 = vld [vmem:[#allocation2 + $0xf] sm:$0xff]  ;;  %v315_v34 = vmul.f32 %v313_v27, %v3340_v40  ;;  %v320_v42 = vld [vmem:[#allocation2 + $0x7] sm:$0xff] }
  0x3e   : > { %386 = vrot.lane.b32.xlu2 %v3247_v15, %s3082_s30  ;;  %v276_v46 = vld [vmem:[#allocation2 + $0xa] sm:$0xff]  ;;  %v323_v49 = vmul.f32 %v322_v35, %v320_v42 }
  0x3f   : > { %v285_v47 = vld [vmem:[#allocation2 + $0xb] sm:$0xff]  ;;  %v279_v58 = vmul.f32 %v277_v52, %v276_v46  ;;  %v324_v46 = vmul.f32 %v322_v35, %v3342_v41  ;;  %v416_v41 = vstv %s3394_s28  ;;  %s466_s28 = sadd.s32 57, %s3313_s7 }
  0x40   : > { %v288_v2 = vmul.f32 %v286_v59, %v285_v47  ;;  %v407_v47 = vstv %s3385_s22  ;;  %s3422_s22 = sld [smem:[#allocation4 + %s439_s10]] }
  0x41   : > { %v281_v1 = vadd.f32 %v279_v58, %v272_v57  ;;  %v924_v58 = vld [vmem:[%s3201_s29 + $0x28] sm:$0x7f]  ;;  %s3446_s10 = sld [smem:[#allocation4 + %s466_s28]] }
  0x43   : > { %v290_v9 = vadd.f32 %v288_v2, %v281_v1 }
  0x45   : > { %390 = vrot.lane.b32.xlu1 %v371_v16, %s3082_s30  ;;  %388 = vrot.lane.b32.xlu0 %v3257_v17, %s3082_s30  ;;  %v304_v16 = vstv %s3362_s8  ;;  %v299_v25 = vadd.f32 %v297_v12, %v290_v9  ;;  %s3397_s8 = sld [smem:[#allocation4 + %s421_s27]] }
  0x46   : > { %392 = vrot.lane.b32.xlu2 %v372_v18, %s3082_s30  ;;  %v306_v26 = vmul.f32 %v304_v16, %v303_v37  ;;  %s3435_s27 = sld [smem:[#allocation4 + %s448_s12]] }
  0x4b   : > { %v425_v59 = vstv %s3397_s8  ;;  %s551_s8 = sadd.s32 2, %s3313_s7 }
  0x4c   : > { %s3452_s12 = sld [smem:[#allocation4 + %s551_s8]]  ;;  %s5006_s8 = smov 122  }
  0x4d   : > { %495 = vrot.lane.b32.xlu1 %v3229_v11, %s3083_s5  ;;  %493 = vrot.lane.b32.xlu0 %v3211_v4, %s3083_s5 }
  0x4e   : > { %497 = vrot.lane.b32.xlu2 %v3208_v3, %s3083_s5 }
  0x55   : > { %501 = vrot.lane.b32.xlu1 %v485_v21, %s3083_s5  ;;  %499 = vrot.lane.b32.xlu0 %v3226_v10, %s3083_s5  ;;  %v296_v21 = vmul.f32 %v295_v5, %v293_v8  ;;  %v930_v8 = vsub.f32 %v924_v58, %v3203_v0  ;;  %v555_v58 = vstv %s3452_s12 }
  0x56   : > { %503 = vrot.lane.b32.xlu2 %v486_v22, %s3083_s5  ;;  %v302_v22 = vld [vmem:[#allocation2 + $0x5] sm:$0xff] }
  0x5d   : > { %532 = vrot.lane.b32.xlu1 %v3243_v14, %s3083_s5  ;;  %530 = vrot.lane.b32.xlu0 %v3239_v13, %s3083_s5 }
  0x5e   : > { %534 = vrot.lane.b32.xlu2 %v3247_v15, %s3083_s5 }
  0x65   : > { %538 = vrot.lane.b32.xlu1 %v519_v23, %s3083_s5  ;;  %536 = vrot.lane.b32.xlu0 %v3257_v17, %s3083_s5 }
  0x66   : > { %540 = vrot.lane.b32.xlu2 %v520_v24, %s3083_s5  ;;  %v815_v24 = vmul.f32 %v781_v45, %v781_v45 }
  0x6d   : > { %643 = vrot.lane.b32.xlu1 %v3229_v11, %s3084_s6  ;;  %641 = vrot.lane.b32.xlu0 %v3211_v4, %s3084_s6 }
  0x6e   : > { %645 = vrot.lane.b32.xlu2 %v3208_v3, %s3084_s6 }
  0x75   : > { %649 = vrot.lane.b32.xlu1 %v633_v28, %s3084_s6  ;;  %647 = vrot.lane.b32.xlu0 %v3226_v10, %s3084_s6  ;;  %v816_v28 = vmul.f32 %v782_v53, %v782_v53 }
  0x76   : > { %651 = vrot.lane.b32.xlu2 %v634_v30, %s3084_s6  ;;  %v298_v30 = vadd.f32 %v296_v21, %v289_v20 }
  0x7d   : > { %680 = vrot.lane.b32.xlu1 %v3243_v14, %s3084_s6  ;;  %678 = vrot.lane.b32.xlu0 %v3239_v13, %s3084_s6 }
  0x7e   : > { %682 = vrot.lane.b32.xlu2 %v3247_v15, %s3084_s6 }
  0x85   : > { %686 = vrot.lane.b32.xlu1 %v667_v31, %s3084_s6  ;;  %684 = vrot.lane.b32.xlu0 %v3257_v17, %s3084_s6  ;;  %v305_v31 = vmul.f32 %v304_v16, %v302_v22 }
  0x86   : > { %688 = vrot.lane.b32.xlu2 %v668_v32, %s3084_s6  ;;  %v311_v32 = vld [vmem:[#allocation2 + $0x6] sm:$0xff] }
  0x87   : > { %v307_v38 = vadd.f32 %v305_v31, %v298_v30  ;;  %v314_v39 = vmul.f32 %v313_v27, %v311_v32 }
  0x88   : > { %v354_v33 = vpop.permute.xlu2 %353 }
  0x8d   : > { %791 = vrot.lane.b32.xlu1 %v3229_v11, %s5011_s20  ;;  %789 = vrot.lane.b32.xlu0 %v3211_v4, %s5011_s20 }
  0x8e   : > { %793 = vrot.lane.b32.xlu2 %v3208_v3, %s5011_s20 }
  0x90   : > { %v356_v43 = vpop.permute.xlu2 %355 }
  0x91   : > { %v360_v48 = vsel %vm357_vm0, %v354_v33, %v356_v43  ;;  %v308_v33 = vadd.f32 %v306_v26, %v299_v25  ;;  %v443_v26 = vstv %s3422_s22  ;;  %s569_s22 = sadd.s32 18, %s3313_s7 }
  0x92   : > { %366 = vst [vmem:[#allocation2 + $0x10] sm:$0x7f] %v360_v48  ;;  %v3350_v51 = vadd.f32 %v360_v48, %v3298_v29  ;;  %v316_v48 = vadd.f32 %v314_v39, %v307_v38  ;;  %s3500_s28 = sld [smem:[#allocation4 + %s569_s22]] }
  0x94   : > { %v325_v54 = vadd.f32 %v323_v49, %v316_v48 }
  0x95   : > { %797 = vrot.lane.b32.xlu1 %v781_v45, %s5011_s20  ;;  %795 = vrot.lane.b32.xlu0 %v3226_v10, %s5011_s20  ;;  %v317_v45 = vadd.f32 %v315_v34, %v308_v33  ;;  %v452_v34 = vstv %s3435_s27  ;;  %s578_s27 = sadd.s32 26, %s3313_s7 }
  0x96   : > { %799 = vrot.lane.b32.xlu2 %v782_v53, %s5011_s20  ;;  %v923_v53 = vld [vmem:[%s3201_s29 + $0x20] sm:$0x7f] }
  0x97   : > { %v326_v50 = vadd.f32 %v324_v46, %v317_v45  ;;  %v929_v5 = vsub.f32 %v923_v53, %v3203_v0  ;;  %v461_v45 = vstv %s3441_s9  ;;  %s587_s9 = sadd.s32 34, %s3313_s7 }
  0x98   : > { %v3366_v63 = vpop.permute.xlu2 %386  ;;  %s3517_s12 = sld [smem:[#allocation4 + %s587_s9]]  ;;  %s699_s9 = sadd.s32 3, %s3313_s7 }
  0x9d   : > { %828 = vrot.lane.b32.xlu1 %v3243_v14, %s5011_s20  ;;  %826 = vrot.lane.b32.xlu0 %v3239_v13, %s5011_s20 }
  0x9e   : > { %830 = vrot.lane.b32.xlu2 %v3247_v15, %s5011_s20 }
  0x9f   : > { %v350_v18 = vpop.permute.xlu1 %349  ;;  %v346_v19 = vpop.permute.xlu0 %345 }
  0xa0   : > { %v3382_v23 = vpop.permute.xlu2 %392 }
  0xa5   : > { %834 = vrot.lane.b32.xlu1 %v815_v24, %s5011_s20  ;;  %832 = vrot.lane.b32.xlu0 %v3257_v17, %s5011_s20 }
  0xa6   : > { %836 = vrot.lane.b32.xlu2 %v816_v28, %s5011_s20 }
  0xa7   : > { %v352_v36 = vpop.permute.xlu1 %351  ;;  %v348_v37 = vpop.permute.xlu0 %347 }
  0xa8   : > { %v3400_v43 = vsel %vm357_vm0, %v350_v18, %v352_v36  ;;  %v3403_v40 = vsel %vm357_vm0, %v346_v19, %v348_v37  ;;  %v3405_v44 = vpop.permute.xlu2 %497  ;;  %v434_v19 = vstv %s3413_s11  ;;  %s560_s11 = sadd.s32 10, %s3313_s7 }
  0xa9   : > { %365 = vst [vmem:[#allocation2 + $0x8] sm:$0xff] %v3400_v43  ;;  %v409_v52 = vmul.f32 %v407_v47, %v3400_v43  ;;  %v408_v55 = vmul.f32 %v407_v47, %v3403_v40  ;;  %s3497_s23 = sld [smem:[#allocation4 + %s560_s11]]  ;;  %s596_s11 = sadd.s32 42, %s3313_s7 }
  0xaa   : > { %364 = vst [vmem:[#allocation2] sm:$0xff] %v3403_v40  ;;  %s3531_s22 = sld [smem:[#allocation4 + %s596_s11]]  ;;  %s708_s11 = sadd.s32 11, %s3313_s7 }
  0xab   : > { %v411_v1 = vadd.f32 %v409_v52, %v326_v50  ;;  %v410_v16 = vadd.f32 %v408_v55, %v325_v54  ;;  %v470_v50 = vstv %s3446_s10  ;;  %s3505_s10 = sld [smem:[#allocation4 + %s578_s27]] }
  0xad   : > { %939 = vrot.lane.b32.xlu1 %v3229_v11, %s5008_s13  ;;  %937 = vrot.lane.b32.xlu0 %v3211_v4, %s5008_s13 }
  0xae   : > { %941 = vrot.lane.b32.xlu2 %v3208_v3, %s5008_s13 }
  0xaf   : > { %v3429_v56 = vpop.permute.xlu1 %384  ;;  %v3431_v57 = vpop.permute.xlu0 %382 }
  0xb0   : > { %v415_v60 = vld [vmem:[#allocation2 + $0x9] sm:$0xff]  ;;  %v3437_v62 = vpop.permute.xlu2 %503 }
  0xb1   : > { %v424_v61 = vld [vmem:[#allocation2 + $0xa] sm:$0xff]  ;;  %v418_v2 = vmul.f32 %v416_v41, %v415_v60  ;;  %v414_v6 = vld [vmem:[#allocation2 + $0x1] sm:$0xff]  ;;  %v373_v60 = vadd.f32 %v3403_v40, %v3211_v4 }
  0xb2   : > { %v423_v7 = vld [vmem:[#allocation2 + $0x2] sm:$0xff]  ;;  %v427_v12 = vmul.f32 %v425_v59, %v424_v61  ;;  %v417_v18 = vmul.f32 %v416_v41, %v414_v6  ;;  %v433_v20 = vld [vmem:[#allocation2 + $0xb] sm:$0xff] }
  0xb3   : > { %v420_v9 = vadd.f32 %v418_v2, %v411_v1  ;;  %v432_v21 = vld [vmem:[#allocation2 + $0x3] sm:$0xff]  ;;  %v426_v25 = vmul.f32 %v425_v59, %v423_v7  ;;  %v436_v28 = vmul.f32 %v434_v19, %v433_v20  ;;  %v442_v35 = vld [vmem:[#allocation2 + $0xc] sm:$0xff] }
  0xb4   : > { %v419_v24 = vadd.f32 %v417_v18, %v410_v16  ;;  %v441_v27 = vld [vmem:[#allocation2 + $0x4] sm:$0xff]  ;;  %v435_v31 = vmul.f32 %v434_v19, %v432_v21  ;;  %v445_v47 = vmul.f32 %v443_v26, %v442_v35  ;;  %v451_v52 = vld [vmem:[#allocation2 + $0xd] sm:$0xff] }
  0xb5   : > { %v429_v22 = vadd.f32 %v427_v12, %v420_v9  ;;  %945 = vrot.lane.b32.xlu1 %v929_v5, %s5008_s13  ;;  %943 = vrot.lane.b32.xlu0 %v3226_v10, %s5008_s13  ;;  %v450_v36 = vld [vmem:[#allocation2 + $0x5] sm:$0xff]  ;;  %v444_v42 = vmul.f32 %v443_v26, %v441_v27  ;;  %v454_v59 = vmul.f32 %v452_v34, %v451_v52  ;;  %v460_v7 = vld [vmem:[#allocation2 + $0xe] sm:$0xff]  ;;  %v573_v52 = vstv %s3500_s28  ;;  %s614_s28 = sadd.s32 58, %s3313_s7 }
  0xb6   : > { %947 = vrot.lane.b32.xlu2 %v930_v8, %s5008_s13  ;;  %v428_v30 = vadd.f32 %v426_v25, %v419_v24  ;;  %v459_v46 = vld [vmem:[#allocation2 + $0x6] sm:$0xff]  ;;  %v453_v49 = vmul.f32 %v452_v34, %v450_v36  ;;  %v963_v12 = vmul.f32 %v929_v5, %v929_v5  ;;  %v463_v40 = vmul.f32 %v461_v45, %v460_v7  ;;  %v469_v25 = vld [vmem:[#allocation2 + $0xf] sm:$0xff] }
  0xb7   : > { %v3455_v32 = vpop.permute.xlu1 %390  ;;  %v3457_v33 = vpop.permute.xlu0 %388  ;;  %v438_v38 = vadd.f32 %v436_v28, %v429_v22  ;;  %v468_v41 = vld [vmem:[#allocation2 + $0x7] sm:$0xff]  ;;  %v462_v55 = vmul.f32 %v461_v45, %v459_v46  ;;  %v964_v22 = vmul.f32 %v930_v8, %v930_v8  ;;  %v374_v5 = vadd.f32 %v3400_v43, %v3208_v3 }
  0xb8   : > { %v3460_v37 = vpop.permute.xlu2 %534  ;;  %v437_v39 = vadd.f32 %v435_v31, %v428_v30  ;;  %v471_v1 = vmul.f32 %v470_v50, %v468_v41  ;;  %v472_v27 = vmul.f32 %v470_v50, %v469_v25  ;;  %v396_v41 = vsel %vm357_vm0, %v3455_v32, %v3382_v23 }
  0xb9   : > { %v447_v53 = vadd.f32 %v445_v47, %v438_v38  ;;  %v564_v47 = vstv %s3497_s23  ;;  %s605_s23 = sadd.s32 50, %s3313_s7 }
  0xba   : > { %v446_v48 = vadd.f32 %v444_v42, %v437_v39  ;;  %v1072_v42 = vld [vmem:[%s3201_s29 + $0x28] sm:$0x7f]  ;;  %s3546_s27 = sld [smem:[#allocation4 + %s605_s23]] }
  0xbb   : > { %v456_v18 = vadd.f32 %v454_v59, %v447_v53  ;;  %v582_v59 = vstv %s3505_s10  ;;  %s3553_s10 = sld [smem:[#allocation4 + %s614_s28]]  ;;  %s726_s28 = sadd.s32 27, %s3313_s7 }
  0xbc   : > { %v455_v54 = vadd.f32 %v453_v49, %v446_v48  ;;  %v1078_v48 = vsub.f32 %v1072_v42, %v3203_v0  ;;  %v257_v49 = vmul.f32 %v3298_v29, %v3298_v29  ;;  %s3590_s23 = sld [smem:[#allocation4 + %s708_s11]]  ;;  %s744_s11 = sadd.s32 43, %s3313_s7 }
  0xbd   : > { %976 = vrot.lane.b32.xlu1 %v3243_v14, %s5008_s13  ;;  %974 = vrot.lane.b32.xlu0 %v3239_v13, %s5008_s13  ;;  %v465_v26 = vadd.f32 %v463_v40, %v456_v18 }
  0xbe   : > { %978 = vrot.lane.b32.xlu2 %v3247_v15, %s5008_s13  ;;  %v464_v61 = vadd.f32 %v462_v55, %v455_v54  ;;  %v402_v23 = vadd.f32 %v396_v41, %v257_v49 }
  0xbf   : > { %v496_v2 = vpop.permute.xlu1 %495  ;;  %v494_v6 = vpop.permute.xlu0 %493  ;;  %v474_v35 = vadd.f32 %v472_v27, %v465_v26  ;;  %v600_v26 = vstv %s3531_s22  ;;  %s717_s22 = sadd.s32 19, %s3313_s7 }
  0xc0   : > { %v506_v9 = vsel %vm505_vm1, %v494_v6, %v496_v2  ;;  %v3474_v16 = vpop.permute.xlu2 %540  ;;  %v473_v19 = vadd.f32 %v471_v1, %v464_v61  ;;  %v591_v1 = vstv %s3517_s12  ;;  %s3561_s12 = sld [smem:[#allocation4 + %s699_s9]]  ;;  %v609_v42 = vstv %s3546_s27  ;;  %s5013_s9 = smov 121  }
  0xc1   : > { %512 = vst [vmem:[#allocation2] sm:$0xff] %v506_v9  ;;  %v3476_v20 = vadd.f32 %v506_v9, %v373_v60  ;;  %v556_v21 = vmul.f32 %v555_v58, %v506_v9  ;;  %s3592_s27 = sld [smem:[#allocation4 + %s717_s22]] }
  0xc3   : > { %v558_v24 = vadd.f32 %v556_v21, %v473_v19 }
  0xc5   : > { %982 = vrot.lane.b32.xlu1 %v963_v12, %s5008_s13  ;;  %980 = vrot.lane.b32.xlu0 %v3257_v17, %s5008_s13 }
  0xc6   : > { %984 = vrot.lane.b32.xlu2 %v964_v22, %s5008_s13  ;;  %s762_s13 = sadd.s32 59, %s3313_s7 }
  0xc7   : > { %v502_v28 = vpop.permute.xlu1 %501  ;;  %v500_v8 = vpop.permute.xlu0 %499 }
  0xc8   : > { %v508_v30 = vsel %vm505_vm1, %v502_v28, %v3437_v62  ;;  %v507_v31 = vsel %vm505_vm1, %v3405_v44, %v500_v8  ;;  %v3489_v34 = vpop.permute.xlu2 %645 }
  0xc9   : > { %514 = vst [vmem:[#allocation2 + $0x10] sm:$0x7f] %v508_v30  ;;  %v3493_v36 = vadd.f32 %v508_v30, %v3350_v51  ;;  %v3495_v43 = vadd.f32 %v507_v31, %v374_v5  ;;  %v557_v38 = vmul.f32 %v555_v58, %v507_v31  ;;  %v1071_v51 = vld [vmem:[%s3201_s29 + $0x20] sm:$0x7f] }
  0xca   : > { %513 = vst [vmem:[#allocation2 + $0x8] sm:$0xff] %v507_v31  ;;  %v1077_v46 = vsub.f32 %v1071_v51, %v3203_v0 }
  0xcb   : > { %v559_v62 = vadd.f32 %v557_v38, %v474_v35 }
  0xcc   : > { %v1111_v49 = vmul.f32 %v1077_v46, %v1077_v46 }
  0xcd   : > { %1087 = vrot.lane.b32.xlu1 %v3229_v11, %s5006_s8  ;;  %1085 = vrot.lane.b32.xlu0 %v3211_v4, %s5006_s8 }
  0xce   : > { %1089 = vrot.lane.b32.xlu2 %v3208_v3, %s5006_s8 }
  0xcf   : > { %v3512_v44 = vpop.permute.xlu1 %532  ;;  %v3514_v39 = vpop.permute.xlu0 %530 }
  0xd0   : > { %v3519_v45 = vpop.permute.xlu2 %651 }
  0xd1   : > { %v562_v50 = vld [vmem:[#allocation2 + $0x1] sm:$0xff]  ;;  %v563_v55 = vld [vmem:[#allocation2 + $0x9] sm:$0xff] }
  0xd2   : > { %v571_v53 = vld [vmem:[#allocation2 + $0x2] sm:$0xff]  ;;  %v565_v54 = vmul.f32 %v564_v47, %v562_v50  ;;  %v566_v9 = vmul.f32 %v564_v47, %v563_v55  ;;  %v572_v22 = vld [vmem:[#allocation2 + $0xa] sm:$0xff] }
  0xd3   : > { %v580_v58 = vld [vmem:[#allocation2 + $0x3] sm:$0xff]  ;;  %v574_v60 = vmul.f32 %v573_v52, %v571_v53  ;;  %v575_v5 = vmul.f32 %v573_v52, %v572_v22  ;;  %v581_v8 = vld [vmem:[#allocation2 + $0xb] sm:$0xff]  ;;  %v1112_v52 = vmul.f32 %v1078_v48, %v1078_v48 }
  0xd4   : > { %v567_v29 = vadd.f32 %v565_v54, %v558_v24  ;;  %v589_v7 = vld [vmem:[#allocation2 + $0x4] sm:$0xff]  ;;  %v583_v18 = vmul.f32 %v582_v59, %v580_v58  ;;  %v568_v25 = vadd.f32 %v566_v9, %v559_v62  ;;  %v584_v41 = vmul.f32 %v582_v59, %v581_v8  ;;  %v590_v53 = vld [vmem:[#allocation2 + $0xc] sm:$0xff] }
  0xd5   : > { %1093 = vrot.lane.b32.xlu1 %v1077_v46, %s5006_s8  ;;  %1091 = vrot.lane.b32.xlu0 %v3226_v10, %s5006_s8  ;;  %v592_v40 = vmul.f32 %v591_v1, %v589_v7  ;;  %v598_v24 = vld [vmem:[#allocation2 + $0x5] sm:$0xff]  ;;  %v618_v58 = vstv %s3553_s10  ;;  %v608_v59 = vld [vmem:[#allocation2 + $0xe] sm:$0xff]  ;;  %s735_s10 = sadd.s32 35, %s3313_s7 }
  0xd6   : > { %1095 = vrot.lane.b32.xlu2 %v1078_v48, %s5006_s8  ;;  %v576_v12 = vadd.f32 %v574_v60, %v567_v29  ;;  %v601_v30 = vmul.f32 %v600_v26, %v598_v24  ;;  %v607_v38 = vld [vmem:[#allocation2 + $0x6] sm:$0xff]  ;;  %v577_v51 = vadd.f32 %v575_v5, %v568_v25  ;;  %v703_v60 = vstv %s3561_s12  ;;  %s3604_s12 = sld [smem:[#allocation4 + %s726_s28]]  ;;  %s753_s28 = sadd.s32 51, %s3313_s7 }
  0xd7   : > { %v539_v32 = vpop.permute.xlu1 %538  ;;  %v3539_v61 = vpop.permute.xlu0 %536  ;;  %v616_v62 = vld [vmem:[#allocation2 + $0x7] sm:$0xff]  ;;  %v610_v54 = vmul.f32 %v609_v42, %v607_v38  ;;  %s3615_s22 = sld [smem:[#allocation4 + %s735_s10]]  ;;  %s847_s10 = sadd.s32 4, %s3313_s7 }
  0xd8   : > { %v544_v2 = vsel %vm505_vm1, %v539_v32, %v3474_v16  ;;  %v3544_v6 = vpop.permute.xlu2 %682  ;;  %v585_v21 = vadd.f32 %v583_v18, %v576_v12  ;;  %v586_v55 = vadd.f32 %v584_v41, %v577_v51  ;;  %v619_v32 = vmul.f32 %v618_v58, %v616_v62  ;;  %v1220_v5 = vld [vmem:[%s3201_s29 + $0x28] sm:$0x7f] }
  0xd9   : > { %v3548_v19 = vadd.f32 %v544_v2, %v402_v23  ;;  %v599_v23 = vld [vmem:[#allocation2 + $0xd] sm:$0xff]  ;;  %v3621_v8 = vsub.f32 %v1220_v5, %v3203_v0  ;;  %v543_v51 = vsel %vm505_vm1, %v3460_v37, %v3539_v61 }
  0xda   : > { %v594_v16 = vadd.f32 %v592_v40, %v585_v21  ;;  %v617_v2 = vld [vmem:[#allocation2 + $0xf] sm:$0xff] }
  0xdc   : > { %v603_v50 = vadd.f32 %v601_v30, %v594_v16  ;;  %v620_v30 = vmul.f32 %v618_v58, %v617_v2 }
  0xdd   : > { %1124 = vrot.lane.b32.xlu1 %v3243_v14, %s5006_s8  ;;  %1122 = vrot.lane.b32.xlu0 %v3239_v13, %s5006_s8 }
  0xde   : > { %1126 = vrot.lane.b32.xlu2 %v3247_v15, %s5006_s8  ;;  %v612_v29 = vadd.f32 %v610_v54, %v603_v50 }
  0xdf   : > { %v644_v27 = vpop.permute.xlu1 %643  ;;  %v642_v28 = vpop.permute.xlu0 %641 }
  0xe0   : > { %v654_v31 = vsel %vm653_vm2, %v642_v28, %v644_v27  ;;  %v3564_v35 = vpop.permute.xlu2 %688  ;;  %v621_v40 = vadd.f32 %v619_v32, %v612_v29 }
  0xe1   : > { %v3568_v47 = vadd.f32 %v654_v31, %v3476_v20  ;;  %660 = vst [vmem:[#allocation2] sm:$0xff] %v654_v31  ;;  %v593_v20 = vmul.f32 %v591_v1, %v590_v53  ;;  %v712_v31 = vstv %s3590_s23  ;;  %s3636_s23 = sld [smem:[#allocation4 + %s753_s28]] }
  0xe3   : > { %v595_v18 = vadd.f32 %v593_v20, %v586_v55 }
  0xe5   : > { %1130 = vrot.lane.b32.xlu1 %v1111_v49, %s5006_s8  ;;  %1128 = vrot.lane.b32.xlu0 %v3257_v17, %s5006_s8 }
  0xe6   : > { %1132 = vrot.lane.b32.xlu2 %v1112_v52, %s5006_s8  ;;  %s3625_s8 = sld [smem:[#allocation4 + %s744_s11]] }
  0xe7   : > { %v650_v46 = vpop.permute.xlu1 %649  ;;  %v648_v48 = vpop.permute.xlu0 %647  ;;  %s3645_s11 = sld [smem:[#allocation4 + %s847_s10]]  ;;  %v757_v5 = vstv %s3636_s23  ;;  %s874_s10 = sadd.s32 28, %s3313_s7 }
  0xe8   : > { %v656_v7 = vsel %vm653_vm2, %v650_v46, %v3519_v45  ;;  %v655_v9 = vsel %vm653_vm2, %v3489_v34, %v648_v48  ;;  %v3581_v12 = vpop.permute.xlu2 %793  ;;  %v701_v1 = vld [vmem:[#allocation2] sm:$0xff]  ;;  %v602_v34 = vmul.f32 %v600_v26, %v599_v23  ;;  %v730_v46 = vstv %s3604_s12 }
  0xe9   : > { %662 = vst [vmem:[#allocation2 + $0x10] sm:$0x7f] %v656_v7  ;;  %v3584_v21 = vadd.f32 %v656_v7, %v3493_v36  ;;  %v3587_v22 = vadd.f32 %v655_v9, %v3495_v43  ;;  %v704_v24 = vmul.f32 %v703_v60, %v701_v1  ;;  %v1219_v36 = vld [vmem:[%s3201_s29 + $0x20] sm:$0x7f]  ;;  %v611_v43 = vmul.f32 %v609_v42, %v608_v59 }
  0xea   : > { %661 = vst [vmem:[#allocation2 + $0x8] sm:$0xff] %v655_v9  ;;  %v604_v25 = vadd.f32 %v602_v34, %v595_v18  ;;  %v3613_v28 = vsub.f32 %v1219_v36, %v3203_v0  ;;  %v739_v1 = vstv %s3615_s22  ;;  %s865_s22 = sadd.s32 20, %s3313_s7 }
  0xeb   : > { %v706_v45 = vadd.f32 %v704_v24, %v621_v40  ;;  %s3717_s23 = sld [smem:[#allocation4 + %s865_s22]]  ;;  %s901_s22 = sadd.s32 52, %s3313_s7 }
  0xed   : > { %1235 = vrot.lane.b32.xlu1 %v3229_v11, %s5013_s9  ;;  %1233 = vrot.lane.b32.xlu0 %v3211_v4, %s5013_s9  ;;  %v613_v4 = vadd.f32 %v611_v43, %v604_v25 }
  0xee   : > { %1237 = vrot.lane.b32.xlu2 %v3208_v3, %s5013_s9  ;;  %v395_v3 = vsel %vm357_vm0, %v3366_v63, %v3457_v33  ;;  %v721_v63 = vstv %s3592_s27  ;;  %s3642_s27 = sld [smem:[#allocation4 + %s762_s13]]  ;;  %s5010_s13 = sadd.s32 1, %s3193_s14 }
  0xef   : > { %v681_v26 = vpop.permute.xlu1 %680  ;;  %v679_v16 = vpop.permute.xlu0 %678  ;;  %v622_v49 = vadd.f32 %v620_v30, %v613_v4  ;;  %v401_v0 = vadd.f32 %v395_v3, %v3247_v15  ;;  %s3665_s12 = sld [smem:[#allocation9 + %s5010_s13]] }
  0xf0   : > { %v3607_v27 = vsel %vm653_vm2, %v679_v16, %v681_v26  ;;  %v3609_v11 = vpop.permute.xlu2 %799 }
  0xf1   : > { %v711_v38 = vld [vmem:[#allocation2 + $0x9] sm:$0xff]  ;;  %v710_v52 = vld [vmem:[#allocation2 + $0x1] sm:$0xff]  ;;  %v549_v53 = vadd.f32 %v543_v51, %v401_v0 }
  0xf2   : > { %v702_v62 = vld [vmem:[#allocation2 + $0x8] sm:$0xff]  ;;  %v713_v33 = vmul.f32 %v712_v31, %v710_v52  ;;  %v714_v61 = vmul.f32 %v712_v31, %v711_v38 }
  0xf3   : > { %v720_v42 = vld [vmem:[#allocation2 + $0xa] sm:$0xff]  ;;  %v705_v50 = vmul.f32 %v703_v60, %v702_v62  ;;  %v719_v41 = vld [vmem:[#allocation2 + $0x2] sm:$0xff] }
  0xf4   : > { %v729_v58 = vld [vmem:[#allocation2 + $0xb] sm:$0xff]  ;;  %v715_v29 = vadd.f32 %v713_v33, %v706_v45  ;;  %v723_v20 = vmul.f32 %v721_v63, %v720_v42  ;;  %v728_v60 = vld [vmem:[#allocation2 + $0x3] sm:$0xff]  ;;  %v722_v59 = vmul.f32 %v721_v63, %v719_v41  ;;  %v748_v45 = vstv %s3625_s8  ;;  %s856_s8 = sadd.s32 12, %s3313_s7 }
  0xf5   : > { %1241 = vrot.lane.b32.xlu1 %v3613_v28, %s5013_s9  ;;  %1239 = vrot.lane.b32.xlu0 %v3226_v10, %s5013_s9  ;;  %v707_v37 = vadd.f32 %v705_v50, %v622_v49  ;;  %v738_v9 = vld [vmem:[#allocation2 + $0xc] sm:$0xff]  ;;  %v737_v18 = vld [vmem:[#allocation2 + $0x4] sm:$0xff]  ;;  %v731_v24 = vmul.f32 %v730_v46, %v728_v60  ;;  %v732_v34 = vmul.f32 %v730_v46, %v729_v58  ;;  %v851_v42 = vstv %s3645_s11  ;;  %s3696_s28 = sld [smem:[#allocation4 + %s856_s8]] }
  0xf6   : > { %1243 = vrot.lane.b32.xlu2 %v3621_v8, %s5013_s9  ;;  %v747_v25 = vld [vmem:[#allocation2 + $0xd] sm:$0xff]  ;;  %v740_v26 = vmul.f32 %v739_v1, %v737_v18  ;;  %v1259_v33 = vmul.f32 %v3613_v28, %v3613_v28  ;;  %v2820_v28 = vld [vmem:[%s3201_s29 + $0x38] sm:$0xff]  ;;  %s3730_s11 = sld [smem:[#allocation4 + %s874_s10]] }
  0xf7   : > { %v687_v54 = vpop.permute.xlu1 %686  ;;  %v685_v55 = vpop.permute.xlu0 %684  ;;  %v716_v32 = vadd.f32 %v714_v61, %v707_v37  ;;  %v755_v16 = vld [vmem:[#allocation2 + $0x6] sm:$0xff]  ;;  %v750_v62 = vmul.f32 %v748_v45, %v747_v25  ;;  %v756_v50 = vld [vmem:[#allocation2 + $0xe] sm:$0xff]  ;;  %v1260_v37 = vmul.f32 %v3621_v8, %v3621_v8  ;;  %v2824_v25 = vld [vmem:[%s3201_s29 + $0x58] sm:$0x7f] }
  0xf8   : > { %v692_v10 = vsel %vm653_vm2, %v687_v54, %v3564_v35  ;;  %v691_v23 = vsel %vm653_vm2, %v3544_v6, %v685_v55  ;;  %v3651_v48 = vpop.permute.xlu2 %830  ;;  %v724_v35 = vadd.f32 %v722_v59, %v715_v29  ;;  %v746_v6 = vld [vmem:[#allocation2 + $0x5] sm:$0xff]  ;;  %v758_v0 = vmul.f32 %v757_v5, %v755_v16  ;;  %v765_v58 = vld [vmem:[#allocation2 + $0xf] sm:$0xff] }
  0xf9   : > { %v3654_v2 = vadd.f32 %v692_v10, %v3548_v19  ;;  %v3656_v7 = vadd.f32 %v691_v23, %v549_v53  ;;  %v725_v40 = vadd.f32 %v723_v20, %v716_v32  ;;  %v741_v19 = vmul.f32 %v739_v1, %v738_v9  ;;  %v764_v51 = vld [vmem:[#allocation2 + $0x7] sm:$0xff]  ;;  %v2819_v10 = vld [vmem:[%s3201_s29 + $0x30] sm:$0xff] }
  0xfa   : > { %v733_v36 = vadd.f32 %v731_v24, %v724_v35  ;;  %v749_v30 = vmul.f32 %v748_v45, %v746_v6  ;;  %v759_v55 = vmul.f32 %v757_v5, %v756_v50  ;;  %v2821_v23 = vld [vmem:[%s3201_s29 + $0x40] sm:$0xff]  ;;  %v394_v59 = vsel %vm357_vm0, %v3431_v57, %v3429_v56  ;;  %v2822_v45 = vld [vmem:[%s3201_s29 + $0x48] sm:$0xff] }
  0xfb   : > { %v734_v43 = vadd.f32 %v732_v34, %v725_v40 }
  0xfc   : > { %v742_v4 = vadd.f32 %v740_v26, %v733_v36  ;;  %v860_v36 = vstv %s3696_s28  ;;  %s910_s28 = sadd.s32 60, %s3313_s7 }
  0xfd   : > { %1272 = vrot.lane.b32.xlu1 %v3243_v14, %s5013_s9  ;;  %1270 = vrot.lane.b32.xlu0 %v3239_v13, %s5013_s9  ;;  %v743_v3 = vadd.f32 %v741_v19, %v734_v43  ;;  %v766_v14 = vstv %s3642_s27  ;;  %s883_s27 = sadd.s32 36, %s3313_s7 }
  0xfe   : > { %1274 = vrot.lane.b32.xlu2 %v3247_v15, %s5013_s9  ;;  %v751_v63 = vadd.f32 %v749_v30, %v742_v4  ;;  %v767_v53 = vmul.f32 %v766_v14, %v764_v51  ;;  %v768_v32 = vmul.f32 %v766_v14, %v765_v58  ;;  %s3735_s8 = sld [smem:[#allocation4 + %s883_s27]] }
  0xff   : > { %v792_v31 = vpop.permute.xlu1 %791  ;;  %v790_v38 = vpop.permute.xlu0 %789  ;;  %v752_v41 = vadd.f32 %v750_v62, %v743_v3  ;;  %v869_v3 = vstv %s3717_s23  ;;  %s3758_s27 = sld [smem:[#allocation4 + %s901_s22]]  ;;  %s1013_s22 = sadd.s32 21, %s3313_s7 }
 0x100   : > { %v802_v49 = vsel %vm801_vm3, %v790_v38, %v792_v31  ;;  %v3675_v52 = vpop.permute.xlu2 %836  ;;  %v760_v61 = vadd.f32 %v758_v0, %v751_v63  ;;  %s3769_s23 = sld [smem:[#allocation4 + %s910_s28]]  ;;  %s1031_s28 = sadd.s32 37, %s3313_s7 }
 0x101   : > { %v3678_v15 = vadd.f32 %v802_v49, %v3568_v47  ;;  %808 = vst [vmem:[#allocation2] sm:$0xff] %v802_v49  ;;  %v852_v54 = vmul.f32 %v851_v42, %v802_v49  ;;  %v3687_v47 = vstv %s3665_s12  ;;  %v761_v20 = vadd.f32 %v759_v55, %v752_v41  ;;  %s892_s12 = sadd.s32 44, %s3313_s7 }
 0x102   : > { %v769_v29 = vadd.f32 %v767_v53, %v760_v61  ;;  %v3706_v18 = vsub.f32 %v2820_v28, %v3687_v47  ;;  %v3723_v40 = vsub.f32 %v2819_v10, %v3687_v47  ;;  %v3726_v24 = vsub.f32 %v2821_v23, %v3687_v47  ;;  %s3747_s10 = sld [smem:[#allocation4 + %s892_s12]]  ;;  %s995_s12 = sadd.s32 5, %s3313_s7 }
 0x103   : > { %v770_v57 = vadd.f32 %v768_v32, %v761_v20  ;;  %v3762_v30 = vsub.f32 %v2822_v45, %v3687_v47  ;;  %v3765_v31 = vsub.f32 %v2824_v25, %v3687_v47 }
 0x104   : > { %v854_v8 = vadd.f32 %v852_v54, %v769_v29  ;;  %v3782_v29 = vmul.f32 %v3706_v18, %v3706_v18 }
 0x105   : > { %1278 = vrot.lane.b32.xlu1 %v1259_v33, %s5013_s9  ;;  %1276 = vrot.lane.b32.xlu0 %v3257_v17, %s5013_s9 }
 0x106   : > { %1280 = vrot.lane.b32.xlu2 %v1260_v37, %s5013_s9  ;;  %v887_v37 = vstv %s3735_s8  ;;  %s1004_s8 = sadd.s32 13, %s3313_s7 }
 0x107   : > { %v798_v60 = vpop.permute.xlu1 %797  ;;  %v796_v46 = vpop.permute.xlu0 %795 }
 0x108   : > { %v804_v9 = vsel %vm801_vm3, %v798_v60, %v3609_v11  ;;  %v803_v17 = vsel %vm801_vm3, %v3581_v12, %v796_v46  ;;  %v3708_v1 = vpop.permute.xlu2 %941  ;;  %v542_v12 = vsel %vm505_vm1, %v3514_v39, %v3512_v44  ;;  %v2823_v44 = vld [vmem:[%s3201_s29 + $0x50] sm:$0x7f] }
 0x109   : > { %810 = vst [vmem:[#allocation2 + $0x10] sm:$0x7f] %v804_v9  ;;  %v3712_v35 = vadd.f32 %v804_v9, %v3584_v21  ;;  %v3715_v56 = vadd.f32 %v803_v17, %v3587_v22  ;;  %v853_v11 = vmul.f32 %v851_v42, %v803_v17  ;;  %v400_v21 = vadd.f32 %v394_v59, %v3239_v13 }
 0x10a   : > { %809 = vst [vmem:[#allocation2 + $0x8] sm:$0xff] %v803_v17  ;;  %v3755_v16 = vsub.f32 %v2823_v44, %v3687_v47  ;;  %v878_v42 = vstv %s3730_s11  ;;  %s3778_s11 = sld [smem:[#allocation4 + %s995_s12]]  ;;  %v3799_v17 = vmul.f32 %v3723_v40, %v3723_v40 }
 0x10b   : > { %v855_v22 = vadd.f32 %v853_v11, %v770_v57  ;;  %v548_v34 = vadd.f32 %v542_v12, %v400_v21  ;;  %v905_v11 = vstv %s3758_s27  ;;  %s1022_s27 = sadd.s32 29, %s3313_s7 }
 0x10c   : > { %s3852_s12 = sld [smem:[#allocation4 + %s1022_s27]] }
 0x10d   : > { %1575 = vrot.lane.b32.xlu1 %v3706_v18, %s3082_s30  ;;  %1573 = vrot.lane.b32.xlu0 %v3723_v40, %s3082_s30  ;;  %v696_v13 = vadd.f32 %v3607_v27, %v548_v34 }
 0x10e   : > { %1577 = vrot.lane.b32.xlu2 %v3726_v24, %s3082_s30 }
 0x10f   : > { %v829_v39 = vpop.permute.xlu1 %828  ;;  %v827_v6 = vpop.permute.xlu0 %826 }
 0x110   : > { %v838_v43 = vsel %vm801_vm3, %v827_v6, %v829_v39  ;;  %v3750_v26 = vpop.permute.xlu2 %947  ;;  %v999_v25 = vstv %s3778_s11  ;;  %s3859_s11 = sld [smem:[#allocation4 + %s1031_s28]]  ;;  %s1143_s28 = sadd.s32 6, %s3313_s7 }
 0x111   : > { %v3752_v19 = vadd.f32 %v838_v43, %v696_v13  ;;  %v858_v27 = vld [vmem:[#allocation2 + $0x1] sm:$0xff]  ;;  %v859_v5 = vld [vmem:[#allocation2 + $0x9] sm:$0xff]  ;;  %v914_v13 = vstv %s3769_s23  ;;  %s1040_s23 = sadd.s32 45, %s3313_s7 }
 0x112   : > { %v867_v4 = vld [vmem:[#allocation2 + $0x2] sm:$0xff]  ;;  %v861_v38 = vmul.f32 %v860_v36, %v858_v27  ;;  %v862_v62 = vmul.f32 %v860_v36, %v859_v5  ;;  %v868_v51 = vld [vmem:[#allocation2 + $0xa] sm:$0xff] }
 0x113   : > { %v876_v14 = vld [vmem:[#allocation2 + $0x3] sm:$0xff]  ;;  %v870_v63 = vmul.f32 %v869_v3, %v867_v4  ;;  %v871_v0 = vmul.f32 %v869_v3, %v868_v51  ;;  %v877_v33 = vld [vmem:[#allocation2 + $0xb] sm:$0xff] }
 0x114   : > { %v863_v49 = vadd.f32 %v861_v38, %v854_v8  ;;  %v864_v50 = vadd.f32 %v862_v62, %v855_v22  ;;  %v885_v41 = vld [vmem:[#allocation2 + $0x4] sm:$0xff]  ;;  %v879_v54 = vmul.f32 %v878_v42, %v876_v14  ;;  %v880_v28 = vmul.f32 %v878_v42, %v877_v33  ;;  %v886_v57 = vld [vmem:[#allocation2 + $0xc] sm:$0xff] }
 0x115   : > { %1581 = vrot.lane.b32.xlu1 %v3755_v16, %s3082_s30  ;;  %1579 = vrot.lane.b32.xlu0 %v3762_v30, %s3082_s30  ;;  %v894_v20 = vld [vmem:[#allocation2 + $0x5] sm:$0xff]  ;;  %v896_v8 = vstv %s3747_s10  ;;  %v888_v32 = vmul.f32 %v887_v37, %v885_v41  ;;  %v895_v39 = vld [vmem:[#allocation2 + $0xd] sm:$0xff]  ;;  %v1598_v62 = vmul.f32 %v3755_v16, %v3755_v16  ;;  %s3834_s10 = sld [smem:[#allocation4 + %s1004_s8]]  ;;  %s1049_s8 = sadd.s32 53, %s3313_s7 }
 0x116   : > { %1583 = vrot.lane.b32.xlu2 %v3765_v31, %s3082_s30  ;;  %v872_v61 = vadd.f32 %v870_v63, %v863_v49  ;;  %v873_v53 = vadd.f32 %v871_v0, %v864_v50  ;;  %v897_v22 = vmul.f32 %v896_v8, %v894_v20  ;;  %v898_v3 = vmul.f32 %v896_v8, %v895_v39  ;;  %v904_v51 = vld [vmem:[#allocation2 + $0xe] sm:$0xff]  ;;  %v2830_v20 = vld [vmem:[%s3201_s29 + $0x58] sm:$0x7f]  ;;  %s3879_s27 = sld [smem:[#allocation4 + %s1049_s8]] }
 0x117   : > { %v835_v55 = vpop.permute.xlu1 %834  ;;  %v833_v58 = vpop.permute.xlu0 %832  ;;  %v3824_v49 = vmul.f32 %v3762_v30, %v3762_v30  ;;  %v1599_v50 = vmul.f32 %v3765_v31, %v3765_v31  ;;  %v913_v16 = vld [vmem:[#allocation2 + $0xf] sm:$0xff] }
 0x118   : > { %v840_v60 = vsel %vm801_vm3, %v835_v55, %v3675_v52  ;;  %v839_v46 = vsel %vm801_vm3, %v3651_v48, %v833_v58  ;;  %v3789_v10 = vpop.permute.xlu2 %978  ;;  %v881_v23 = vadd.f32 %v879_v54, %v872_v61  ;;  %v903_v52 = vld [vmem:[#allocation2 + $0x6] sm:$0xff]  ;;  %v3804_v48 = vmul.f32 %v3726_v24, %v3726_v24 }
 0x119   : > { %v3792_v59 = vadd.f32 %v840_v60, %v3654_v2  ;;  %v3795_v9 = vadd.f32 %v839_v46, %v3656_v7  ;;  %v882_v12 = vadd.f32 %v880_v28, %v873_v53  ;;  %v889_v2 = vmul.f32 %v887_v37, %v886_v57  ;;  %v912_v7 = vld [vmem:[#allocation2 + $0x7] sm:$0xff] }
 0x11a   : > { %v890_v21 = vadd.f32 %v888_v32, %v881_v23  ;;  %v906_v44 = vmul.f32 %v905_v11, %v903_v52  ;;  %v915_v27 = vmul.f32 %v914_v13, %v912_v7  ;;  %v916_v53 = vmul.f32 %v914_v13, %v913_v16 }
 0x11b   : > { %v891_v6 = vadd.f32 %v889_v2, %v882_v12  ;;  %v1008_v8 = vstv %s3834_s10  ;;  %s1058_s10 = sadd.s32 61, %s3313_s7  ;;  %v1035_v7 = vstv %s3859_s11  ;;  %s1161_s11 = sadd.s32 22, %s3313_s7 }
 0x11c   : > { %v899_v34 = vadd.f32 %v897_v22, %v890_v21  ;;  %v1026_v22 = vstv %s3852_s12  ;;  %s3981_s8 = sld [smem:[#allocation4 + %s1161_s11]] }
 0x11d   : > { %1611 = vrot.lane.b32.xlu1 %v3782_v29, %s3082_s30  ;;  %1609 = vrot.lane.b32.xlu0 %v3799_v17, %s3082_s30  ;;  %v900_v63 = vadd.f32 %v898_v3, %v891_v6 }
 0x11e   : > { %1613 = vrot.lane.b32.xlu2 %v3804_v48, %s3082_s30  ;;  %v908_v45 = vadd.f32 %v906_v44, %v899_v34 }
 0x11f   : > { %v940_v36 = vpop.permute.xlu1 %939  ;;  %v938_v43 = vpop.permute.xlu0 %937 }
 0x120   : > { %v950_v5 = vsel %vm949_vm4, %v938_v43, %v940_v36  ;;  %v3815_v4 = vpop.permute.xlu2 %984  ;;  %v917_v14 = vadd.f32 %v915_v27, %v908_v45 }
 0x121   : > { %v3818_v38 = vadd.f32 %v950_v5, %v3678_v15  ;;  %956 = vst [vmem:[#allocation2] sm:$0xff] %v950_v5  ;;  %v1000_v42 = vmul.f32 %v999_v25, %v950_v5  ;;  %v907_v15 = vmul.f32 %v905_v11, %v904_v51  ;;  %v1713_v11 = vsub.f32 %v2830_v20, %v3687_v47 }
 0x122   : > { %v1053_v51 = vstv %s3879_s27 }
 0x123   : > { %v1002_v0 = vadd.f32 %v1000_v42, %v917_v14  ;;  %v909_v33 = vadd.f32 %v907_v15, %v900_v63 }
 0x125   : > { %1617 = vrot.lane.b32.xlu1 %v1598_v62, %s3082_s30  ;;  %1615 = vrot.lane.b32.xlu0 %v3824_v49, %s3082_s30  ;;  %v918_v58 = vadd.f32 %v916_v53, %v909_v33 }
 0x126   : > { %1619 = vrot.lane.b32.xlu2 %v1599_v50, %s3082_s30  ;;  %s3846_s30 = sld [smem:[#allocation4 + %s1013_s22]] }
 0x127   : > { %v946_v41 = vpop.permute.xlu1 %945  ;;  %v944_v37 = vpop.permute.xlu0 %943  ;;  %s3871_s22 = sld [smem:[#allocation4 + %s1040_s23]] }
 0x128   : > { %v952_v31 = vsel %vm949_vm4, %v946_v41, %v3750_v26  ;;  %v3838_v61 = vpop.permute.xlu2 %1089  ;;  %v951_v55 = vsel %vm949_vm4, %v3708_v1, %v944_v37  ;;  %v2829_v1 = vld [vmem:[%s3201_s29 + $0x50] sm:$0x7f]  ;;  %s3897_s23 = sld [smem:[#allocation4 + %s1143_s28]] }
 0x129   : > { %v3842_v54 = vadd.f32 %v952_v31, %v3712_v35  ;;  %958 = vst [vmem:[#allocation2 + $0x10] sm:$0x7f] %v952_v31  ;;  %v3849_v26 = vadd.f32 %v951_v55, %v3715_v56  ;;  %v1001_v28 = vmul.f32 %v999_v25, %v951_v55  ;;  %v1712_v23 = vsub.f32 %v2829_v1, %v3687_v47 }
 0x12a   : > { %957 = vst [vmem:[#allocation2 + $0x8] sm:$0xff] %v951_v55  ;;  %v1746_v1 = vmul.f32 %v1713_v11, %v1713_v11 }
 0x12b   : > { %v3854_v35 = vadd.f32 %v1001_v28, %v918_v58  ;;  %v1745_v28 = vmul.f32 %v1712_v23, %v1712_v23 }
 0x12c   : > { %v1017_v52 = vstv %s3846_s30  ;;  %s3887_s30 = sld [smem:[#allocation4 + %s1058_s10]]  ;;  %s1179_s10 = sadd.s32 38, %s3313_s7 }
 0x12d   : > { %1722 = vrot.lane.b32.xlu1 %v3706_v18, %s3083_s5  ;;  %1720 = vrot.lane.b32.xlu0 %v3723_v40, %s3083_s5  ;;  %v1044_v25 = vstv %s3871_s22  ;;  %s1170_s22 = sadd.s32 30, %s3313_s7  ;;  %s4005_s28 = sld [smem:[#allocation4 + %s1179_s10]] }
 0x12e   : > { %1724 = vrot.lane.b32.xlu2 %v3726_v24, %s3083_s5  ;;  %v1147_v31 = vstv %s3897_s23  ;;  %s3995_s27 = sld [smem:[#allocation4 + %s1170_s22]]  ;;  %s1300_s22 = sadd.s32 15, %s3313_s7 }
 0x12f   : > { %v3867_v56 = vpop.permute.xlu1 %976  ;;  %v3873_v60 = vpop.permute.xlu0 %974  ;;  %s1309_s10 = sadd.s32 23, %s3313_s7 }
 0x130   : > { %v3875_v46 = vpop.permute.xlu2 %1095 }
 0x131   : > { %v1006_v32 = vld [vmem:[#allocation2 + $0x1] sm:$0xff]  ;;  %v1007_v63 = vld [vmem:[#allocation2 + $0x9] sm:$0xff] }
 0x132   : > { %v1015_v57 = vld [vmem:[#allocation2 + $0x2] sm:$0xff]  ;;  %v1009_v12 = vmul.f32 %v1008_v8, %v1006_v32  ;;  %v1062_v33 = vstv %s3887_s30  ;;  %v1010_v41 = vmul.f32 %v1008_v8, %v1007_v63  ;;  %v1016_v20 = vld [vmem:[#allocation2 + $0xa] sm:$0xff]  ;;  %s1188_s30 = sadd.s32 46, %s3313_s7 }
 0x133   : > { %v1024_v21 = vld [vmem:[#allocation2 + $0x3] sm:$0xff]  ;;  %v1018_v34 = vmul.f32 %v1017_v52, %v1015_v57  ;;  %s4019_s23 = sld [smem:[#allocation4 + %s1188_s30]]  ;;  %s1318_s30 = sadd.s32 31, %s3313_s7 }
 0x134   : > { %v1011_v2 = vadd.f32 %v1009_v12, %v1002_v0  ;;  %v1033_v44 = vld [vmem:[#allocation2 + $0x4] sm:$0xff]  ;;  %v1027_v39 = vmul.f32 %v1026_v22, %v1024_v21  ;;  %v1012_v8 = vadd.f32 %v1010_v41, %v3854_v35  ;;  %v1019_v21 = vmul.f32 %v1017_v52, %v1016_v20  ;;  %v1043_v52 = vld [vmem:[#allocation2 + $0xd] sm:$0xff] }
 0x135   : > { %1728 = vrot.lane.b32.xlu1 %v1712_v23, %s3083_s5  ;;  %1726 = vrot.lane.b32.xlu0 %v3762_v30, %s3083_s5  ;;  %v1042_v45 = vld [vmem:[#allocation2 + $0x5] sm:$0xff]  ;;  %v1036_v5 = vmul.f32 %v1035_v7, %v1033_v44  ;;  %v1046_v63 = vmul.f32 %v1044_v25, %v1043_v52 }
 0x136   : > { %1730 = vrot.lane.b32.xlu2 %v1713_v11, %s3083_s5  ;;  %v1020_v13 = vadd.f32 %v1018_v34, %v1011_v2  ;;  %v1051_v62 = vld [vmem:[#allocation2 + $0x6] sm:$0xff]  ;;  %v1045_v50 = vmul.f32 %v1044_v25, %v1042_v45  ;;  %v1021_v2 = vadd.f32 %v1019_v21, %v1012_v8  ;;  %v1061_v45 = vld [vmem:[#allocation2 + $0xf] sm:$0xff]  ;;  %v1165_v21 = vstv %s3981_s8  ;;  %s1291_s8 = sadd.s32 7, %s3313_s7 }
 0x137   : > { %v3894_v6 = vpop.permute.xlu1 %982  ;;  %v981_v36 = vpop.permute.xlu0 %980  ;;  %v1054_v15 = vmul.f32 %v1053_v51, %v1051_v62  ;;  %v1060_v16 = vld [vmem:[#allocation2 + $0x7] sm:$0xff] }
 0x138   : > { %v3899_v43 = vpop.permute.xlu2 %1126  ;;  %v1029_v27 = vadd.f32 %v1027_v39, %v1020_v13  ;;  %v987_v3 = vsel %vm949_vm4, %v3789_v10, %v981_v36  ;;  %v1063_v55 = vmul.f32 %v1062_v33, %v1060_v16  ;;  %v1025_v23 = vld [vmem:[#allocation2 + $0xb] sm:$0xff] }
 0x139   : > { %v3907_v14 = vadd.f32 %v987_v3, %v3795_v9  ;;  %v1034_v34 = vld [vmem:[#allocation2 + $0xc] sm:$0xff]  ;;  %v2836_v3 = vld [vmem:[%s3201_s29 + $0x58] sm:$0x7f] }
 0x13a   : > { %v1038_v42 = vadd.f32 %v1036_v5, %v1029_v27  ;;  %v1052_v39 = vld [vmem:[#allocation2 + $0xe] sm:$0xff]  ;;  %v1028_v27 = vmul.f32 %v1026_v22, %v1025_v23  ;;  %v1037_v5 = vmul.f32 %v1035_v7, %v1034_v34 }
 0x13b   : > { %v1055_v16 = vmul.f32 %v1053_v51, %v1052_v39 }
 0x13c   : > { %v1047_v0 = vadd.f32 %v1045_v50, %v1038_v42 }
 0x13d   : > { %1758 = vrot.lane.b32.xlu1 %v3782_v29, %s3083_s5  ;;  %1756 = vrot.lane.b32.xlu0 %v3799_v17, %s3083_s5 }
 0x13e   : > { %1760 = vrot.lane.b32.xlu2 %v3804_v48, %s3083_s5  ;;  %v1056_v10 = vadd.f32 %v1054_v15, %v1047_v0  ;;  %v1860_v0 = vsub.f32 %v2836_v3, %v3687_v47 }
 0x13f   : > { %v1088_v9 = vpop.permute.xlu1 %1087  ;;  %v1086_v37 = vpop.permute.xlu0 %1085 }
 0x140   : > { %v3921_v53 = vpop.permute.xlu2 %1132  ;;  %v3926_v58 = vsel %vm1097_vm5, %v1086_v37, %v1088_v9  ;;  %v1065_v32 = vadd.f32 %v1063_v55, %v1056_v10 }
 0x141   : > { %1104 = vst [vmem:[#allocation2] sm:$0xff] %v3926_v58  ;;  %v1148_v57 = vmul.f32 %v1147_v31, %v3926_v58 }
 0x143   : > { %v3933_v12 = vadd.f32 %v1148_v57, %v1065_v32 }
 0x145   : > { %1764 = vrot.lane.b32.xlu1 %v1745_v28, %s3083_s5  ;;  %1762 = vrot.lane.b32.xlu0 %v3824_v49, %s3083_s5  ;;  %v1064_v28 = vmul.f32 %v1062_v33, %v1061_v45 }
 0x146   : > { %1766 = vrot.lane.b32.xlu2 %v1746_v1, %s3083_s5  ;;  %s1152_s5 = sadd.s32 14, %s3313_s7 }
 0x147   : > { %v1094_v11 = vpop.permute.xlu1 %1093  ;;  %v1092_v44 = vpop.permute.xlu0 %1091  ;;  %s1153_s12 = sld [smem:[#allocation4 + %s1152_s5]]  ;;  %s1197_s5 = sadd.s32 54, %s3313_s7 }
 0x148   : > { %v3941_v35 = vsel %vm1097_vm5, %v1094_v11, %v3875_v46  ;;  %v3943_v13 = vpop.permute.xlu2 %1237  ;;  %v3947_v36 = vsel %vm1097_vm5, %v3838_v61, %v1092_v44  ;;  %v1030_v46 = vadd.f32 %v1028_v27, %v1021_v2  ;;  %v2835_v61 = vld [vmem:[%s3201_s29 + $0x50] sm:$0x7f]  ;;  %s4029_s11 = sld [smem:[#allocation4 + %s1197_s5]]  ;;  %s1327_s5 = sadd.s32 39, %s3313_s7 }
 0x149   : > { %1106 = vst [vmem:[#allocation2 + $0x10] sm:$0x7f] %v3941_v35  ;;  %v1859_v7 = vsub.f32 %v2835_v61, %v3687_v47  ;;  %v1149_v1 = vmul.f32 %v1147_v31, %v3947_v36 }
 0x14a   : > { %1105 = vst [vmem:[#allocation2 + $0x8] sm:$0xff] %v3947_v36  ;;  %v1039_v62 = vadd.f32 %v1037_v5, %v1030_v46 }
 0x14b   : > { %v1892_v27 = vmul.f32 %v1859_v7, %v1859_v7 }
 0x14c   : > { %v1048_v15 = vadd.f32 %v1046_v63, %v1039_v62  ;;  %v1893_v62 = vmul.f32 %v1860_v0, %v1860_v0 }
 0x14d   : > { %1869 = vrot.lane.b32.xlu1 %v3706_v18, %s3084_s6  ;;  %1867 = vrot.lane.b32.xlu0 %v3723_v40, %s3084_s6  ;;  %v1156_v51 = vstv %s1153_s12  ;;  %s1206_s12 = sadd.s32 62, %s3313_s7 }
 0x14e   : > { %1871 = vrot.lane.b32.xlu2 %v3726_v24, %s3084_s6  ;;  %v1057_v25 = vadd.f32 %v1055_v16, %v1048_v15  ;;  %v1174_v15 = vstv %s3995_s27  ;;  %s4050_s27 = sld [smem:[#allocation4 + %s1291_s8]]  ;;  %s1336_s8 = sadd.s32 47, %s3313_s7 }
 0x14f   : > { %v3963_v22 = vpop.permute.xlu1 %1124  ;;  %v3966_v42 = vpop.permute.xlu0 %1122 }
 0x150   : > { %v3968_v50 = vpop.permute.xlu2 %1243  ;;  %v1066_v20 = vadd.f32 %v1064_v28, %v1057_v25 }
 0x151   : > { %v1154_v37 = vld [vmem:[#allocation2 + $0x1] sm:$0xff]  ;;  %v1155_v55 = vld [vmem:[#allocation2 + $0x9] sm:$0xff] }
 0x152   : > { %v1157_v32 = vmul.f32 %v1156_v51, %v1154_v37  ;;  %v1158_v57 = vmul.f32 %v1156_v51, %v1155_v55  ;;  %v1151_v8 = vadd.f32 %v1149_v1, %v1066_v20  ;;  %v1163_v33 = vld [vmem:[#allocation2 + $0x2] sm:$0xff]  ;;  %v1164_v31 = vld [vmem:[#allocation2 + $0xa] sm:$0xff]  ;;  %v1183_v55 = vstv %s4005_s28  ;;  %s4056_s28 = sld [smem:[#allocation4 + %s1300_s22]]  ;;  %s4089_s22 = sadd.s32 64, %s3313_s7 }
 0x153   : > { %v1172_v52 = vld [vmem:[#allocation2 + $0x3] sm:$0xff]  ;;  %v1166_v46 = vmul.f32 %v1165_v21, %v1163_v33  ;;  %v1167_v5 = vmul.f32 %v1165_v21, %v1164_v31  ;;  %v1173_v63 = vld [vmem:[#allocation2 + $0xb] sm:$0xff]  ;;  %s1519_s13 = sadd.s32 32, %s4089_s22  ;;  %s1657_s9 = sadd.s32 25, %s4089_s22 }
 0x154   : > { %v1159_v11 = vadd.f32 %v1157_v32, %v3933_v12  ;;  %v1160_v2 = vadd.f32 %v1158_v57, %v1151_v8  ;;  %v1181_v39 = vld [vmem:[#allocation2 + $0x4] sm:$0xff]  ;;  %v1176_v37 = vmul.f32 %v1174_v15, %v1173_v63  ;;  %v1191_v8 = vld [vmem:[#allocation2 + $0xd] sm:$0xff]  ;;  %s1684_s0 = sadd.s32 49, %s4089_s22 }
 0x155   : > { %1875 = vrot.lane.b32.xlu1 %v1859_v7, %s3084_s6  ;;  %1873 = vrot.lane.b32.xlu0 %v3762_v30, %s3084_s6  ;;  %v1190_v61 = vld [vmem:[#allocation2 + $0x5] sm:$0xff]  ;;  %v1175_v7 = vmul.f32 %v1174_v15, %v1172_v52  ;;  %v1200_v33 = vld [vmem:[#allocation2 + $0xe] sm:$0xff]  ;;  %v988_v52 = vsel %vm949_vm4, %v3894_v6, %v3815_v4  ;;  %v1201_v4 = vstv %s4029_s11  ;;  %s1345_s11 = sadd.s32 55, %s3313_s7 }
 0x156   : > { %1877 = vrot.lane.b32.xlu2 %v1860_v0, %s3084_s6  ;;  %v4014_v3 = vld [vmem:[#allocation2 + $0x6] sm:$0xff]  ;;  %v1168_v16 = vadd.f32 %v1166_v46, %v1159_v11  ;;  %v1169_v25 = vadd.f32 %v1167_v5, %v1160_v2  ;;  %v4040_v31 = vld [vmem:[#allocation2 + $0xf] sm:$0xff]  ;;  %v986_v2 = vsel %vm949_vm4, %v3873_v60, %v3867_v56 }
 0x157   : > { %v3983_v10 = vpop.permute.xlu1 %1130  ;;  %v3986_v9 = vpop.permute.xlu0 %1128  ;;  %v4016_v12 = vld [vmem:[#allocation2 + $0x7] sm:$0xff]  ;;  %v2841_v46 = vld [vmem:[%s3201_s29 + $0x50] sm:$0x7f] }
 0x158   : > { %v3988_v41 = vpop.permute.xlu2 %1274  ;;  %v1182_v0 = vld [vmem:[#allocation2 + $0xc] sm:$0xff]  ;;  %v1177_v28 = vadd.f32 %v1175_v7, %v1168_v16  ;;  %v1178_v1 = vadd.f32 %v1176_v37, %v1169_v25  ;;  %v4093_v7 = vsub.f32 %v2841_v46, %v3687_v47  ;;  %v1203_v37 = vmul.f32 %v1201_v4, %v1200_v33 }
 0x159   : > { %v1185_v11 = vmul.f32 %v1183_v55, %v1182_v0 }
 0x15d   : > { %1905 = vrot.lane.b32.xlu1 %v3782_v29, %s3084_s6  ;;  %1903 = vrot.lane.b32.xlu0 %v3799_v17, %s3084_s6 }
 0x15e   : > { %1907 = vrot.lane.b32.xlu2 %v3804_v48, %s3084_s6 }
 0x15f   : > { %v1236_v23 = vpop.permute.xlu1 %1235  ;;  %v1234_v34 = vpop.permute.xlu0 %1233 }
 0x160   : > { %v4009_v44 = vpop.permute.xlu2 %1280  ;;  %v4012_v45 = vsel %vm1245_vm6, %v1234_v34, %v1236_v23  ;;  %v1184_v23 = vmul.f32 %v1183_v55, %v1181_v39  ;;  %v1134_v39 = vsel %vm1097_vm5, %v3966_v42, %v3963_v22  ;;  %v2842_v22 = vld [vmem:[%s3201_s29 + $0x58] sm:$0x7f] }
 0x161   : > { %1252 = vst [vmem:[#allocation2] sm:$0xff] %v4012_v45 }
 0x162   : > { %v1186_v34 = vadd.f32 %v1184_v23, %v1177_v28  ;;  %v1295_v28 = vstv %s4050_s27  ;;  %s4128_s27 = sld [smem:[#allocation4 + %s1345_s11]] }
 0x165   : > { %1911 = vrot.lane.b32.xlu1 %v1892_v27, %s3084_s6  ;;  %1909 = vrot.lane.b32.xlu0 %v3824_v49, %s3084_s6  ;;  %v992_v27 = vadd.f32 %v986_v2, %v3752_v19  ;;  %v994_v19 = vadd.f32 %v988_v52, %v3792_v59  ;;  %v1202_v59 = vmul.f32 %v1201_v4, %v4014_v3 }
 0x166   : > { %1913 = vrot.lane.b32.xlu2 %v1893_v62, %s3084_s6  ;;  %s4038_s6 = sld [smem:[#allocation4 + %s1206_s12]] }
 0x167   : > { %v1242_v51 = vpop.permute.xlu1 %1241  ;;  %v1240_v32 = vpop.permute.xlu0 %1239  ;;  %s4078_s12 = sld [smem:[#allocation4 + %s1318_s30]]  ;;  %v1140_v62 = vadd.f32 %v1134_v39, %v992_v27  ;;  %s1354_s30 = sadd.s32 63, %s3313_s7  ;;  %v1135_v39 = vsel %vm1097_vm5, %v3899_v43, %v3986_v9 }
 0x168   : > { %v4034_v20 = vsel %vm1245_vm6, %v1242_v51, %v3968_v50  ;;  %v4036_v57 = vpop.permute.xlu2 %1577  ;;  %v4044_v21 = vsel %vm1245_vm6, %v3943_v13, %v1240_v32  ;;  %v1192_v50 = vstv %s4019_s23  ;;  %v1187_v13 = vadd.f32 %v1185_v11, %v1178_v1  ;;  %s4074_s23 = sld [smem:[#allocation4 + %s1309_s10]] }
 0x169   : > { %1254 = vst [vmem:[#allocation2 + $0x10] sm:$0x7f] %v4034_v20  ;;  %v1193_v56 = vmul.f32 %v1192_v50, %v1190_v61  ;;  %v1194_v60 = vmul.f32 %v1192_v50, %v1191_v8  ;;  %v1113_v61 = vadd.f32 %v3926_v58, %v3818_v38  ;;  %s4098_s10 = sld [smem:[#allocation4 + %s1327_s5]]  ;;  %v1115_v58 = vadd.f32 %v3941_v35, %v3842_v54  ;;  %s1492_s5 = sadd.s32 8, %s4089_s22 }
 0x16a   : > { %1253 = vst [vmem:[#allocation2 + $0x8] sm:$0xff] %v4044_v21  ;;  %v4105_v51 = vsub.f32 %v2842_v22, %v3687_v47  ;;  %v1114_v54 = vadd.f32 %v3947_v36, %v3849_v26  ;;  %v1136_v35 = vsel %vm1097_vm5, %v3983_v10, %v3921_v53  ;;  %v1304_v36 = vstv %s4056_s28  ;;  %s4145_s7 = sld [smem:[#allocation4 + %s4089_s22]] }
 0x16b   : > { %v1195_v42 = vadd.f32 %v1193_v56, %v1186_v34  ;;  %v1196_v5 = vadd.f32 %v1194_v60, %v1187_v13  ;;  %v4132_v34 = vadd.f32 %v4012_v45, %v1113_v61  ;;  %s4157_s28 = sld [smem:[#allocation4 + %s1354_s30]]  ;;  %v1142_v46 = vadd.f32 %v1136_v35, %v994_v19 }
 0x16c   : > { %v1210_v16 = vstv %s4038_s6  ;;  %s4114_s6 = sld [smem:[#allocation4 + %s1336_s8]]  ;;  %v4151_v56 = vadd.f32 %v4044_v21, %v1114_v54  ;;  %s1501_s8 = sadd.s32 16, %s4089_s22  ;;  %v1263_v43 = vadd.f32 %v4034_v20, %v1115_v58  ;;  %v1141_v20 = vadd.f32 %v1135_v39, %v3907_v14 }
 0x16d   : > { %2016 = vrot.lane.b32.xlu1 %v3706_v18, %s5011_s20  ;;  %2014 = vrot.lane.b32.xlu0 %v3723_v40, %s5011_s20  ;;  %v1204_v33 = vadd.f32 %v1202_v59, %v1195_v42  ;;  %v1205_v23 = vadd.f32 %v1203_v37, %v1196_v5  ;;  %v1211_v26 = vmul.f32 %v1210_v16, %v4016_v12  ;;  %s4170_s11 = sld [smem:[#allocation4 + %s1492_s5]]  ;;  %s1510_s5 = sadd.s32 24, %s4089_s22  ;;  %v1349_v35 = vstv %s4128_s27 }
 0x16e   : > { %2018 = vrot.lane.b32.xlu2 %v3726_v24, %s5011_s20  ;;  %v1212_v53 = vmul.f32 %v1210_v16, %v4040_v31  ;;  %v1296_v12 = vmul.f32 %v1295_v28, %v4012_v45  ;;  %v1297_v31 = vmul.f32 %v1295_v28, %v4044_v21  ;;  %s4178_s30 = sld [smem:[#allocation4 + %s1501_s8]]  ;;  %v1313_v16 = vstv %s4074_s23  ;;  %s1528_s8 = sadd.s32 40, %s4089_s22 }
 0x16f   : > { %v1273_v6 = vpop.permute.xlu1 %1272  ;;  %v1271_v63 = vpop.permute.xlu0 %1270  ;;  %v1213_v45 = vadd.f32 %v1211_v26, %v1204_v33  ;;  %s4200_s23 = sld [smem:[#allocation4 + %s1510_s5]]  ;;  %s1546_s27 = sadd.s32 56, %s4089_s22 }
 0x170   : > { %v4084_v15 = vpop.permute.xlu2 %1583  ;;  %v1282_v25 = vsel %vm1245_vm6, %v1271_v63, %v1273_v6  ;;  %v1214_v21 = vadd.f32 %v1212_v53, %v1205_v23  ;;  %v1489_v58 = vstv %s4145_s7  ;;  %s5024_s7 = smov 123   ;;  %s1630_s5 = sadd.s32 1, %s4089_s22 }
 0x171   : > { %v1302_v0 = vld [vmem:[#allocation2 + $0x1] sm:$0xff]  ;;  %v4102_v55 = vadd.f32 %v1282_v25, %v1140_v62  ;;  %v1303_v1 = vld [vmem:[#allocation2 + $0x9] sm:$0xff]  ;;  %v1298_v62 = vadd.f32 %v1296_v12, %v1213_v45  ;;  %v1358_v26 = vstv %s4157_s28  ;;  %s4281_s28 = sld [smem:[#allocation4 + %s1546_s27]]  ;;  %s1648_s27 = sadd.s32 17, %s4089_s22 }
 0x172   : > { %v4096_v38 = vld [vmem:[#allocation2 + $0x2] sm:$0xff]  ;;  %v4108_v32 = vld [vmem:[#allocation2 + $0xa] sm:$0xff]  ;;  %v1305_v4 = vmul.f32 %v1304_v36, %v1302_v0  ;;  %v1306_v6 = vmul.f32 %v1304_v36, %v1303_v1  ;;  %v1299_v14 = vadd.f32 %v1297_v31, %v1214_v21  ;;  %v1322_v0 = vstv %s4078_s12  ;;  %s4214_s12 = sld [smem:[#allocation4 + %s1519_s13]] }
 0x173   : > { %v4110_v3 = vld [vmem:[#allocation2 + $0x3] sm:$0xff]  ;;  %v4112_v8 = vld [vmem:[#allocation2 + $0xb] sm:$0xff]  ;;  %1366 = vst [vmem:[#allocation3] sm:$0xff] %v4102_v55  ;;  %v1314_v28 = vmul.f32 %v1313_v16, %v4096_v38  ;;  %v1315_v1 = vmul.f32 %v1313_v16, %v4108_v32  ;;  %v1340_v54 = vstv %s4114_s6  ;;  %v1496_v36 = vstv %s4170_s11  ;;  %s4223_s6 = sld [smem:[#allocation4 + %s1528_s8]] }
 0x174   : > { %v4122_v11 = vld [vmem:[#allocation2 + $0x4] sm:$0xff]  ;;  %v4124_v50 = vld [vmem:[#allocation2 + $0xc] sm:$0xff]  ;;  %v1307_v59 = vadd.f32 %v1305_v4, %v1298_v62  ;;  %v1308_v37 = vadd.f32 %v1306_v6, %v1299_v14  ;;  %v4221_v21 = vmul.f32 %v3723_v40, %v1489_v58  ;;  %v1505_v62 = vstv %s4178_s30  ;;  %s4309_s8 = sld [smem:[#allocation7 + %s3193_s14]]  ;;  %s1666_s30 = sadd.s32 33, %s4089_s22 }
 0x175   : > { %v4126_v2 = vld [vmem:[#allocation2 + $0x5] sm:$0xff]  ;;  %v4138_v10 = vld [vmem:[#allocation2 + $0xd] sm:$0xff]  ;;  %2022 = vrot.lane.b32.xlu1 %v4093_v7, %s5011_s20  ;;  %2020 = vrot.lane.b32.xlu0 %v3762_v30, %s5011_s20  ;;  %v1324_v14 = vmul.f32 %v1322_v0, %v4112_v8 }
 0x176   : > { %v4140_v13 = vld [vmem:[#allocation2 + $0x6] sm:$0xff]  ;;  %v4142_v52 = vld [vmem:[#allocation2 + $0xe] sm:$0xff]  ;;  %2024 = vrot.lane.b32.xlu2 %v4105_v51, %s5011_s20  ;;  %v1316_v12 = vadd.f32 %v1314_v28, %v1307_v59  ;;  %v1317_v31 = vadd.f32 %v1315_v1, %v1308_v37 }
 0x177   : > { %v4159_v60 = vld [vmem:[#allocation2 + $0x7] sm:$0xff]  ;;  %v4161_v27 = vld [vmem:[#allocation2 + $0xf] sm:$0xff]  ;;  %v1279_v9 = vpop.permute.xlu1 %1278  ;;  %v1277_v42 = vpop.permute.xlu0 %1276  ;;  %v4247_v28 = vmul.f32 %v1349_v35, %v4140_v13 }
 0x178   : > { %1363 = vst [vmem:[#allocation2] sm:$0xff] %v4132_v34  ;;  %v1284_v22 = vsel %vm1245_vm6, %v1279_v9, %v4009_v44  ;;  %v4176_v5 = vpop.permute.xlu2 %1613  ;;  %v1283_v61 = vsel %vm1245_vm6, %v3988_v41, %v1277_v42  ;;  %v2818_v44 = vld [vmem:[%s3201_s29 + $0x50] sm:$0x7f]  ;;  %v1331_v41 = vstv %s4098_s10  ;;  %s1537_s10 = sadd.s32 48, %s4089_s22 }
 0x179   : > { %1364 = vst [vmem:[#allocation2 + $0x8] sm:$0xff] %v4151_v56  ;;  %v1290_v19 = vadd.f32 %v1284_v22, %v1142_v46  ;;  %v4182_v63 = vadd.f32 %v1283_v61, %v1141_v20  ;;  %v2847_v25 = vld [vmem:[%s3201_s29 + $0x50] sm:$0x7f]  ;;  %v4205_v33 = vsub.f32 %v2818_v44, %v3687_v47  ;;  %v1323_v20 = vmul.f32 %v1322_v0, %v4110_v3  ;;  %s4238_s13 = sld [smem:[#allocation4 + %s1537_s10]]  ;;  %s1639_s10 = sadd.s32 9, %s4089_s22 }
 0x17a   : > { %1365 = vst [vmem:[#allocation2 + $0x10] sm:$0x7f] %v1263_v43  ;;  %v4208_v23 = vsub.f32 %v2847_v25, %v3687_v47  ;;  %v1332_v16 = vmul.f32 %v1331_v41, %v4122_v11  ;;  %v1333_v44 = vmul.f32 %v1331_v41, %v4124_v50  ;;  %s4338_s11 = sld [smem:[#allocation4 + %s1639_s10]] }
 0x17b   : > { %1368 = vst [vmem:[#allocation3 + $0x10] sm:$0x7f] %v1290_v19  ;;  %v1325_v1 = vadd.f32 %v1323_v20, %v1316_v12  ;;  %v1514_v12 = vstv %s4200_s23  ;;  %s4359_s10 = sld [smem:[#allocation4 + %s1657_s9]]  ;;  %s1693_s23 = sadd.s32 57, %s4089_s22 }
 0x17c   : > { %1367 = vst [vmem:[#allocation3 + $0x8] sm:$0xff] %v4182_v63  ;;  %s4370_s9 = sld [smem:[#allocation4 + %s1666_s30]] }
 0x17d   : > { %2052 = vrot.lane.b32.xlu1 %v3782_v29, %s5011_s20  ;;  %2050 = vrot.lane.b32.xlu0 %v3799_v17, %s5011_s20 }
 0x17e   : > { %2054 = vrot.lane.b32.xlu2 %v3804_v48, %s5011_s20  ;;  %s4331_s20 = sld [smem:[#allocation4 + %s1630_s5]] }
 0x17f   : > { %v4217_v39 = vpop.permute.xlu1 %1575  ;;  %v4225_v4 = vpop.permute.xlu0 %1573  ;;  %s4345_s5 = sld [smem:[#allocation4 + %s1648_s27]]  ;;  %s1675_s27 = sadd.s32 41, %s4089_s22 }
 0x180   : > { %v1373_v38 = vld [vmem:[#allocation2 + $0x1] sm:$0xff]  ;;  %v4227_v6 = vpop.permute.xlu2 %1619  ;;  %s4377_s1 = sld [smem:[#allocation4 + %s1675_s27]] }
 0x181   : > { %v1381_v53 = vld [vmem:[#allocation2 + $0x2] sm:$0xff]  ;;  %v1375_v43 = vadd.f32 %v1373_v38, %v4132_v34  ;;  %v1382_v9 = vld [vmem:[#allocation2 + $0xa] sm:$0xff]  ;;  %v4232_v34 = vmul.f32 %v3726_v24, %v1489_v58  ;;  %v4244_v58 = vmul.f32 %v1340_v54, %v4138_v10  ;;  %v1326_v38 = vadd.f32 %v1324_v14, %v1317_v31 }
 0x182   : > { %v1389_v32 = vld [vmem:[#allocation2 + $0x3] sm:$0xff]  ;;  %v1390_v45 = vld [vmem:[#allocation2 + $0xb] sm:$0xff] }
 0x183   : > { %v1374_v46 = vld [vmem:[#allocation2 + $0x9] sm:$0xff]  ;;  %v1383_v25 = vadd.f32 %v1381_v53, %v1375_v43  ;;  %v1377_v0 = vld [vmem:[#allocation3 + $0x1] sm:$0xff]  ;;  %v1378_v41 = vld [vmem:[#allocation3 + $0x9] sm:$0xff]  ;;  %v4254_v53 = vmul.f32 %v1349_v35, %v4142_v52  ;;  %v1335_v14 = vadd.f32 %v1333_v44, %v1326_v38 }
 0x184   : > { %v1376_v22 = vadd.f32 %v1374_v46, %v4151_v56  ;;  %v1397_v42 = vld [vmem:[#allocation2 + $0x4] sm:$0xff]  ;;  %v1398_v19 = vld [vmem:[#allocation2 + $0xc] sm:$0xff]  ;;  %v4241_v56 = vmul.f32 %v1340_v54, %v4126_v2  ;;  %v1379_v10 = vadd.f32 %v1377_v0, %v4102_v55  ;;  %v1380_v13 = vadd.f32 %v1378_v41, %v4182_v63  ;;  %v1385_v52 = vld [vmem:[#allocation3 + $0x2] sm:$0xff] }
 0x185   : > { %v1405_v61 = vld [vmem:[#allocation2 + $0x5] sm:$0xff]  ;;  %v1406_v59 = vld [vmem:[#allocation2 + $0xd] sm:$0xff]  ;;  %v1391_v2 = vadd.f32 %v1389_v32, %v1383_v25  ;;  %v4262_v54 = vmul.f32 %v4205_v33, %v4205_v33  ;;  %2163 = vrot.lane.b32.xlu1 %v3706_v18, %s5024_s7  ;;  %v4268_v32 = vmul.f32 %v1358_v26, %v4159_v60  ;;  %v4271_v55 = vmul.f32 %v1358_v26, %v4161_v27  ;;  %v1393_v27 = vld [vmem:[#allocation3 + $0x3] sm:$0xff] }
 0x186   : > { %v1413_v37 = vld [vmem:[#allocation2 + $0x6] sm:$0xff]  ;;  %v1414_v3 = vld [vmem:[#allocation2 + $0xe] sm:$0xff]  ;;  %v1384_v8 = vadd.f32 %v1382_v9, %v1376_v22  ;;  %v1387_v31 = vadd.f32 %v1385_v52, %v1379_v10  ;;  %2161 = vrot.lane.b32.xlu0 %v3723_v40, %s5024_s7  ;;  %2165 = vrot.lane.b32.xlu2 %v3726_v24, %s5024_s7  ;;  %v2848_v22 = vld [vmem:[%s3201_s29 + $0x58] sm:$0x7f] }
 0x187   : > { %v4249_v11 = vld [vmem:[#allocation2 + $0x7] sm:$0xff]  ;;  %v4251_v50 = vld [vmem:[#allocation2 + $0xf] sm:$0xff]  ;;  %v1399_v63 = vadd.f32 %v1397_v42, %v1391_v2  ;;  %v1582_v20 = vpop.permute.xlu1 %1581  ;;  %v1334_v42 = vadd.f32 %v1332_v16, %v1325_v1  ;;  %v1541_v1 = vstv %s4238_s13  ;;  %s5028_s13 = smov 121  }
 0x188   : > { %1480 = vst [vmem:[#allocation2] sm:$0xff] %v3723_v40  ;;  %v1392_v46 = vadd.f32 %v1390_v45, %v1384_v8  ;;  %v1386_v35 = vld [vmem:[#allocation3 + $0xa] sm:$0xff]  ;;  %v2853_v9 = vld [vmem:[%s3201_s29 + $0x50] sm:$0x7f]  ;;  %v1523_v45 = vstv %s4214_s12  ;;  %v1532_v8 = vstv %s4223_s6  ;;  %v1395_v0 = vadd.f32 %v1393_v27, %v1387_v31  ;;  %v4289_v10 = vpop.permute.xlu2 %1724  ;;  %s4386_s12 = sld [smem:[#allocation4 + %s1684_s0]] }
 0x189   : > { %1481 = vst [vmem:[#allocation2 + $0x8] sm:$0xff] %v3726_v24  ;;  %v1388_v43 = vadd.f32 %v1386_v35, %v1380_v13  ;;  %v1394_v26 = vld [vmem:[#allocation3 + $0xb] sm:$0xff]  ;;  %v1407_v25 = vadd.f32 %v1405_v61, %v1399_v63  ;;  %v4287_v2 = vsel %vm357_vm0, %v1582_v20, %v4084_v15  ;;  %v4296_v61 = vsub.f32 %v2853_v9, %v3687_v47  ;;  %s4399_s6 = sld [smem:[#allocation4 + %s1693_s23]] }
 0x18a   : > { %1482 = vst [vmem:[#allocation2 + $0x10] sm:$0x7f] %v4205_v33  ;;  %v1400_v60 = vadd.f32 %v1398_v19, %v1392_v46  ;;  %v1580_v19 = vpop.permute.xlu0 %1579  ;;  %v1401_v46 = vld [vmem:[#allocation3 + $0x4] sm:$0xff]  ;;  %v1402_v52 = vld [vmem:[#allocation3 + $0xc] sm:$0xff]  ;;  %v4293_v16 = vadd.f32 %v4287_v2, %v4205_v33  ;;  %v4300_v31 = vsub.f32 %v2848_v22, %v3687_v47  ;;  %v4306_v33 = vsel %vm357_vm0, %v4225_v4, %v4217_v39 }
 0x18b   : > { %v1396_v41 = vadd.f32 %v1394_v26, %v1388_v43  ;;  %v1415_v44 = vadd.f32 %v1413_v37, %v1407_v25  ;;  %v1403_v38 = vadd.f32 %v1401_v46, %v1395_v0  ;;  %v1409_v35 = vld [vmem:[#allocation3 + $0x5] sm:$0xff]  ;;  %v1410_v63 = vld [vmem:[#allocation3 + $0xd] sm:$0xff]  ;;  %v1343_v37 = vadd.f32 %v4241_v56, %v1334_v42 }
 0x18c   : > { %v1408_v13 = vadd.f32 %v1406_v59, %v1400_v60  ;;  %v1417_v43 = vld [vmem:[#allocation3 + $0x6] sm:$0xff]  ;;  %v1418_v60 = vld [vmem:[#allocation3 + $0xe] sm:$0xff]  ;;  %v4313_v9 = vadd.f32 %v4244_v58, %v1335_v14  ;;  %v4323_v58 = vsel %vm357_vm0, %v4036_v57, %v1580_v19 }
 0x18d   : > { %v1404_v15 = vadd.f32 %v1402_v52, %v1396_v41  ;;  %v1423_v27 = vadd.f32 %v4249_v11, %v1415_v44  ;;  %v1411_v20 = vadd.f32 %v1409_v35, %v1403_v38  ;;  %v1425_v56 = vld [vmem:[#allocation3 + $0x7] sm:$0xff]  ;;  %2169 = vrot.lane.b32.xlu1 %v4208_v23, %s5024_s7  ;;  %v1426_v35 = vld [vmem:[#allocation3 + $0xf] sm:$0xff] }
 0x18e   : > { %v1416_v59 = vadd.f32 %v1414_v3, %v1408_v13  ;;  %2167 = vrot.lane.b32.xlu0 %v3762_v30, %s5024_s7  ;;  %2171 = vrot.lane.b32.xlu2 %v4300_v31, %s5024_s7 }
 0x18f   : > { %v1412_v22 = vadd.f32 %v1410_v63, %v1404_v15  ;;  %v1429_v11 = vmul.f32 %v1423_v27, %v1423_v27  ;;  %v1419_v57 = vadd.f32 %v1417_v43, %v1411_v20  ;;  %v1612_v63 = vpop.permute.xlu1 %1611 }
 0x190   : > { %v1494_v3 = vld [vmem:[#allocation2 + $0x1] sm:$0xff]  ;;  %v1424_v25 = vadd.f32 %v4251_v50, %v1416_v59 }
 0x191   : > { %v1503_v26 = vld [vmem:[#allocation2 + $0x2] sm:$0xff]  ;;  %v1497_v4 = vmul.f32 %v1496_v36, %v1494_v3  ;;  %v1504_v0 = vld [vmem:[#allocation2 + $0xa] sm:$0xff]  ;;  %v1420_v19 = vadd.f32 %v1418_v60, %v1412_v22  ;;  %v1431_v59 = vmul.f32 0.015625, %v1429_v11  ;;  %v4347_v22 = vpop.permute.xlu2 %1730 }
 0x192   : > { %v1495_v39 = vld [vmem:[#allocation2 + $0x9] sm:$0xff]  ;;  %v1506_v50 = vmul.f32 %v1505_v62, %v1503_v26  ;;  %v1430_v52 = vmul.f32 %v1424_v25, %v1424_v25  ;;  %v1507_v43 = vmul.f32 %v1505_v62, %v1504_v0  ;;  %v1610_v20 = vpop.permute.xlu0 %1609  ;;  %v1427_v25 = vadd.f32 %v1425_v56, %v1419_v57 }
 0x193   : > { %v1512_v41 = vld [vmem:[#allocation2 + $0x3] sm:$0xff]  ;;  %v1498_v42 = vmul.f32 %v1496_v36, %v1495_v39  ;;  %v1513_v14 = vld [vmem:[#allocation2 + $0xb] sm:$0xff]  ;;  %v1499_v27 = vadd.f32 %v1497_v4, %v4221_v21  ;;  %v1428_v39 = vadd.f32 %v1426_v35, %v1420_v19 }
 0x194   : > { %v1521_v13 = vld [vmem:[#allocation2 + $0x4] sm:$0xff]  ;;  %v1531_v44 = vld [vmem:[#allocation2 + $0xd] sm:$0xff]  ;;  %v1432_v15 = vmul.f32 0.015625, %v1430_v52  ;;  %v1515_v11 = vmul.f32 %v1514_v12, %v1512_v41  ;;  %v1516_v0 = vmul.f32 %v1514_v12, %v1513_v14  ;;  %v1352_v41 = vadd.f32 %v4247_v28, %v1343_v37 }
 0x195   : > { %v1530_v46 = vld [vmem:[#allocation2 + $0x5] sm:$0xff]  ;;  %v1540_v38 = vld [vmem:[#allocation2 + $0xe] sm:$0xff]  ;;  %v1500_v3 = vadd.f32 %v1498_v42, %v4232_v34  ;;  %v4354_v34 = vsel %vm357_vm0, %v1610_v20, %v1612_v63  ;;  %v1508_v62 = vadd.f32 %v1506_v50, %v1499_v27  ;;  %v1433_v56 = vsub.f32 %v1427_v25, %v1431_v59  ;;  %2310 = vrot.lane.b32.xlu1 %v3706_v18, %s5025_s2 }
 0x196   : > { %v1539_v36 = vld [vmem:[#allocation2 + $0x6] sm:$0xff]  ;;  %v1549_v26 = vld [vmem:[#allocation2 + $0xf] sm:$0xff]  ;;  %v1434_v42 = vsub.f32 %v1428_v39, %v1432_v15  ;;  %v1524_v57 = vmul.f32 %v1523_v45, %v1521_v13  ;;  %v1437_v50 = vstv %s4309_s8  ;;  %v1533_v37 = vmul.f32 %v1532_v8, %v1530_v46  ;;  %s1777_s8 = sadd.s32 2, %s4089_s22  ;;  %2308 = vrot.lane.b32.xlu0 %v3723_v40, %s5025_s2  ;;  %2312 = vrot.lane.b32.xlu2 %v3726_v24, %s5025_s2 }
 0x197   : > { %v1548_v60 = vld [vmem:[#allocation2 + $0x7] sm:$0xff]  ;;  %v1509_v4 = vadd.f32 %v1507_v43, %v1500_v3  ;;  %v1517_v12 = vadd.f32 %v1515_v11, %v1508_v62  ;;  %v1435_v52 = vmax.f32 %v1433_v56, 0.0  ;;  %v1534_v13 = vmul.f32 %v1532_v8, %v1531_v44  ;;  %v1618_v44 = vpop.permute.xlu1 %1617  ;;  %s4404_s0 = sld [smem:[#allocation4 + %s1777_s8]] }
 0x198   : > { %v1522_v21 = vld [vmem:[#allocation2 + $0xc] sm:$0xff]  ;;  %1591 = vst [vmem:[#allocation2] sm:$0xff] %v4306_v33  ;;  %v1436_v28 = vmax.f32 %v1434_v42, 0.0  ;;  %v1542_v35 = vmul.f32 %v1541_v1, %v1539_v36  ;;  %v2854_v36 = vld [vmem:[%s3201_s29 + $0x58] sm:$0x7f]  ;;  %v1643_v27 = vstv %s4338_s11  ;;  %v1652_v3 = vstv %s4345_s5  ;;  %s1804_s5 = sadd.s32 26, %s4089_s22 }
 0x199   : > { %1592 = vst [vmem:[#allocation2 + $0x8] sm:$0xff] %v4323_v58  ;;  %v1518_v14 = vadd.f32 %v1516_v0, %v1509_v4  ;;  %v1525_v19 = vmul.f32 %v1523_v45, %v1522_v21  ;;  %v1353_v45 = vadd.f32 %v4254_v53, %v4313_v9  ;;  %v4392_v8 = vmul.f32 %v1437_v50, %v1435_v52  ;;  %v4408_v25 = vpop.permute.xlu2 %1760  ;;  %s4537_s27 = sld [smem:[#allocation4 + %s1804_s5]] }
 0x19a   : > { %1593 = vst [vmem:[#allocation2 + $0x10] sm:$0x7f] %v4287_v2  ;;  %v1526_v2 = vadd.f32 %v1524_v57, %v1517_v12  ;;  %v4394_v46 = vmul.f32 %v1437_v50, %v1436_v28  ;;  %v1543_v53 = vmul.f32 %v1541_v1, %v1540_v38  ;;  %v1634_v9 = vstv %s4331_s20  ;;  %v1616_v20 = vpop.permute.xlu0 %1615  ;;  %s1786_s20 = sadd.s32 10, %s4089_s22 }
 0x19b   : > { %v1527_v15 = vadd.f32 %v1525_v19, %v1518_v14  ;;  %v1623_v43 = vsel %vm357_vm0, %v1618_v44, %v4227_v6  ;;  %2954 = vrsqrt.f32 %v4392_v8  ;;  %v5026_v1 = vstv %s4281_s28  ;;  %s4500_s11 = sld [smem:[#allocation4 + %s1786_s20]]  ;;  %s1840_s20 = sadd.s32 58, %s4089_s22 }
 0x19c   : > { %v1535_v63 = vadd.f32 %v1533_v37, %v1526_v2  ;;  %v1551_v38 = vmul.f32 %v5026_v1, %v1548_v60  ;;  %v5027_v39 = vmov %v5026_v1  ;;  %v4416_v21 = vadd.f32 %v1623_v43, %v4262_v54  ;;  %v2859_v54 = vld [vmem:[%s3201_s29 + $0x50] sm:$0x7f] }
 0x19d   : > { %v1536_v59 = vadd.f32 %v1534_v13, %v1527_v15  ;;  %v1552_v11 = vmul.f32 %v5027_v39, %v1549_v26  ;;  %v4420_v62 = vsel %vm357_vm0, %v4176_v5, %v1616_v20  ;;  %2956 = vrsqrt.f32 %v4394_v46  ;;  %2316 = vrot.lane.b32.xlu1 %v4296_v61, %s5025_s2 }
 0x19e   : > { %v1661_v0 = vstv %s4359_s10  ;;  %v4425_v56 = vsub.f32 %v2854_v36, %v3687_v47  ;;  %v4428_v60 = vadd.f32 %v4268_v32, %v1352_v41  ;;  %v1544_v42 = vadd.f32 %v1542_v35, %v1535_v63  ;;  %2314 = vrot.lane.b32.xlu0 %v3762_v30, %s5025_s2  ;;  %s1813_s10 = sadd.s32 34, %s4089_s22 }
 0x19f   : > { %v1545_v26 = vadd.f32 %v1543_v53, %v1536_v59  ;;  %v4432_v57 = vadd.f32 %v4271_v55, %v1353_v45  ;;  %v1635_v5 = vmul.f32 %v1634_v9, %v4306_v33  ;;  %v1636_v50 = vmul.f32 %v1634_v9, %v4323_v58  ;;  %v1723_v36 = vpop.permute.xlu1 %1722  ;;  %s4549_s8 = sld [smem:[#allocation4 + %s1813_s10]]  ;;  %s1942_s10 = sadd.s32 19, %s4089_s22 }
 0x1a0   : > { %v1641_v6 = vld [vmem:[#allocation2 + $0x1] sm:$0xff]  ;;  %v1670_v12 = vstv %s4370_s9  ;;  %v1553_v14 = vadd.f32 %v1551_v38, %v1544_v42  ;;  %v1600_v41 = vadd.f32 %v4306_v33, %v3723_v40  ;;  %v4441_v37 = vadd.f32 %v4323_v58, %v3726_v24  ;;  %2318 = vrot.lane.b32.xlu2 %v4425_v56, %s5025_s2  ;;  %s1822_s9 = sadd.s32 42, %s4089_s22 }
 0x1a1   : > { %v1642_v4 = vld [vmem:[#allocation2 + $0x9] sm:$0xff]  ;;  %v1554_v19 = vadd.f32 %v1552_v11, %v1545_v26  ;;  %v1644_v52 = vmul.f32 %v1643_v27, %v1641_v6  ;;  %v1679_v13 = vstv %s4377_s1  ;;  %v1688_v45 = vstv %s4386_s12  ;;  %v4447_v2 = vpop.eup %2954  ;;  %v4463_v20 = vpop.permute.xlu2 %1766  ;;  %s230_s1 = sand.u32 1, %s3069_s16   ;;  %s1831_s12 = sadd.s32 50, %s4089_s22 }
 0x1a2   : > { %v1645_v28 = vmul.f32 %v1643_v27, %v1642_v4  ;;  %v1650_v32 = vld [vmem:[#allocation2 + $0x2] sm:$0xff]  ;;  %v1651_v55 = vld [vmem:[#allocation2 + $0xa] sm:$0xff]  ;;  %v4452_v15 = vsub.f32 %v2859_v54, %v3687_v47  ;;  %v1637_v33 = vadd.f32 %v1635_v5, %v1553_v14  ;;  %v1697_v9 = vstv %s4399_s6  ;;  %v1721_v43 = vpop.permute.xlu0 %1720  ;;  %s4493_s28 = sshll.u32 %s230_s1, 5  ;;  %s4558_s6 = sld [smem:[#allocation4 + %s1822_s9]] }
 0x1a3   : > { %v1638_v58 = vadd.f32 %v1636_v50, %v1554_v19  ;;  %v1659_v35 = vld [vmem:[#allocation2 + $0x3] sm:$0xff]  ;;  %v1660_v53 = vld [vmem:[#allocation2 + $0xb] sm:$0xff]  ;;  %v4457_v44 = vpop.eup %2956  ;;  %v1443_v63 = vmul.f32 %v4447_v2, %v4392_v8  ;;  %vm1448_vm7 = vweird.f32 %v4392_v8  ;;  %v1653_v59 = vmul.f32 %v1652_v3, %v1650_v32  ;;  %s4546_s23 = scalar_lea.vmem [#allocation10], %s4493_s28  ;;  %s5031_s28 = smov 124  }
 0x1a4   : > { %v1453_v1 = vmul.f32 %v4457_v44, %v4394_v46  ;;  %v1646_v38 = vadd.f32 %v1644_v52, %v1637_v33  ;;  %v1654_v11 = vmul.f32 %v1652_v3, %v1651_v55  ;;  %v1668_v6 = vld [vmem:[#allocation2 + $0x4] sm:$0xff]  ;;  %v1669_v4 = vld [vmem:[#allocation2 + $0xc] sm:$0xff]  ;;  %v1732_v42 = vsel %vm505_vm1, %v1721_v43, %v1723_v36  ;;  %s1951_s9 = sadd.s32 27, %s4089_s22 }
 0x1a5   : > { %v1647_v39 = vadd.f32 %v1645_v28, %v1638_v58  ;;  %v1444_v26 = vmul.f32 %v4447_v2, %v1443_v63  ;;  %v1662_v54 = vmul.f32 %v1661_v0, %v1659_v35  ;;  %v1663_v5 = vmul.f32 %v1661_v0, %v1660_v53  ;;  %v1677_v50 = vld [vmem:[#allocation2 + $0x5] sm:$0xff]  ;;  %v1678_v28 = vld [vmem:[#allocation2 + $0xd] sm:$0xff]  ;;  %v2860_v58 = vld [vmem:[%s3201_s29 + $0x58] sm:$0x7f]  ;;  %2457 = vrot.lane.b32.xlu1 %v3706_v18, %s5028_s13  ;;  %s1795_s29 = sadd.s32 18, %s4089_s22 }
 0x1a6   : > { %v1686_v14 = vld [vmem:[#allocation2 + $0x6] sm:$0xff]  ;;  %v4469_v32 = vadd.f32 %v1732_v42, %v1600_v41  ;;  %v1454_v27 = vmul.f32 %v4457_v44, %v1453_v1  ;;  %v1655_v52 = vadd.f32 %v1653_v59, %v1646_v38  ;;  %vm1440_vm8 = vcmp.gt.f32.partialorder %v4392_v8, 0.0  ;;  %v1687_v63 = vld [vmem:[#allocation2 + $0xe] sm:$0xff]  ;;  %2455 = vrot.lane.b32.xlu0 %v3723_v40, %s5028_s13  ;;  %s4524_s30 = sld [smem:[#allocation4 + %s1795_s29]]  ;;  %s1924_s29 = sadd.s32 3, %s4089_s22 }
 0x1a7   : > { %v1695_v19 = vld [vmem:[#allocation2 + $0x7] sm:$0xff]  ;;  %v1656_v3 = vadd.f32 %v1654_v11, %v1647_v39  ;;  %v1445_v55 = vmul.f32 0.5, %v1444_v26  ;;  %vm1458_vm9 = vweird.f32 %v4394_v46  ;;  %v1671_v0 = vmul.f32 %v1670_v12, %v1668_v6  ;;  %v1729_v18 = vpop.permute.xlu1 %1728  ;;  %s4587_s5 = sld [smem:[#allocation4 + %s1924_s29]] }
 0x1a8   : > { %1738 = vst [vmem:[#allocation2] sm:$0xff] %v1732_v42  ;;  %v1672_v33 = vmul.f32 %v1670_v12, %v1669_v4  ;;  %v1455_v35 = vmul.f32 0.5, %v1454_v27  ;;  %v1664_v41 = vadd.f32 %v1662_v54, %v1655_v52  ;;  %v1680_v36 = vmul.f32 %v1679_v13, %v1677_v50  ;;  %2459 = vrot.lane.b32.xlu2 %v3726_v24, %s5028_s13  ;;  %v1696_v54 = vld [vmem:[#allocation2 + $0xf] sm:$0xff] }
 0x1a9   : > { %v1665_v53 = vadd.f32 %v1663_v5, %v1656_v3  ;;  %v1446_v59 = vsub.f32 1.5, %v1445_v55  ;;  %vm1449_vm10 = vweird.f32 %v4447_v2  ;;  %v1681_v43 = vmul.f32 %v1679_v13, %v1678_v28  ;;  %v4504_v4 = vpop.permute.xlu2 %1871 }
 0x1aa   : > { %v1689_v12 = vmul.f32 %v1688_v45, %v1686_v14  ;;  %v1456_v27 = vsub.f32 1.5, %v1455_v35  ;;  %vm1459_vm11 = vweird.f32 %v4457_v44  ;;  %v1673_v1 = vadd.f32 %v1671_v0, %v1664_v41  ;;  %v1727_v6 = vpop.permute.xlu0 %1726  ;;  %vm1450_vm12 = vmor %vm1448_vm7, %vm1449_vm10 }
 0x1ab   : > { %v1674_v38 = vadd.f32 %v1672_v33, %v1665_v53  ;;  %v4489_v39 = vsub.f32 %v2860_v58, %v3687_v47  ;;  %v1447_v13 = vmul.f32 %v4447_v2, %v1446_v59  ;;  %v1690_v40 = vmul.f32 %v1688_v45, %v1687_v63  ;;  %vm1460_vm13 = vmor %vm1458_vm9, %vm1459_vm11 }
 0x1ac   : > { %v1698_v24 = vmul.f32 %v1697_v9, %v1695_v19  ;;  %v1734_v11 = vsel %vm505_vm1, %v1729_v18, %v4347_v22  ;;  %v1457_v47 = vmul.f32 %v4457_v44, %v1456_v27  ;;  %v1682_v26 = vadd.f32 %v1680_v36, %v1673_v1 }
 0x1ad   : > { %v1683_v45 = vadd.f32 %v1681_v43, %v1674_v38  ;;  %v4513_v5 = vadd.f32 %v1734_v11, %v4293_v16  ;;  %v1733_v22 = vsel %vm505_vm1, %v4289_v10, %v1727_v6  ;;  %v1451_v50 = vsel %vm1450_vm12, %v4447_v2, %v1447_v13  ;;  %1740 = vst [vmem:[#allocation2 + $0x10] sm:$0x7f] %v1734_v11 }
 0x1ae   : > { %v5029_v14 = vstv %s4404_s0  ;;  %v4527_v16 = vadd.f32 %v1733_v22, %v4441_v37  ;;  %v1461_v52 = vsel %vm1460_vm13, %v4457_v44, %v1457_v47  ;;  %v1462_v10 = vmul.f32 %v1451_v50, %v4428_v60  ;;  %1739 = vst [vmem:[#allocation2 + $0x8] sm:$0xff] %v1733_v22  ;;  %2463 = vrot.lane.b32.xlu1 %v4452_v15, %s5028_s13  ;;  %s4568_s0 = sld [smem:[#allocation4 + %s1831_s12]] }
 0x1af   : > { %v1782_v19 = vmul.f32 %v5029_v14, %v1732_v42  ;;  %v1691_v2 = vadd.f32 %v1689_v12, %v1682_v26  ;;  %v1463_v3 = vmul.f32 %v1461_v52, %v4432_v57  ;;  %v1692_v28 = vadd.f32 %v1690_v40, %v1683_v45  ;;  %2461 = vrot.lane.b32.xlu0 %v3762_v30, %s5028_s13  ;;  %s4643_s12 = sld [smem:[#allocation4 + %s1951_s9]] }
 0x1b0   : > { %v1699_v55 = vmul.f32 %v1697_v9, %v1696_v54  ;;  %v5030_v42 = vmov %v5029_v14  ;;  %vm1441_vm14 = vcmp.gt.f32.partialorder %v4394_v46, 0.0  ;;  %v1464_v37 = vsel %vm1440_vm8, %v1462_v10, 0.0  ;;  %2465 = vrot.lane.b32.xlu2 %v4489_v39, %s5028_s13  ;;  %v1759_v46 = vpop.permute.xlu1 %1758 }
 0x1b1   : > { %v1783_v0 = vmul.f32 %v5030_v42, %v1733_v22  ;;  %v1700_v60 = vadd.f32 %v1698_v24, %v1691_v2  ;;  %v1465_v57 = vsel %vm1441_vm14, %v1463_v3, 0.0  ;;  %1466 = vst [vmem:[%s4546_s23] sm:$0xff] %v1464_v37  ;;  %v1790_v33 = vstv %s4500_s11  ;;  %v4562_v41 = vpop.permute.xlu2 %1877  ;;  %s4579_s11 = sld [smem:[#allocation4 + %s1840_s20]]  ;;  %s1978_s20 = sadd.s32 51, %s4089_s22 }
 0x1b2   : > { %v1701_v9 = vadd.f32 %v1699_v55, %v1692_v28  ;;  %1467 = vst [vmem:[%s4546_s23 + $0x8] sm:$0xff] %v1465_v57  ;;  %v1627_v58 = vadd.f32 %v4354_v34, %v3799_v17  ;;  %v1757_v35 = vpop.permute.xlu0 %1756  ;;  %v2039_v30 = vmul.f32 %v4093_v7, %v4093_v7  ;;  %v1799_v43 = vstv %s4524_s30  ;;  %s1933_s30 = sadd.s32 11, %s4089_s22 }
 0x1b3   : > { %v1784_v8 = vadd.f32 %v1782_v19, %v1700_v60  ;;  %v1768_v53 = vsel %vm505_vm1, %v1757_v35, %v1759_v46  ;;  %v2040_v12 = vmul.f32 %v4105_v51, %v4105_v51  ;;  %v1808_v18 = vstv %s4537_s27  ;;  %s4625_s27 = sld [smem:[#allocation4 + %s1933_s30]] }
 0x1b4   : > { %v1785_v44 = vadd.f32 %v1783_v0, %v1701_v9  ;;  %v4572_v34 = vadd.f32 %v1768_v53, %v1627_v58  ;;  %v1817_v51 = vstv %s4549_s8  ;;  %v1628_v22 = vadd.f32 %v4420_v62, %v3804_v48  ;;  %s1960_s8 = sadd.s32 35, %s4089_s22 }
 0x1b5   : > { %v1788_v36 = vld [vmem:[#allocation2 + $0x1] sm:$0xff]  ;;  %v1789_v63 = vld [vmem:[#allocation2 + $0x9] sm:$0xff]  ;;  %v1826_v19 = vstv %s4558_s6  ;;  %v1835_v60 = vstv %s4568_s0  ;;  %s1969_s6 = sadd.s32 43, %s4089_s22  ;;  %s4648_s0 = sld [smem:[#allocation4 + %s1960_s8]] }
 0x1b6   : > { %v1797_v59 = vld [vmem:[#allocation2 + $0x2] sm:$0xff]  ;;  %v1791_v27 = vmul.f32 %v1790_v33, %v1788_v36  ;;  %v1792_v1 = vmul.f32 %v1790_v33, %v1789_v63  ;;  %v1798_v38 = vld [vmem:[#allocation2 + $0xa] sm:$0xff]  ;;  %2058 = vrot.lane.b32.xlu1 %v2039_v30, %s5031_s28  ;;  %v1928_v36 = vstv %s4587_s5  ;;  %s4656_s29 = sld [smem:[#allocation4 + %s1969_s6]]  ;;  %s2071_s5 = sadd.s32 4, %s4089_s22 }
 0x1b7   : > { %v1806_v7 = vld [vmem:[#allocation2 + $0x3] sm:$0xff]  ;;  %v1800_v24 = vmul.f32 %v1799_v43, %v1797_v59  ;;  %v1801_v11 = vmul.f32 %v1799_v43, %v1798_v38  ;;  %v1807_v6 = vld [vmem:[#allocation2 + $0xb] sm:$0xff]  ;;  %2056 = vrot.lane.b32.xlu0 %v3824_v49, %s5031_s28  ;;  %v1844_v35 = vstv %s4579_s11  ;;  %s1987_s11 = sadd.s32 59, %s4089_s22  ;;  %s2107_s8 = sadd.s32 36, %s4089_s22 }
 0x1b8   : > { %v1793_v13 = vadd.f32 %v1791_v27, %v1784_v8  ;;  %v1794_v40 = vadd.f32 %v1792_v1, %v1785_v44  ;;  %v1815_v47 = vld [vmem:[#allocation2 + $0x4] sm:$0xff]  ;;  %2060 = vrot.lane.b32.xlu2 %v2040_v12, %s5031_s28  ;;  %v1809_v54 = vmul.f32 %v1808_v18, %v1806_v7  ;;  %v1765_v50 = vpop.permute.xlu1 %1764  ;;  %v1810_v3 = vmul.f32 %v1808_v18, %v1807_v6  ;;  %v1816_v0 = vld [vmem:[#allocation2 + $0xc] sm:$0xff]  ;;  %s4664_s28 = sld [smem:[#allocation4 + %s1978_s20]]  ;;  %s2116_s6 = sadd.s32 44, %s4089_s22 }
 0x1b9   : > { %v1824_v14 = vld [vmem:[#allocation2 + $0x5] sm:$0xff]  ;;  %v1770_v52 = vsel %vm505_vm1, %v1765_v50, %v4463_v20  ;;  %v4591_v2 = vpop.permute.xlu2 %1907  ;;  %v1818_v55 = vmul.f32 %v1817_v51, %v1815_v47  ;;  %v1819_v46 = vmul.f32 %v1817_v51, %v1816_v0  ;;  %v2186_v27 = vmul.f32 %v4208_v23, %v4208_v23  ;;  %v1834_v7 = vld [vmem:[#allocation2 + $0xe] sm:$0xff]  ;;  %s4676_s30 = sld [smem:[#allocation4 + %s1987_s11]]  ;;  %s2125_s20 = sadd.s32 52, %s4089_s22 }
 0x1ba   : > { %v1802_v26 = vadd.f32 %v1800_v24, %v1793_v13  ;;  %v1803_v45 = vadd.f32 %v1801_v11, %v1794_v40  ;;  %v1763_v10 = vpop.permute.xlu0 %1762  ;;  %v4594_v42 = vadd.f32 %v1770_v52, %v4416_v21  ;;  %v1833_v37 = vld [vmem:[#allocation2 + $0x6] sm:$0xff]  ;;  %v1827_v8 = vmul.f32 %v1826_v19, %v1824_v14  ;;  %v1843_v23 = vld [vmem:[#allocation2 + $0xf] sm:$0xff]  ;;  %s4754_s11 = sld [smem:[#allocation4 + %s2125_s20]]  ;;  %s2272_s20 = sadd.s32 53, %s4089_s22 }
 0x1bb   : > { %v1769_v62 = vsel %vm505_vm1, %v4408_v25, %v1763_v10  ;;  %v1836_v33 = vmul.f32 %v1835_v60, %v1833_v37  ;;  %v1825_v21 = vld [vmem:[#allocation2 + $0xd] sm:$0xff]  ;;  %v2187_v1 = vmul.f32 %v4300_v31, %v4300_v31  ;;  %v1837_v11 = vmul.f32 %v1835_v60, %v1834_v7 }
 0x1bc   : > { %v1811_v28 = vadd.f32 %v1809_v54, %v1802_v26  ;;  %v4599_v57 = vadd.f32 %v1769_v62, %v1628_v22  ;;  %v1812_v20 = vadd.f32 %v1810_v3, %v1803_v45  ;;  %v1842_v58 = vld [vmem:[#allocation2 + $0x7] sm:$0xff]  ;;  %v1828_v43 = vmul.f32 %v1826_v19, %v1825_v21 }
 0x1bd   : > { %v1845_v12 = vmul.f32 %v1844_v35, %v1842_v58  ;;  %v1846_v45 = vmul.f32 %v1844_v35, %v1843_v23  ;;  %v2333_v10 = vmul.f32 %v4296_v61, %v4296_v61  ;;  %v2334_v37 = vmul.f32 %v4425_v56, %v4425_v56 }
 0x1be   : > { %v1820_v9 = vadd.f32 %v1818_v55, %v1811_v28  ;;  %2199 = vrot.lane.b32.xlu1 %v3782_v29, %s5024_s7  ;;  %v1821_v25 = vadd.f32 %v1819_v46, %v1812_v20  ;;  %v1955_v46 = vstv %s4643_s12  ;;  %v1982_v23 = vstv %s4664_s28  ;;  %s2134_s28 = sadd.s32 60, %s4089_s22 }
 0x1bf   : > { %2197 = vrot.lane.b32.xlu0 %v3799_v17, %s5024_s7 }
 0x1c0   : > { %v1829_v44 = vadd.f32 %v1827_v8, %v1820_v9  ;;  %2201 = vrot.lane.b32.xlu2 %v3804_v48, %s5024_s7  ;;  %v1870_v53 = vpop.permute.xlu1 %1869  ;;  %v1830_v13 = vadd.f32 %v1828_v43, %v1821_v25  ;;  %v1964_v25 = vstv %s4648_s0  ;;  %v1973_v43 = vstv %s4656_s29  ;;  %s4743_s0 = sld [smem:[#allocation4 + %s2107_s8]] }
 0x1c1   : > { %v4609_v59 = vpop.permute.xlu2 %1913  ;;  %s4747_s29 = sld [smem:[#allocation4 + %s2116_s6]] }
 0x1c2   : > { %v1838_v30 = vadd.f32 %v1836_v33, %v1829_v44  ;;  %v1868_v63 = vpop.permute.xlu0 %1867  ;;  %v1839_v31 = vadd.f32 %v1837_v11, %v1830_v13 }
 0x1c3   : > { %v1879_v38 = vsel %vm653_vm2, %v1868_v63, %v1870_v53 }
 0x1c4   : > { %v4617_v18 = vadd.f32 %v1879_v38, %v4469_v32  ;;  %v1847_v40 = vadd.f32 %v1845_v12, %v1838_v30  ;;  %1885 = vst [vmem:[#allocation2] sm:$0xff] %v1879_v38  ;;  %v1929_v24 = vmul.f32 %v1928_v36, %v1879_v38 }
 0x1c6   : > { %v1931_v6 = vadd.f32 %v1929_v24, %v1847_v40  ;;  %2205 = vrot.lane.b32.xlu1 %v2186_v27, %s5024_s7 }
 0x1c7   : > { %2203 = vrot.lane.b32.xlu0 %v3824_v49, %s5024_s7 }
 0x1c8   : > { %2207 = vrot.lane.b32.xlu2 %v2187_v1, %s5024_s7  ;;  %v1876_v32 = vpop.permute.xlu1 %1875  ;;  %s4637_s7 = sld [smem:[#allocation4 + %s1942_s10]] }
 0x1c9   : > { %v1881_v47 = vsel %vm653_vm2, %v1876_v32, %v4562_v41  ;;  %v4629_v26 = vpop.permute.xlu2 %2018  ;;  %v1848_v41 = vadd.f32 %v1846_v45, %v1839_v31  ;;  %s4682_s10 = sld [smem:[#allocation4 + %s2071_s5]]  ;;  %s2218_s5 = sadd.s32 5, %s4089_s22 }
 0x1ca   : > { %v1874_v51 = vpop.permute.xlu0 %1873  ;;  %v4633_v54 = vadd.f32 %v1881_v47, %v4513_v5  ;;  %1887 = vst [vmem:[#allocation2 + $0x10] sm:$0x7f] %v1881_v47  ;;  %v1937_v5 = vstv %s4625_s27  ;;  %s2089_s27 = sadd.s32 20, %s4089_s22 }
 0x1cb   : > { %v1880_v22 = vsel %vm653_vm2, %v4504_v4, %v1874_v51 }
 0x1cc   : > { %v4640_v50 = vadd.f32 %v1880_v22, %v4527_v16  ;;  %1886 = vst [vmem:[#allocation2 + $0x8] sm:$0xff] %v1880_v22  ;;  %v1930_v14 = vmul.f32 %v1928_v36, %v1880_v22 }
 0x1ce   : > { %v1932_v19 = vadd.f32 %v1930_v14, %v1848_v41  ;;  %2346 = vrot.lane.b32.xlu1 %v3782_v29, %s5025_s2  ;;  %v1946_v0 = vstv %s4637_s7  ;;  %v1991_v14 = vstv %s4676_s30  ;;  %s2098_s7 = sadd.s32 28, %s4089_s22  ;;  %s4761_s30 = sld [smem:[#allocation4 + %s2134_s28]] }
 0x1cf   : > { %2344 = vrot.lane.b32.xlu0 %v3799_v17, %s5025_s2  ;;  %s4740_s12 = sld [smem:[#allocation4 + %s2098_s7]]  ;;  %s2245_s7 = sadd.s32 29, %s4089_s22 }
 0x1d0   : > { %2348 = vrot.lane.b32.xlu2 %v3804_v48, %s5025_s2  ;;  %v1906_v4 = vpop.permute.xlu1 %1905  ;;  %s2281_s28 = sadd.s32 61, %s4089_s22 }
 0x1d1   : > { %v4658_v52 = vpop.permute.xlu2 %2024 }
 0x1d2   : > { %v1904_v16 = vpop.permute.xlu0 %1903 }
 0x1d3   : > { %v1915_v3 = vsel %vm653_vm2, %v1904_v16, %v1906_v4  ;;  %v1935_v28 = vld [vmem:[#allocation2 + $0x1] sm:$0xff]  ;;  %v1936_v55 = vld [vmem:[#allocation2 + $0x9] sm:$0xff]  ;;  %v2075_v4 = vstv %s4682_s10  ;;  %s4764_s10 = sld [smem:[#allocation4 + %s2218_s5]]  ;;  %s2365_s5 = sadd.s32 6, %s4089_s22 }
 0x1d4   : > { %v1944_v62 = vld [vmem:[#allocation2 + $0x2] sm:$0xff]  ;;  %v4669_v60 = vadd.f32 %v1915_v3, %v4572_v34  ;;  %v1938_v20 = vmul.f32 %v1937_v5, %v1935_v28  ;;  %v1939_v9 = vmul.f32 %v1937_v5, %v1936_v55  ;;  %v1945_v8 = vld [vmem:[#allocation2 + $0xa] sm:$0xff]  ;;  %v2481_v28 = vmul.f32 %v4489_v39, %v4489_v39 }
 0x1d5   : > { %v1953_v61 = vld [vmem:[#allocation2 + $0x3] sm:$0xff]  ;;  %v1947_v21 = vmul.f32 %v1946_v0, %v1944_v62  ;;  %v1948_v58 = vmul.f32 %v1946_v0, %v1945_v8  ;;  %v1954_v35 = vld [vmem:[#allocation2 + $0xb] sm:$0xff] }
 0x1d6   : > { %v1940_v44 = vadd.f32 %v1938_v20, %v1931_v6  ;;  %v1941_v33 = vadd.f32 %v1939_v9, %v1932_v19  ;;  %2352 = vrot.lane.b32.xlu1 %v2333_v10, %s5025_s2  ;;  %v1962_v56 = vld [vmem:[#allocation2 + $0x4] sm:$0xff]  ;;  %v1956_v53 = vmul.f32 %v1955_v46, %v1953_v61  ;;  %v1957_v38 = vmul.f32 %v1955_v46, %v1954_v35  ;;  %v1963_v11 = vld [vmem:[#allocation2 + $0xc] sm:$0xff] }
 0x1d7   : > { %2350 = vrot.lane.b32.xlu0 %v3824_v49, %s5025_s2  ;;  %v1971_v63 = vld [vmem:[#allocation2 + $0x5] sm:$0xff]  ;;  %v1965_v13 = vmul.f32 %v1964_v25, %v1962_v56  ;;  %v1966_v51 = vmul.f32 %v1964_v25, %v1963_v11 }
 0x1d8   : > { %2354 = vrot.lane.b32.xlu2 %v2334_v37, %s5025_s2  ;;  %v1949_v34 = vadd.f32 %v1947_v21, %v1940_v44  ;;  %v1950_v30 = vadd.f32 %v1948_v58, %v1941_v33  ;;  %v1912_v36 = vpop.permute.xlu1 %1911  ;;  %v1980_v6 = vld [vmem:[#allocation2 + $0x6] sm:$0xff]  ;;  %v1974_v47 = vmul.f32 %v1973_v43, %v1971_v63  ;;  %s2080_s2 = sadd.s32 12, %s4089_s22 }
 0x1d9   : > { %v1917_v12 = vsel %vm653_vm2, %v1912_v36, %v4609_v59  ;;  %v4686_v1 = vpop.permute.xlu2 %2054  ;;  %v1983_v22 = vmul.f32 %v1982_v23, %v1980_v6  ;;  %v1989_v41 = vld [vmem:[#allocation2 + $0x7] sm:$0xff]  ;;  %s4721_s9 = sld [smem:[#allocation4 + %s2080_s2]]  ;;  %s2227_s2 = sadd.s32 13, %s4089_s22 }
 0x1da   : > { %v1910_v27 = vpop.permute.xlu0 %1909  ;;  %v1958_v7 = vadd.f32 %v1956_v53, %v1949_v34  ;;  %v4689_v40 = vadd.f32 %v1917_v12, %v4594_v42  ;;  %v1959_v59 = vadd.f32 %v1957_v38, %v1950_v30  ;;  %v1972_v42 = vld [vmem:[#allocation2 + $0xd] sm:$0xff]  ;;  %v1992_v3 = vmul.f32 %v1991_v14, %v1989_v41 }
 0x1db   : > { %v1916_v24 = vsel %vm653_vm2, %v4591_v2, %v1910_v27  ;;  %v1975_v10 = vmul.f32 %v1973_v43, %v1972_v42 }
 0x1dc   : > { %v4695_v31 = vadd.f32 %v1916_v24, %v4599_v57  ;;  %v1967_v32 = vadd.f32 %v1965_v13, %v1958_v7  ;;  %v1968_v2 = vadd.f32 %v1966_v51, %v1959_v59  ;;  %v2102_v13 = vstv %s4740_s12  ;;  %s4796_s12 = sld [smem:[#allocation4 + %s2245_s7]]  ;;  %s2392_s7 = sadd.s32 30, %s4089_s22 }
 0x1de   : > { %v1976_v45 = vadd.f32 %v1974_v47, %v1967_v32  ;;  %2493 = vrot.lane.b32.xlu1 %v3782_v29, %s5028_s13  ;;  %v2480_v29 = vmul.f32 %v4452_v15, %v4452_v15  ;;  %v1977_v62 = vadd.f32 %v1975_v10, %v1968_v2  ;;  %v1990_v15 = vld [vmem:[#allocation2 + $0xf] sm:$0xff]  ;;  %v2111_v47 = vstv %s4743_s0  ;;  %s2263_s0 = sadd.s32 45, %s4089_s22 }
 0x1df   : > { %2491 = vrot.lane.b32.xlu0 %v3799_v17, %s5028_s13  ;;  %v1993_v44 = vmul.f32 %v1991_v14, %v1990_v15  ;;  %v2084_v58 = vstv %s4721_s9  ;;  %v2120_v2 = vstv %s4747_s29  ;;  %s4778_s9 = sld [smem:[#allocation4 + %s2227_s2]] }
 0x1e0   : > { %2495 = vrot.lane.b32.xlu2 %v3804_v48, %s5028_s13  ;;  %v1985_v57 = vadd.f32 %v1983_v22, %v1976_v45  ;;  %v2017_v19 = vpop.permute.xlu1 %2016  ;;  %v1981_v48 = vld [vmem:[#allocation2 + $0xe] sm:$0xff]  ;;  %s4805_s29 = sld [smem:[#allocation4 + %s2263_s0]] }
 0x1e1   : > { %v4705_v16 = vpop.permute.xlu2 %2165  ;;  %v1984_v20 = vmul.f32 %v1982_v23, %v1981_v48  ;;  %s4820_s2 = sld [smem:[#allocation4 + %s2365_s5]]  ;;  %s2512_s5 = sadd.s32 7, %s4089_s22 }
 0x1e2   : > { %v2015_v5 = vpop.permute.xlu0 %2014  ;;  %v1994_v0 = vadd.f32 %v1992_v3, %v1985_v57 }
 0x1e3   : > { %v2026_v17 = vsel %vm801_vm3, %v2015_v5, %v2017_v19  ;;  %v1986_v39 = vadd.f32 %v1984_v20, %v1977_v62 }
 0x1e4   : > { %v4713_v55 = vadd.f32 %v2026_v17, %v4617_v18  ;;  %2032 = vst [vmem:[#allocation2] sm:$0xff] %v2026_v17  ;;  %v2076_v37 = vmul.f32 %v2075_v4, %v2026_v17  ;;  %v2129_v17 = vstv %s4754_s11  ;;  %s4809_s11 = sld [smem:[#allocation4 + %s2272_s20]]  ;;  %s2419_s20 = sadd.s32 54, %s4089_s22 }
 0x1e5   : > { %v1995_v33 = vadd.f32 %v1993_v44, %v1986_v39  ;;  %v2138_v39 = vstv %s4761_s30  ;;  %s4817_s30 = sld [smem:[#allocation4 + %s2281_s28]]  ;;  %s2428_s28 = sadd.s32 62, %s4089_s22 }
 0x1e6   : > { %v2078_v9 = vadd.f32 %v2076_v37, %v1994_v0  ;;  %2499 = vrot.lane.b32.xlu1 %v2480_v29, %s5028_s13 }
 0x1e7   : > { %2497 = vrot.lane.b32.xlu0 %v3824_v49, %s5028_s13 }
 0x1e8   : > { %2501 = vrot.lane.b32.xlu2 %v2481_v28, %s5028_s13  ;;  %v2023_v18 = vpop.permute.xlu1 %2022  ;;  %s4735_s13 = sld [smem:[#allocation4 + %s2089_s27]]  ;;  %s2236_s27 = sadd.s32 21, %s4089_s22 }
 0x1e9   : > { %v4725_v8 = vsel %vm801_vm3, %v2023_v18, %v4658_v52  ;;  %v4727_v46 = vpop.permute.xlu2 %2171  ;;  %s4792_s8 = sld [smem:[#allocation4 + %s2236_s27]]  ;;  %s2383_s27 = sadd.s32 22, %s4089_s22 }
 0x1ea   : > { %v2021_v61 = vpop.permute.xlu0 %2020  ;;  %2034 = vst [vmem:[#allocation2 + $0x10] sm:$0x7f] %v4725_v8 }
 0x1eb   : > { %v4732_v49 = vsel %vm801_vm3, %v4629_v26, %v2021_v61 }
 0x1ec   : > { %2033 = vst [vmem:[#allocation2 + $0x8] sm:$0xff] %v4732_v49  ;;  %v2077_v52 = vmul.f32 %v2075_v4, %v4732_v49 }
 0x1ee   : > { %v2079_v21 = vadd.f32 %v2077_v52, %v1995_v33  ;;  %v2093_v36 = vstv %s4735_s13  ;;  %v2222_v52 = vstv %s4764_s10  ;;  %s2254_s13 = sadd.s32 37, %s4089_s22  ;;  %s2374_s10 = sadd.s32 14, %s4089_s22 }
 0x1ef   : > { %s4798_s6 = sld [smem:[#allocation4 + %s2254_s13]] }
 0x1f0   : > { %v2053_v26 = vpop.permute.xlu1 %2052  ;;  %s4840_s13 = sld [smem:[#allocation4 + %s2383_s27]]  ;;  %s2530_s27 = sadd.s32 23, %s4089_s22 }
 0x1f1   : > { %v4751_v25 = vpop.permute.xlu2 %2312 }
 0x1f2   : > { %v2051_v35 = vpop.permute.xlu0 %2050 }
 0x1f3   : > { %v2062_v56 = vsel %vm801_vm3, %v2051_v35, %v2053_v26  ;;  %v2082_v34 = vld [vmem:[#allocation2 + $0x1] sm:$0xff]  ;;  %v2083_v30 = vld [vmem:[#allocation2 + $0x9] sm:$0xff] }
 0x1f4   : > { %v2091_v53 = vld [vmem:[#allocation2 + $0x2] sm:$0xff]  ;;  %v4757_v63 = vadd.f32 %v2062_v56, %v4669_v60  ;;  %v2085_v43 = vmul.f32 %v2084_v58, %v2082_v34  ;;  %v2086_v12 = vmul.f32 %v2084_v58, %v2083_v30  ;;  %v2092_v27 = vld [vmem:[#allocation2 + $0xa] sm:$0xff] }
 0x1f5   : > { %v2100_v38 = vld [vmem:[#allocation2 + $0x3] sm:$0xff]  ;;  %v2101_v7 = vld [vmem:[#allocation2 + $0xb] sm:$0xff]  ;;  %v2094_v6 = vmul.f32 %v2093_v36, %v2091_v53  ;;  %v2095_v23 = vmul.f32 %v2093_v36, %v2092_v27 }
 0x1f6   : > { %v2087_v24 = vadd.f32 %v2085_v43, %v2078_v9  ;;  %v2088_v11 = vadd.f32 %v2086_v12, %v2079_v21  ;;  %v2109_v59 = vld [vmem:[#allocation2 + $0x4] sm:$0xff]  ;;  %v2110_v32 = vld [vmem:[#allocation2 + $0xc] sm:$0xff]  ;;  %v2103_v45 = vmul.f32 %v2102_v13, %v2100_v38  ;;  %v2104_v22 = vmul.f32 %v2102_v13, %v2101_v7 }
 0x1f7   : > { %v2118_v41 = vld [vmem:[#allocation2 + $0x5] sm:$0xff]  ;;  %v2119_v14 = vld [vmem:[#allocation2 + $0xd] sm:$0xff]  ;;  %v2112_v5 = vmul.f32 %v2111_v47, %v2109_v59  ;;  %v2113_v10 = vmul.f32 %v2111_v47, %v2110_v32  ;;  %v2231_v13 = vstv %s4778_s9  ;;  %v2240_v59 = vstv %s4792_s8  ;;  %s4827_s9 = sld [smem:[#allocation4 + %s2374_s10]]  ;;  %s2401_s8 = sadd.s32 38, %s4089_s22 }
 0x1f8   : > { %v2096_v60 = vadd.f32 %v2094_v6, %v2087_v24  ;;  %v2097_v51 = vadd.f32 %v2095_v23, %v2088_v11  ;;  %v2164_v42 = vpop.permute.xlu1 %2163  ;;  %v2127_v29 = vld [vmem:[#allocation2 + $0x6] sm:$0xff]  ;;  %v2128_v28 = vld [vmem:[#allocation2 + $0xe] sm:$0xff]  ;;  %v2121_v37 = vmul.f32 %v2120_v2, %v2118_v41  ;;  %v2122_v20 = vmul.f32 %v2120_v2, %v2119_v14  ;;  %s4849_s0 = sld [smem:[#allocation4 + %s2401_s8]]  ;;  %s2521_s10 = sadd.s32 15, %s4089_s22 }
 0x1f9   : > { %v2136_v48 = vld [vmem:[#allocation2 + $0x7] sm:$0xff]  ;;  %v2137_v15 = vld [vmem:[#allocation2 + $0xf] sm:$0xff]  ;;  %v2130_v44 = vmul.f32 %v2129_v17, %v2127_v29  ;;  %v2131_v33 = vmul.f32 %v2129_v17, %v2128_v28  ;;  %v2258_v14 = vstv %s4798_s6  ;;  %s2410_s6 = sadd.s32 46, %s4089_s22  ;;  %s2548_s8 = sadd.s32 39, %s4089_s22 }
 0x1fa   : > { %v2162_v57 = vpop.permute.xlu0 %2161  ;;  %v2105_v19 = vadd.f32 %v2103_v45, %v2096_v60  ;;  %v2106_v4 = vadd.f32 %v2104_v22, %v2097_v51  ;;  %v4772_v9 = vpop.permute.xlu2 %2318  ;;  %v2139_v58 = vmul.f32 %v2138_v39, %v2136_v48  ;;  %v2140_v35 = vmul.f32 %v2138_v39, %v2137_v15 }
 0x1fb   : > { %v4768_v3 = vsel %vm949_vm4, %v2162_v57, %v2164_v42  ;;  %v2249_v42 = vstv %s4796_s12  ;;  %s4845_s12 = sld [smem:[#allocation4 + %s2392_s7]]  ;;  %s2539_s7 = sadd.s32 31, %s4089_s22 }
 0x1fc   : > { %v2114_v62 = vadd.f32 %v2112_v5, %v2105_v19  ;;  %v2115_v0 = vadd.f32 %v2113_v10, %v2106_v4  ;;  %2179 = vst [vmem:[#allocation2] sm:$0xff] %v4768_v3  ;;  %v2223_v43 = vmul.f32 %v2222_v52, %v4768_v3 }
 0x1fe   : > { %v2123_v18 = vadd.f32 %v2121_v37, %v2114_v62  ;;  %v2124_v61 = vadd.f32 %v2122_v20, %v2115_v0 }
 0x200   : > { %v2132_v21 = vadd.f32 %v2130_v44, %v2123_v18  ;;  %v2133_v26 = vadd.f32 %v2131_v33, %v2124_v61  ;;  %v2170_v56 = vpop.permute.xlu1 %2169  ;;  %v2267_v18 = vstv %s4805_s29  ;;  %s4853_s29 = sld [smem:[#allocation4 + %s2410_s6]]  ;;  %s2557_s6 = sadd.s32 47, %s4089_s22 }
 0x201   : > { %v4783_v34 = vsel %vm949_vm4, %v2170_v56, %v4727_v46  ;;  %v2276_v56 = vstv %s4809_s11  ;;  %s4861_s11 = sld [smem:[#allocation4 + %s2419_s20]]  ;;  %s2566_s20 = sadd.s32 55, %s4089_s22 }
 0x202   : > { %v2168_v30 = vpop.permute.xlu0 %2167  ;;  %v2141_v53 = vadd.f32 %v2139_v58, %v2132_v21  ;;  %v2142_v36 = vadd.f32 %v2140_v35, %v2133_v26  ;;  %2181 = vst [vmem:[#allocation2 + $0x10] sm:$0x7f] %v4783_v34  ;;  %v4801_v7 = vpop.permute.xlu2 %2459 }
 0x203   : > { %v4789_v12 = vsel %vm949_vm4, %v4705_v16, %v2168_v30 }
 0x204   : > { %2180 = vst [vmem:[#allocation2 + $0x8] sm:$0xff] %v4789_v12  ;;  %v2224_v46 = vmul.f32 %v2222_v52, %v4789_v12  ;;  %v2225_v27 = vadd.f32 %v2223_v43, %v2141_v53  ;;  %v2285_v43 = vstv %s4817_s30  ;;  %s4868_s30 = sld [smem:[#allocation4 + %s2428_s28]]  ;;  %s2575_s28 = sadd.s32 63, %s4089_s22 }
 0x205   : > { %s4928_s22 = sld [smem:[#allocation4 + %s2575_s28]] }
 0x206   : > { %v2226_v38 = vadd.f32 %v2224_v46, %v2142_v36 }
 0x208   : > { %v2311_v16 = vpop.permute.xlu1 %2310 }
 0x20a   : > { %v2309_v24 = vpop.permute.xlu0 %2308  ;;  %v4824_v20 = vpop.permute.xlu2 %2465 }
 0x20b   : > { %v2229_v11 = vld [vmem:[#allocation2 + $0x1] sm:$0xff]  ;;  %v2230_v6 = vld [vmem:[#allocation2 + $0x9] sm:$0xff]  ;;  %v4813_v45 = vsel %vm1097_vm5, %v2309_v24, %v2311_v16  ;;  %v2369_v16 = vstv %s4820_s2  ;;  %s4872_s2 = sld [smem:[#allocation4 + %s2512_s5]]  ;;  %s5032_s5 = sadd.s32 1, %s3193_s14 }
 0x20c   : > { %v2238_v23 = vld [vmem:[#allocation2 + $0x2] sm:$0xff]  ;;  %v2232_v32 = vmul.f32 %v2231_v13, %v2229_v11  ;;  %v2233_v47 = vmul.f32 %v2231_v13, %v2230_v6  ;;  %v2239_v60 = vld [vmem:[#allocation2 + $0xa] sm:$0xff]  ;;  %s2872_s14 = sshll.u32 %s3137_s19, 5 }
 0x20d   : > { %v2247_v51 = vld [vmem:[#allocation2 + $0x3] sm:$0xff]  ;;  %v2248_v22 = vld [vmem:[#allocation2 + $0xb] sm:$0xff]  ;;  %v2241_v4 = vmul.f32 %v2240_v59, %v2238_v23  ;;  %v2242_v5 = vmul.f32 %v2240_v59, %v2239_v60  ;;  %v2378_v59 = vstv %s4827_s9  ;;  %s4877_s9 = sld [smem:[#allocation4 + %s2521_s10]] }
 0x20e   : > { %v2256_v41 = vld [vmem:[#allocation2 + $0x4] sm:$0xff]  ;;  %v2234_v57 = vadd.f32 %v2232_v32, %v2225_v27  ;;  %v2235_v19 = vadd.f32 %v2233_v47, %v2226_v38  ;;  %v2257_v29 = vld [vmem:[#allocation2 + $0xc] sm:$0xff]  ;;  %v2250_v62 = vmul.f32 %v2249_v42, %v2247_v51  ;;  %v2251_v0 = vmul.f32 %v2249_v42, %v2248_v22 }
 0x20f   : > { %v2265_v2 = vld [vmem:[#allocation2 + $0x5] sm:$0xff]  ;;  %v2259_v15 = vmul.f32 %v2258_v14, %v2256_v41  ;;  %v2266_v39 = vld [vmem:[#allocation2 + $0xd] sm:$0xff]  ;;  %v2260_v21 = vmul.f32 %v2258_v14, %v2257_v29  ;;  %v2370_v51 = vmul.f32 %v2369_v16, %v4813_v45 }
 0x210   : > { %v2274_v10 = vld [vmem:[#allocation2 + $0x6] sm:$0xff]  ;;  %v2243_v17 = vadd.f32 %v2241_v4, %v2234_v57  ;;  %v2244_v48 = vadd.f32 %v2242_v5, %v2235_v19  ;;  %v2317_v37 = vpop.permute.xlu1 %2316  ;;  %v2275_v26 = vld [vmem:[#allocation2 + $0xe] sm:$0xff]  ;;  %v2268_v53 = vmul.f32 %v2267_v18, %v2265_v2  ;;  %v2269_v36 = vmul.f32 %v2267_v18, %v2266_v39 }
 0x211   : > { %v2283_v28 = vld [vmem:[#allocation2 + $0x7] sm:$0xff]  ;;  %v4831_v61 = vsel %vm1097_vm5, %v2317_v37, %v4772_v9  ;;  %v2284_v58 = vld [vmem:[#allocation2 + $0xf] sm:$0xff]  ;;  %v2277_v27 = vmul.f32 %v2276_v56, %v2274_v10  ;;  %v2278_v38 = vmul.f32 %v2276_v56, %v2275_v26  ;;  %v2387_v57 = vstv %s4840_s13  ;;  %s4890_s13 = sld [smem:[#allocation4 + %s2530_s27]]  ;;  %s2703_s27 = scalar_lea.hbm %s5005_s4, %s2872_s14 }
 0x212   : > { %2326 = vst [vmem:[#allocation2] sm:$0xff] %v4813_v45  ;;  %v2315_v44 = vpop.permute.xlu0 %2314  ;;  %v2252_v33 = vadd.f32 %v2250_v62, %v2243_v17  ;;  %v2253_v52 = vadd.f32 %v2251_v0, %v2244_v48  ;;  %v2286_v11 = vmul.f32 %v2285_v43, %v2283_v28  ;;  %v2287_v6 = vmul.f32 %v2285_v43, %v2284_v58  ;;  %v4858_v42 = vpop.permute.xlu2 %2060  ;;  %s2706_s19 = sshll.u32 %s2703_s27, 4  ;;  %s2707_s19 = int_to_ptr.hbm [resolvable:$true] %s2706_s19 }
 0x213   : > { %v4836_v35 = vsel %vm1097_vm5, %v4751_v25, %v2315_v44  ;;  %2328 = vst [vmem:[#allocation2 + $0x10] sm:$0x7f] %v4831_v61  ;;  %v2396_v48 = vstv %s4845_s12  ;;  %s4897_s12 = sld [smem:[#allocation4 + %s2539_s7]]  ;;  %s2691_s7 = scalar_lea.sflag [#allocation5], %s230_s1 }
 0x214   : > { %v2261_v9 = vadd.f32 %v2259_v15, %v2252_v33  ;;  %v2262_v30 = vadd.f32 %v2260_v21, %v2253_v52  ;;  %2327 = vst [vmem:[#allocation2 + $0x8] sm:$0xff] %v4836_v35  ;;  %v2371_v22 = vmul.f32 %v2369_v16, %v4836_v35  ;;  %v2405_v52 = vstv %s4849_s0  ;;  %s4901_s0 = sld [smem:[#allocation4 + %s2548_s8]] }
 0x216   : > { %v2270_v25 = vadd.f32 %v2268_v53, %v2261_v9  ;;  %v2271_v46 = vadd.f32 %v2269_v36, %v2262_v30  ;;  %v2414_v36 = vstv %s4853_s29  ;;  %s4911_s29 = sld [smem:[#allocation4 + %s2557_s6]] }
 0x218   : > { %v2279_v13 = vadd.f32 %v2277_v27, %v2270_v25  ;;  %v2280_v24 = vadd.f32 %v2278_v38, %v2271_v46  ;;  %v2458_v23 = vpop.permute.xlu1 %2457 }
 0x21a   : > { %v2456_v32 = vpop.permute.xlu0 %2455  ;;  %v2288_v47 = vadd.f32 %v2286_v11, %v2279_v13  ;;  %v2289_v60 = vadd.f32 %v2287_v6, %v2280_v24 }
 0x21b   : > { %v2376_v41 = vld [vmem:[#allocation2 + $0x1] sm:$0xff]  ;;  %v2377_v14 = vld [vmem:[#allocation2 + $0x9] sm:$0xff]  ;;  %v4865_v29 = vsel %vm1245_vm6, %v2456_v32, %v2458_v23  ;;  %v2423_v23 = vstv %s4861_s11  ;;  %v4894_v32 = vpop.permute.xlu2 %2201  ;;  %s4923_s11 = sld [smem:[#allocation4 + %s2566_s20]] }
 0x21c   : > { %v2385_v2 = vld [vmem:[#allocation2 + $0x2] sm:$0xff]  ;;  %v2372_v19 = vadd.f32 %v2370_v51, %v2288_v47  ;;  %v2373_v4 = vadd.f32 %v2371_v22, %v2289_v60  ;;  %v2379_v5 = vmul.f32 %v2378_v59, %v2376_v41  ;;  %v2386_v10 = vld [vmem:[#allocation2 + $0xa] sm:$0xff]  ;;  %v2380_v28 = vmul.f32 %v2378_v59, %v2377_v14 }
 0x21d   : > { %v2394_v17 = vld [vmem:[#allocation2 + $0x3] sm:$0xff]  ;;  %v2388_v15 = vmul.f32 %v2387_v57, %v2385_v2  ;;  %v2395_v39 = vld [vmem:[#allocation2 + $0xb] sm:$0xff]  ;;  %v2389_v33 = vmul.f32 %v2387_v57, %v2386_v10  ;;  %v2432_v60 = vstv %s4868_s30  ;;  %v2516_v2 = vstv %s4872_s2  ;;  %s1470_s30 = sld [smem:[#allocation7 + %s5032_s5]] }
 0x21e   : > { %v2403_v62 = vld [vmem:[#allocation2 + $0x4] sm:$0xff]  ;;  %v2381_v37 = vadd.f32 %v2379_v5, %v2372_v19  ;;  %v2382_v44 = vadd.f32 %v2380_v28, %v2373_v4  ;;  %v2397_v58 = vmul.f32 %v2396_v48, %v2394_v17  ;;  %v2404_v56 = vld [vmem:[#allocation2 + $0xc] sm:$0xff]  ;;  %v2398_v53 = vmul.f32 %v2396_v48, %v2395_v39 }
 0x21f   : > { %v2412_v0 = vld [vmem:[#allocation2 + $0x5] sm:$0xff]  ;;  %v2406_v27 = vmul.f32 %v2405_v52, %v2403_v62  ;;  %v2413_v38 = vld [vmem:[#allocation2 + $0xd] sm:$0xff]  ;;  %v2407_v6 = vmul.f32 %v2405_v52, %v2404_v56  ;;  %v2043_v57 = vadd.f32 %v4725_v8, %v4633_v54  ;;  %v2042_v5 = vadd.f32 %v4732_v49, %v4640_v50 }
 0x220   : > { %v2421_v18 = vld [vmem:[#allocation2 + $0x6] sm:$0xff]  ;;  %v2390_v26 = vadd.f32 %v2388_v15, %v2381_v37  ;;  %v2464_v9 = vpop.permute.xlu1 %2463  ;;  %v2391_v30 = vadd.f32 %v2389_v33, %v2382_v44  ;;  %v2422_v16 = vld [vmem:[#allocation2 + $0xe] sm:$0xff]  ;;  %v2415_v59 = vmul.f32 %v2414_v36, %v2412_v0  ;;  %v2525_v48 = vstv %s4877_s9  ;;  %s2704_s9 = sshll.u32 %s4546_s23, 4  ;;  %s2705_s9 = int_to_ptr.vmem [resolvable:$true] %s2704_s9 }
 0x221   : > { %v2430_v21 = vld [vmem:[#allocation2 + $0x7] sm:$0xff]  ;;  %v4881_v43 = vsel %vm1245_vm6, %v2464_v9, %v4824_v20  ;;  %v2431_v13 = vld [vmem:[#allocation2 + $0xf] sm:$0xff]  ;;  %v2424_v22 = vmul.f32 %v2423_v23, %v2421_v18  ;;  %v2425_v14 = vmul.f32 %v2423_v23, %v2422_v16  ;;  %v2188_v62 = vadd.f32 %v4768_v3, %v4713_v55 }
 0x222   : > { %2473 = vst [vmem:[#allocation2] sm:$0xff] %v4865_v29  ;;  %v2462_v25 = vpop.permute.xlu0 %2461  ;;  %v2399_v46 = vadd.f32 %v2397_v58, %v2390_v26  ;;  %v2400_v11 = vadd.f32 %v2398_v53, %v2391_v30  ;;  %v2433_v4 = vmul.f32 %v2432_v60, %v2430_v21  ;;  %v2434_v17 = vmul.f32 %v2432_v60, %v2431_v13 }
 0x223   : > { %v4886_v24 = vsel %vm1245_vm6, %v4801_v7, %v2462_v25  ;;  %2475 = vst [vmem:[#allocation2 + $0x10] sm:$0x7f] %v4881_v43  ;;  %v2416_v7 = vmul.f32 %v2414_v36, %v2413_v38  ;;  %v2190_v0 = vadd.f32 %v4783_v34, %v2043_v57  ;;  %v2517_v37 = vmul.f32 %v2516_v2, %v4865_v29 }
 0x224   : > { %v2408_v20 = vadd.f32 %v2406_v27, %v2399_v46  ;;  %2474 = vst [vmem:[#allocation2 + $0x8] sm:$0xff] %v4886_v24  ;;  %v2409_v47 = vadd.f32 %v2407_v6, %v2400_v11  ;;  %v2189_v50 = vadd.f32 %v4789_v12, %v2042_v5  ;;  %v2518_v15 = vmul.f32 %v2516_v2, %v4886_v24  ;;  %v2208_v11 = vpop.permute.xlu2 %2207 }
 0x225   : > { %v2534_v33 = vstv %s4890_s13  ;;  %v2335_v55 = vadd.f32 %v4813_v45, %v2188_v62  ;;  %v2543_v9 = vstv %s4897_s12  ;;  %v2337_v25 = vadd.f32 %v4831_v61, %v2190_v0  ;;  %s3021_s13 = sshra.s32 %s2707_s19, 4  ;;  %s3022_s13 = int_to_ptr.hbm [resolvable:$true] %s3021_s13 }
 0x226   : > { %v2417_v51 = vadd.f32 %v2415_v59, %v2408_v20  ;;  %v2418_v41 = vadd.f32 %v2416_v7, %v2409_v47  ;;  %v2336_v12 = vadd.f32 %v4836_v35, %v2189_v50  ;;  %v2552_v20 = vstv %s4901_s0  ;;  %s3023_s8 = scalar_lea.hbm %s3022_s13, 32  ;;  %s3027_s0 = scalar_lea.hbm %s5005_s4, 64 }
 0x227   : > { %v2482_v45 = vadd.f32 %v4865_v29, %v2335_v55  ;;  %v2484_v7 = vadd.f32 %v4881_v43, %v2337_v25  ;;  %p3024_p0 = scmp.ne.s32.totalorder %s3022_s13, %s3023_s8  ;;  %p3028_p3 = scmp.lt.s32.totalorder %s3022_s13, %s5005_s4 }
 0x228   : > { %v2426_v19 = vadd.f32 %v2424_v22, %v2417_v51  ;;  %v4908_v10 = vpop.permute.xlu1 %2058  ;;  %v2427_v28 = vadd.f32 %v2425_v14, %v2418_v41  ;;  %v2483_v35 = vadd.f32 %v4886_v24, %v2336_v12  ;;  %v2561_v41 = vstv %s4911_s29  ;;  %p3029_p4 = scmp.lt.s32.totalorder %s3027_s0, %s3023_s8 }
 0x229   : > { %p3025_p1 = pnand %p3024_p0, %p3154_p5 }
 0x22a   : > { %v4916_v54 = vpop.permute.xlu0 %2056  ;;  %v2435_v8 = vadd.f32 %v2433_v4, %v2426_v19  ;;  %v2436_v49 = vadd.f32 %v2434_v17, %v2427_v28  ;;  %v2570_v4 = vstv %s4923_s11  ;;  %p3030_p7 = por %p3029_p4, %p3028_p3 }
 0x22b   : > { %v2523_v39 = vld [vmem:[#allocation2 + $0x1] sm:$0xff]  ;;  %v2524_v18 = vld [vmem:[#allocation2 + $0x9] sm:$0xff]  ;;  %p3026_p2 = pneg %p3025_p1 }
 0x22c   : > { %v2532_v44 = vld [vmem:[#allocation2 + $0x2] sm:$0xff]  ;;  %v2519_v3 = vadd.f32 %v2517_v37, %v2435_v8  ;;  %v2526_v34 = vmul.f32 %v2525_v48, %v2523_v39  ;;  %v2527_v52 = vmul.f32 %v2525_v48, %v2524_v18  ;;  %v2533_v21 = vld [vmem:[#allocation2 + $0xa] sm:$0xff]  ;;  %v2520_v56 = vadd.f32 %v2518_v15, %v2436_v49  ;;  %v2349_v39 = vpop.permute.xlu2 %2348 }
 0x22d   : > { %v2541_v26 = vld [vmem:[#allocation2 + $0x3] sm:$0xff]  ;;  %v2542_v58 = vld [vmem:[#allocation2 + $0xb] sm:$0xff]  ;;  %v2535_v27 = vmul.f32 %v2534_v33, %v2532_v44  ;;  %v2536_v23 = vmul.f32 %v2534_v33, %v2533_v21  ;;  %v2579_v48 = vstv %s4928_s22  ;;  %p3031_p8 = pnand %p3030_p7, %p3026_p2 }
 0x22e   : > { %v2550_v30 = vld [vmem:[#allocation2 + $0x4] sm:$0xff]  ;;  %v2551_v53 = vld [vmem:[#allocation2 + $0xc] sm:$0xff]  ;;  %v2528_v46 = vadd.f32 %v2526_v34, %v2519_v3  ;;  %v2529_v6 = vadd.f32 %v2527_v52, %v2520_v56  ;;  %v2544_v60 = vmul.f32 %v2543_v9, %v2541_v26  ;;  %v2545_v22 = vmul.f32 %v2543_v9, %v2542_v58 }
 0x22f   : > { %v2559_v36 = vld [vmem:[#allocation2 + $0x5] sm:$0xff]  ;;  %v2560_v38 = vld [vmem:[#allocation2 + $0xd] sm:$0xff]  ;;  %v2553_v2 = vmul.f32 %v2552_v20, %v2550_v30  ;;  %v2554_v19 = vmul.f32 %v2552_v20, %v2551_v53 }
 0x230   : > { %v2568_v16 = vld [vmem:[#allocation2 + $0x6] sm:$0xff]  ;;  %v2569_v13 = vld [vmem:[#allocation2 + $0xe] sm:$0xff]  ;;  %v2537_v61 = vadd.f32 %v2535_v27, %v2528_v46  ;;  %v2200_v29 = vpop.permute.xlu1 %2199  ;;  %v2538_v51 = vadd.f32 %v2536_v23, %v2529_v6  ;;  %v2562_v28 = vmul.f32 %v2561_v41, %v2559_v36  ;;  %v2563_v43 = vmul.f32 %v2561_v41, %v2560_v38 }
 0x231   : > { %v2577_v59 = vld [vmem:[#allocation2 + $0x7] sm:$0xff]  ;;  %v2578_v47 = vld [vmem:[#allocation2 + $0xf] sm:$0xff]  ;;  %v2571_v0 = vmul.f32 %v2570_v4, %v2568_v16  ;;  %v2572_v37 = vmul.f32 %v2570_v4, %v2569_v13  ;;  %v2064_v46 = vsel %vm801_vm3, %v4908_v10, %v4858_v42  ;;  %v2063_v6 = vsel %vm801_vm3, %v4686_v1, %v4916_v54 }
 0x232   : > { %2584 = vst [vmem:[#allocation2] sm:$0xff] %v2482_v45  ;;  %v2198_v14 = vpop.permute.xlu0 %2197  ;;  %v2546_v24 = vadd.f32 %v2544_v60, %v2537_v61  ;;  %v2547_v57 = vadd.f32 %v2545_v22, %v2538_v51  ;;  %v2580_v49 = vmul.f32 %v2579_v48, %v2577_v59  ;;  %v2581_v44 = vmul.f32 %v2579_v48, %v2578_v47 }
 0x233   : > { %2585 = vst [vmem:[#allocation2 + $0x8] sm:$0xff] %v2483_v35  ;;  %v2209_v12 = vsel %vm949_vm4, %v2198_v14, %v2200_v29  ;;  %v2069_v10 = vadd.f32 %v2063_v6, %v4695_v31 }
 0x234   : > { %2586 = vst [vmem:[#allocation2 + $0x10] sm:$0x7f] %v2484_v7  ;;  %v2555_v5 = vadd.f32 %v2553_v2, %v2546_v24  ;;  %v2556_v17 = vadd.f32 %v2554_v19, %v2547_v57  ;;  %v2355_v21 = vpop.permute.xlu2 %2354  ;;  %v2215_v36 = vadd.f32 %v2209_v12, %v4757_v63  ;;  %v2070_v63 = vadd.f32 %v2064_v46, %v4689_v40 }
 0x236   : > { %v2564_v62 = vadd.f32 %v2562_v28, %v2555_v5  ;;  %v2565_v8 = vadd.f32 %v2563_v43, %v2556_v17 }
 0x238   : > { %v2573_v50 = vadd.f32 %v2571_v0, %v2564_v62  ;;  %v2206_v15 = vpop.permute.xlu1 %2205  ;;  %v2574_v18 = vadd.f32 %v2572_v37, %v2565_v8 }
 0x239   : > { %v2211_v20 = vsel %vm949_vm4, %v2206_v15, %v2208_v11 }
 0x23a   : > { %v2204_v33 = vpop.permute.xlu0 %2203  ;;  %v4938_v55 = vadd.f32 %v2580_v49, %v2573_v50  ;;  %v4940_v3 = vadd.f32 %v2581_v44, %v2574_v18  ;;  %v2594_v30 = vld [vmem:[#allocation2 + $0x1] sm:$0xff]  ;;  %v2217_v1 = vadd.f32 %v2211_v20, %v2070_v63 }
 0x23b   : > { %v2595_v53 = vld [vmem:[#allocation2 + $0x9] sm:$0xff]  ;;  %v2596_v16 = vadd.f32 %v2594_v30, %v2482_v45  ;;  %v2210_v47 = vsel %vm949_vm4, %v4894_v32, %v2204_v33 }
 0x23c   : > { %v2496_v56 = vpop.permute.xlu2 %2495  ;;  %v2597_v13 = vadd.f32 %v2595_v53, %v2483_v35  ;;  %v2602_v7 = vld [vmem:[#allocation2 + $0x2] sm:$0xff]  ;;  %v2603_v42 = vld [vmem:[#allocation2 + $0xa] sm:$0xff]  ;;  %v2216_v11 = vadd.f32 %v2210_v47, %v2069_v10 }
 0x23d   : > { %v2604_v35 = vadd.f32 %v2602_v7, %v2596_v16  ;;  %v2610_v40 = vld [vmem:[#allocation2 + $0x3] sm:$0xff]  ;;  %v2611_v22 = vld [vmem:[#allocation2 + $0xb] sm:$0xff] }
 0x23e   : > { %v2605_v61 = vadd.f32 %v2603_v42, %v2597_v13  ;;  %v2618_v4 = vld [vmem:[#allocation2 + $0x4] sm:$0xff]  ;;  %v2619_v5 = vld [vmem:[#allocation2 + $0xc] sm:$0xff] }
 0x23f   : > { %v2612_v24 = vadd.f32 %v2610_v40, %v2604_v35  ;;  %v2626_v43 = vld [vmem:[#allocation2 + $0x5] sm:$0xff]  ;;  %v2627_v48 = vld [vmem:[#allocation2 + $0xd] sm:$0xff]  ;;  %v2658_v40 = vstv %s1470_s30 }
 0x240   : > { %v2347_v34 = vpop.permute.xlu1 %2346  ;;  %v2613_v31 = vadd.f32 %v2611_v22, %v2605_v61  ;;  %v2634_v37 = vld [vmem:[#allocation2 + $0x6] sm:$0xff]  ;;  %v2635_v50 = vld [vmem:[#allocation2 + $0xe] sm:$0xff] }
 0x241   : > { %v2620_v28 = vadd.f32 %v2618_v4, %v2612_v24  ;;  %v2642_v12 = vld [vmem:[#allocation2 + $0x7] sm:$0xff]  ;;  %v2643_v30 = vld [vmem:[#allocation2 + $0xf] sm:$0xff] }
 0x242   : > { %v2345_v52 = vpop.permute.xlu0 %2344  ;;  %v2621_v17 = vadd.f32 %v2619_v5, %v2613_v31 }
 0x243   : > { %v2356_v9 = vsel %vm1097_vm5, %v2345_v52, %v2347_v34  ;;  %v2628_v62 = vadd.f32 %v2626_v43, %v2620_v28 }
 0x244   : > { %v2362_v27 = vadd.f32 %v2356_v9, %v2215_v36  ;;  %v2502_v60 = vpop.permute.xlu2 %2501  ;;  %v2629_v0 = vadd.f32 %v2627_v48, %v2621_v17 }
 0x245   : > { %v2636_v33 = vadd.f32 %v2634_v37, %v2628_v62 }
 0x246   : > { %v2637_v34 = vadd.f32 %v2635_v50, %v2629_v0 }
 0x248   : > { %v2353_v26 = vpop.permute.xlu1 %2352  ;;  %v2645_v46 = vadd.f32 %v2643_v30, %v2637_v34 }
 0x249   : > { %v2358_v45 = vsel %vm1097_vm5, %v2353_v26, %v2355_v21 }
 0x24a   : > { %v2351_v58 = vpop.permute.xlu0 %2350  ;;  %v2364_v29 = vadd.f32 %v2358_v45, %v2217_v1  ;;  %v2651_v47 = vmul.f32 %v2645_v46, %v2645_v46 }
 0x24b   : > { %v2357_v54 = vsel %vm1097_vm5, %v2349_v39, %v2351_v58 }
 0x24c   : > { %v2363_v41 = vadd.f32 %v2357_v54, %v2216_v11  ;;  %v2653_v11 = vmul.f32 0.015625, %v2651_v47 }
 0x250   : > { %v2494_v25 = vpop.permute.xlu1 %2493 }
 0x252   : > { %v2492_v38 = vpop.permute.xlu0 %2491 }
 0x253   : > { %v2503_v23 = vsel %vm1245_vm6, %v2492_v38, %v2494_v25  ;;  %v2644_v25 = vadd.f32 %v2642_v12, %v2636_v33 }
 0x254   : > { %v2509_v59 = vadd.f32 %v2503_v23, %v2362_v27 }
 0x255   : > { %v2650_v63 = vmul.f32 %v2644_v25, %v2644_v25 }
 0x256   : > { %2587 = vst [vmem:[#allocation3] sm:$0xff] %v2509_v59 }
 0x258   : > { %v2500_v51 = vpop.permute.xlu1 %2499 }
 0x259   : > { %v2505_v32 = vsel %vm1245_vm6, %v2500_v51, %v2502_v60  ;;  %v2652_v60 = vmul.f32 0.015625, %v2650_v63 }
 0x25a   : > { %v2498_v14 = vpop.permute.xlu0 %2497  ;;  %v2511_v2 = vadd.f32 %v2505_v32, %v2364_v29 }
 0x25b   : > { %v2504_v57 = vsel %vm1245_vm6, %v2496_v56, %v2498_v14 }
 0x25c   : > { %v2510_v19 = vadd.f32 %v2504_v57, %v2363_v41  ;;  %2589 = vst [vmem:[#allocation3 + $0x10] sm:$0x7f] %v2511_v2 }
 0x25d   : > { %v2592_v8 = vld [vmem:[#allocation3] sm:$0xff] }
 0x25e   : > { %2588 = vst [vmem:[#allocation3 + $0x8] sm:$0xff] %v2510_v19 }
 0x265   : > { %v2593_v49 = vld [vmem:[#allocation3 + $0x8] sm:$0xff] }
 0x266   : > { %v2598_v15 = vld [vmem:[#allocation3 + $0x1] sm:$0xff]  ;;  %v2599_v39 = vld [vmem:[#allocation3 + $0x9] sm:$0xff] }
 0x267   : > { %v2600_v18 = vadd.f32 %v2598_v15, %v2592_v8  ;;  %v2601_v44 = vadd.f32 %v2599_v39, %v2593_v49  ;;  %v2606_v52 = vld [vmem:[#allocation3 + $0x2] sm:$0xff]  ;;  %v2607_v21 = vld [vmem:[#allocation3 + $0xa] sm:$0xff] }
 0x268   : > { %v2614_v56 = vld [vmem:[#allocation3 + $0x3] sm:$0xff]  ;;  %v2615_v9 = vld [vmem:[#allocation3 + $0xb] sm:$0xff] }
 0x269   : > { %v2608_v26 = vadd.f32 %v2606_v52, %v2600_v18  ;;  %v2609_v58 = vadd.f32 %v2607_v21, %v2601_v44  ;;  %v2622_v27 = vld [vmem:[#allocation3 + $0x4] sm:$0xff]  ;;  %v2623_v38 = vld [vmem:[#allocation3 + $0xc] sm:$0xff] }
 0x26a   : > { %v2630_v6 = vld [vmem:[#allocation3 + $0x5] sm:$0xff]  ;;  %v2631_v23 = vld [vmem:[#allocation3 + $0xd] sm:$0xff] }
 0x26b   : > { %v2616_v53 = vadd.f32 %v2614_v56, %v2608_v26  ;;  %v2617_v36 = vadd.f32 %v2615_v9, %v2609_v58  ;;  %v2638_v7 = vld [vmem:[#allocation3 + $0x6] sm:$0xff]  ;;  %v2639_v42 = vld [vmem:[#allocation3 + $0xe] sm:$0xff] }
 0x26c   : > { %v2646_v35 = vld [vmem:[#allocation3 + $0x7] sm:$0xff]  ;;  %v2647_v61 = vld [vmem:[#allocation3 + $0xf] sm:$0xff] }
 0x26d   : > { %v2624_v16 = vadd.f32 %v2622_v27, %v2616_v53  ;;  %v2625_v13 = vadd.f32 %v2623_v38, %v2617_v36 }
 0x26f   : > { %v2632_v20 = vadd.f32 %v2630_v6, %v2624_v16  ;;  %v2633_v59 = vadd.f32 %v2631_v23, %v2625_v13 }
 0x271   : > { %v2640_v10 = vadd.f32 %v2638_v7, %v2632_v20  ;;  %v2641_v45 = vadd.f32 %v2639_v42, %v2633_v59 }
 0x273   : > { %v2648_v1 = vadd.f32 %v2646_v35, %v2640_v10  ;;  %v2649_v54 = vadd.f32 %v2647_v61, %v2641_v45 }
 0x275   : > { %v2654_v29 = vsub.f32 %v2648_v1, %v2652_v60  ;;  %v2655_v51 = vsub.f32 %v2649_v54, %v2653_v11 }
 0x277   : > { %v2656_v22 = vmax.f32 %v2654_v29, 0.0  ;;  %v2657_v41 = vmax.f32 %v2655_v51, 0.0 }
 0x279   : > { %v2659_v32 = vmul.f32 %v2658_v40, %v2656_v22  ;;  %v2660_v14 = vmul.f32 %v2658_v40, %v2657_v41 }
 0x27b   : > { %2958 = vrsqrt.f32 %v2659_v32  ;;  %vm2669_vm1 = vweird.f32 %v2659_v32  ;;  %vm2679_vm3 = vweird.f32 %v2660_v14  ;;  %vm2661_vm5 = vcmp.gt.f32.partialorder %v2659_v32, 0.0 }
 0x27c   : > { %2960 = vrsqrt.f32 %v2660_v14  ;;  %vm2662_vm6 = vcmp.gt.f32.partialorder %v2660_v14, 0.0 }
 0x281   : > { %v2959_v24 = vpop.eup %2958 }
 0x282   : > { %v2961_v31 = vpop.eup %2960  ;;  %v2664_v2 = vmul.f32 %v2959_v24, %v2659_v32  ;;  %vm2670_vm15 = vweird.f32 %v2959_v24 }
 0x283   : > { %v2674_v57 = vmul.f32 %v2961_v31, %v2660_v14  ;;  %vm2680_vm0 = vweird.f32 %v2961_v31  ;;  %vm2671_vm2 = vmor %vm2669_vm1, %vm2670_vm15 }
 0x284   : > { %v2665_v19 = vmul.f32 %v2959_v24, %v2664_v2  ;;  %vm2681_vm4 = vmor %vm2679_vm3, %vm2680_vm0 }
 0x285   : > { %v2675_v4 = vmul.f32 %v2961_v31, %v2674_v57 }
 0x286   : > { %v2666_v5 = vmul.f32 0.5, %v2665_v19 }
 0x287   : > { %v2676_v28 = vmul.f32 0.5, %v2675_v4 }
 0x288   : > { %v2667_v17 = vsub.f32 1.5, %v2666_v5 }
 0x289   : > { %v2677_v43 = vsub.f32 1.5, %v2676_v28 }
 0x28a   : > { %v2668_v48 = vmul.f32 %v2959_v24, %v2667_v17 }
 0x28b   : > { %v2678_v62 = vmul.f32 %v2961_v31, %v2677_v43 }
 0x28c   : > { %v2672_v0 = vsel %vm2671_vm2, %v2959_v24, %v2668_v48 }
 0x28d   : > { %v2682_v8 = vsel %vm2681_vm4, %v2961_v31, %v2678_v62  ;;  %v2683_v37 = vmul.f32 %v2672_v0, %v4938_v55 }
 0x28e   : > { %v2684_v50 = vmul.f32 %v2682_v8, %v4940_v3 }
 0x28f   : > { %v2685_v49 = vsel %vm2661_vm5, %v2683_v37, 0.0 }
 0x290   : > { %v2686_v15 = vsel %vm2662_vm6, %v2684_v50, 0.0  ;;  %2861 = vst [vmem:[%s4546_s23 + $0x10] sm:$0xff] %v2685_v49 }
 0x291   : > { %2862 = vst [vmem:[%s4546_s23 + $0x18] sm:$0xff] %v2686_v15 }
 0x292   : > { %3034 = shalt.err (!%p3031_p8)
}
 0x293   : > { %s3089_s1 = smov 128   ;;  %s3090_s23 = smov 8  }
 0x294   : > { %2887 = dma.vmem_to_hbm [thread:$0]  (%p3154_p5), %s2705_s9, 512, %s2707_s19, %s2691_s7, %s3089_s1, %s3089_s1, %s3090_s23  }
 0x295 PF: > { %p2909_p9 = scmp.ge.s32.totalorder %s3077_s18, 2  ;;  %s2721_s28 = sand.u32 1, %s3065_s15  }
 0x296   : > { %s2722_s11 = scalar_lea.sflag [#allocation5], %s2721_s28 }
 0x297   : > { %p2900_p10 = pnand %p2909_p9, %p3158_p6 }
 0x299   : > { %p2901_p11 = pneg %p2900_p10 }
 0x29b   : > { %3060 = dma.done.wait (%p2901_p11), %s2722_s11, 512  }
 0x29c   : > { %3062 = vsyncadd (%p2901_p11), %s2722_s11, 4294966784  ;;  %p16_p12 = scmp.ge.s32.totalorder %s3141_s21, 4   ;;  %s5033_s15 = smov %s3069_s16 }
 0x29d   : > { %s5034_s16 = smov %s3073_s17  ;;  %s5035_s17 = smov %s3152_s24 }
 0x29e   : > { %s5036_s18 = smov %s3141_s21  ;;  %18 = sbr.rel (!%p16_p12) target bundleno = 9 (0x9), region = 86 }
 0x2a3   :  { %2728 = vsyncpa [#allocation5], 1 }
 0x2a4   :  { %2730 = vsyncpa [#allocation5 + $0x1], 1 }
 0x2a5   :  { %2731 = vsyncpa [#allocation6], 1 }
 0x2a6   :  { %2733 = vsyncpa [#allocation6 + $0x1], 1 }
 0x2a7   :  { %2734 = vsyncpa [#allocation8], 1 }

</bundles_post_ra>
